<compile_context>
chip_gen: v7x
topology: tpu7x:2x2x1
jax: 0.10.0
libtpu: 0.0.40
codegen_flags: <defaults>
</compile_context>

<pallas_src>
import functools

import jax
import jax.numpy as jnp
from jax.experimental import pallas as pl
from jax.experimental.pallas import tpu as pltpu


# ----------------------------------------------------------------------------
# In-kernel helpers
# ----------------------------------------------------------------------------
def _silu(x):
    return x * jax.nn.sigmoid(x)


def _conv_taps(src_ref, w_ref, b_ref, *, stride, lout, base):
    """1-D conv as K accumulated MXU matmuls over shifted slices of src_ref.

    src_ref : (Lsrc, Cin) f32 VMEM ref holding the (already zero-padded) signal.
    w_ref   : (K, Cin, Cout) bf16 weight ref (BN scale pre-folded).
    b_ref   : (1, Cout) f32 bias ref (BN shift pre-folded).
    base    : row of src_ref corresponding to padded-signal index 0.
    Returns f32 (lout, Cout).
    """
    K = w_ref.shape[0]
    acc = None
    for k in range(K):
        if stride == 1:
            idx = pl.ds(base + k, lout)
        else:
            idx = pl.ds(base + k, lout, stride)          # strided sublane read
        xk = src_ref[idx, :].astype(jnp.bfloat16)         # MXU operand in bf16
        d = jnp.dot(xk, w_ref[k], preferred_element_type=jnp.float32)
        acc = d if acc is None else acc + d
    return acc + b_ref[...]                               # f32 epilogue


def _store_padded(dst_ref, value, pad):
    """Write `value` into rows [pad, pad+len) of dst_ref, zeroing the pad rows."""
    dst_ref[...] = jnp.zeros(dst_ref.shape, dst_ref.dtype)
    dst_ref[pl.ds(pad, value.shape[0]), :] = value


# ----------------------------------------------------------------------------
# Fused whole-encoder kernel (one grid step == one batch element)
# ----------------------------------------------------------------------------
def _encoder_kernel(x_ref, *refs, seq_len, n_params):
    params = refs[:n_params]
    out_ref = refs[n_params]
    bufs = refs[n_params + 1:]          # [a0, h1, y1, h2, y2, h3, y3, h4, y4]

    it = iter(params)
    w_in, b_in = next(it), next(it)

    # conv_in (K=7, s=1, p=3; x_ref is pre-padded by 3) + SiLU
    a0 = _silu(_conv_taps(x_ref, w_in, b_in, stride=1, lout=seq_len, base=0))
    src = bufs[0]
    _store_padded(src, a0, pad=1)

    lcur = seq_len
    for i in range(4):
        w1, b1 = next(it), next(it)
        w2, b2 = next(it), next(it)
        w3, b3 = next(it), next(it)
        h_ref = bufs[1 + 2 * i]
        y_ref = bufs[2 + 2 * i]
        lout = lcur // 2

        # conv1 (K=3, s=2, p=1) with BN1 folded, then SiLU
        h = _silu(_conv_taps(src, w1, b1, stride=2, lout=lout, base=0))
        _store_padded(h_ref, h, pad=1)

        # conv3 skip (K=3, s=2, p=1), BN2 scale folded in
        skip = _conv_taps(src, w3, b3, stride=2, lout=lout, base=0)

        # conv2 (K=3, s=1, p=1) + skip, BN2 folded, then SiLU
        y = _silu(_conv_taps(h_ref, w2, b2, stride=1, lout=lout, base=0) + skip)
        _store_padded(y_ref, y, pad=1)

        src = y_ref
        lcur = lout

    # fused conv_mu / conv_logvar head: K=4, s=1, p=0 (src alloc pad 1 -> base=1)
    w_h, b_h = next(it), next(it)
    k_head = w_h.shape[0]
    head = _conv_taps(src, w_h, b_h, stride=1, lout=lcur - k_head + 1, base=1)
    out_ref[...] = head.astype(out_ref.dtype)


# ----------------------------------------------------------------------------
# One-time parameter packing (BN folding + MXU-friendly repack), outside jit
# ----------------------------------------------------------------------------
def bn_scale_shift(gamma, beta, mean, var, eps=1e-5):
    scale = gamma / jnp.sqrt(var + eps)
    shift = beta - mean * scale
    return scale, shift


def _repack_w(w, scale=None):
    """(Cout, Cin, K) PyTorch layout -> (K, Cin, Cout) bf16, optional Cout scale."""
    w = jnp.transpose(w, (2, 1, 0)).astype(jnp.float32)
    if scale is not None:
        w = w * scale
    return w.astype(jnp.bfloat16)


def pack_encoder_params(params, eps=1e-5):
    packed = {}
    w, b = params["conv_in"]
    packed["conv_in"] = (_repack_w(w), b.reshape(1, -1).astype(jnp.float32))
    for i in range(4):
        p = params[f"res_down{i + 1}"]
        s1, t1 = bn_scale_shift(*p["bn1"], eps=eps)
        s2, t2 = bn_scale_shift(*p["bn2"], eps=eps)
        w1, b1 = p["conv1"]
        w2, b2 = p["conv2"]
        w3, b3 = p["conv3"]
        packed[f"block{i + 1}"] = {
            "w1": _repack_w(w1, s1),
            "b1": (b1 * s1 + t1).reshape(1, -1).astype(jnp.float32),
            "w2": _repack_w(w2, s2),
            "b2": (b2 * s2 + t2).reshape(1, -1).astype(jnp.float32),
            "w3": _repack_w(w3, s2),
            "b3": (b3 * s2).reshape(1, -1).astype(jnp.float32),
        }
    wmu, bmu = params["conv_mu"]
    wlv, blv = params["conv_logvar"]
    w_head = jnp.concatenate(
        [jnp.transpose(wmu, (2, 1, 0)), jnp.transpose(wlv, (2, 1, 0))], axis=-1
    ).astype(jnp.bfloat16)
    b_head = jnp.concatenate([bmu, blv]).reshape(1, -1).astype(jnp.float32)
    packed["head"] = (w_head, b_head)
    return packed


# ----------------------------------------------------------------------------
# Forward pass wrapper (single pallas_call)
# ----------------------------------------------------------------------------
def _const_spec(arr):
    zeros = (0,) * arr.ndim
    return pl.BlockSpec(arr.shape, lambda b: zeros)


def encoder_forward(packed, x_ncl):
    """x_ncl: (B, Cin, L) f32 NCL (PyTorch layout). Returns (z, mu, logvar) in NCL."""
    B, cin, L = x_ncl.shape
    # Compute layout per batch element is (L, C): channels on lanes, length on sublanes.
    x_blc = jnp.transpose(x_ncl, (0, 2, 1)).astype(jnp.float32)
    pad_in = (packed["conv_in"][0].shape[0] - 1) // 2          # 3 for K=7
    x_pad = jnp.pad(x_blc, ((0, 0), (pad_in, pad_in), (0, 0)))

    flat = [packed["conv_in"][0], packed["conv_in"][1]]
    for i in range(4):
        blk = packed[f"block{i + 1}"]
        flat += [blk["w1"], blk["b1"], blk["w2"], blk["b2"], blk["w3"], blk["b3"]]
    flat += [packed["head"][0], packed["head"][1]]

    ch = packed["conv_in"][0].shape[-1]
    k_head = packed["head"][0].shape[0]
    two_latent = packed["head"][0].shape[-1]
    l_head = L // 16 - k_head + 1

    # Per-program VMEM scratch: every intermediate activation, padded by 1 row.
    scratch = [pltpu.VMEM((L + 2, ch), jnp.float32)]
    lcur, ccur = L, ch
    for _ in range(4):
        lout, cout = lcur // 2, ccur * 2
        scratch.append(pltpu.VMEM((lout + 2, ccur), jnp.float32))   # h (cmid == cin)
        scratch.append(pltpu.VMEM((lout + 2, cout), jnp.float32))   # block output
        lcur, ccur = lout, cout

    in_specs = [pl.BlockSpec((None, L + 2 * pad_in, cin), lambda b: (b, 0, 0))]
    in_specs += [_const_spec(a) for a in flat]

    kernel = functools.partial(_encoder_kernel, seq_len=L, n_params=len(flat))
    out = pl.pallas_call(
        kernel,
        out_shape=jax.ShapeDtypeStruct((B, l_head, two_latent), jnp.float32),
        grid=(B,),
        in_specs=in_specs,
        out_specs=pl.BlockSpec((None, l_head, two_latent), lambda b: (b, 0, 0)),
        scratch_shapes=scratch,
        compiler_params=pltpu.CompilerParams(
            dimension_semantics=("parallel",)),
    )(x_pad, *flat)

    latent = two_latent // 2
    mu = jnp.transpose(out[:, :, :latent], (0, 2, 1))        # (B, latent_dim, l_head)
    logvar = jnp.transpose(out[:, :, latent:], (0, 2, 1))
    z = mu                                                    # eval mode: z = mu
    return z, mu, logvar


# ----------------------------------------------------------------------------
# Parameter init (deterministic, PyTorch-like shapes)
# ----------------------------------------------------------------------------
def init_conv(key, cout, cin, k):
    kw, kb = jax.random.split(key)
    fan_in = cin * k
    bound = 1.0 / (fan_in ** 0.5)
    w = jax.random.uniform(kw, (cout, cin, k), jnp.float32, -bound, bound)
    b = jax.random.uniform(kb, (cout,), jnp.float32, -bound, bound)
    return w, b


def init_bn(key, c):
    k1, k2 = jax.random.split(key)
    gamma = 1.0 + 0.1 * jax.random.normal(k1, (c,), jnp.float32)
    beta = 0.1 * jax.random.normal(k2, (c,), jnp.float32)
    running_mean = jnp.zeros((c,), jnp.float32)
    running_var = jnp.ones((c,), jnp.float32)
    return gamma, beta, running_mean, running_var


def init_encoder_params(key, in_channels, ch, latent_dim):
    keys = jax.random.split(key, 7)
    params = {"conv_in": init_conv(keys[0], ch, in_channels, 7)}
    cin = ch
    for i in range(4):
        cout = ch * (2 ** (i + 1))
        kk = jax.random.split(keys[1 + i], 5)
        params[f"res_down{i + 1}"] = {
            "conv1": init_conv(kk[0], cout // 2, cin, 3),
            "bn1": init_bn(kk[1], cout // 2),
            "conv2": init_conv(kk[2], cout, cout // 2, 3),
            "bn2": init_bn(kk[3], cout),
            "conv3": init_conv(kk[4], cout, cin, 3),
        }
        cin = cout
    params["conv_mu"] = init_conv(keys[5], latent_dim, cin, 4)
    params["conv_logvar"] = init_conv(keys[6], latent_dim, cin, 4)
    return params


# ----------------------------------------------------------------------------
if __name__ == "__main__":
    key = jax.random.PRNGKey(0)
    kx, kp = jax.random.split(key)

    B, in_channels, L = 2, 4, 64
    ch, latent_dim = 8, 16

    x = jax.random.normal(kx, (B, in_channels, L), jnp.float32)   # NCL like PyTorch
    params = init_encoder_params(kp, in_channels, ch, latent_dim)
    packed = pack_encoder_params(params)      # one-time BN fold + repack (not in hot path)

    fwd = jax.jit(encoder_forward)
    z, mu, logvar = fwd(packed, x)
    jax.block_until_ready((z, mu, logvar))

    # L: 64 -> (4 stride-2 downsamples) -> 4 -> conv(k=4, pad=0) -> 1
    assert z.shape == (B, latent_dim, 1), z.shape
    assert mu.shape == (B, latent_dim, 1) and logvar.shape == (B, latent_dim, 1)
    assert bool(jnp.all(jnp.isfinite(z))) and bool(jnp.all(jnp.isfinite(logvar)))

    print("KERNEL_OK")
</pallas_src>

<mosaic_0001>
module attributes {stable_mosaic.version = 11 : i64} {
  func.func @_encoder_kernel(%arg0: i32, %arg1: memref<1x70x4xf32, #tpu.memory_space<vmem>>, %arg2: memref<7x4x8xbf16, #tpu.memory_space<vmem>>, %arg3: memref<1x8xf32, #tpu.memory_space<vmem>>, %arg4: memref<3x8x8xbf16, #tpu.memory_space<vmem>>, %arg5: memref<1x8xf32, #tpu.memory_space<vmem>>, %arg6: memref<3x8x16xbf16, #tpu.memory_space<vmem>>, %arg7: memref<1x16xf32, #tpu.memory_space<vmem>>, %arg8: memref<3x8x16xbf16, #tpu.memory_space<vmem>>, %arg9: memref<1x16xf32, #tpu.memory_space<vmem>>, %arg10: memref<3x16x16xbf16, #tpu.memory_space<vmem>>, %arg11: memref<1x16xf32, #tpu.memory_space<vmem>>, %arg12: memref<3x16x32xbf16, #tpu.memory_space<vmem>>, %arg13: memref<1x32xf32, #tpu.memory_space<vmem>>, %arg14: memref<3x16x32xbf16, #tpu.memory_space<vmem>>, %arg15: memref<1x32xf32, #tpu.memory_space<vmem>>, %arg16: memref<3x32x32xbf16, #tpu.memory_space<vmem>>, %arg17: memref<1x32xf32, #tpu.memory_space<vmem>>, %arg18: memref<3x32x64xbf16, #tpu.memory_space<vmem>>, %arg19: memref<1x64xf32, #tpu.memory_space<vmem>>, %arg20: memref<3x32x64xbf16, #tpu.memory_space<vmem>>, %arg21: memref<1x64xf32, #tpu.memory_space<vmem>>, %arg22: memref<3x64x64xbf16, #tpu.memory_space<vmem>>, %arg23: memref<1x64xf32, #tpu.memory_space<vmem>>, %arg24: memref<3x64x128xbf16, #tpu.memory_space<vmem>>, %arg25: memref<1x128xf32, #tpu.memory_space<vmem>>, %arg26: memref<3x64x128xbf16, #tpu.memory_space<vmem>>, %arg27: memref<1x128xf32, #tpu.memory_space<vmem>>, %arg28: memref<4x128x32xbf16, #tpu.memory_space<vmem>>, %arg29: memref<1x32xf32, #tpu.memory_space<vmem>>, %arg30: memref<1x1x32xf32, #tpu.memory_space<vmem>>, %arg31: memref<66x8xf32, #tpu.memory_space<vmem>>, %arg32: memref<34x8xf32, #tpu.memory_space<vmem>>, %arg33: memref<34x16xf32, #tpu.memory_space<vmem>>, %arg34: memref<18x16xf32, #tpu.memory_space<vmem>>, %arg35: memref<18x32xf32, #tpu.memory_space<vmem>>, %arg36: memref<10x32xf32, #tpu.memory_space<vmem>>, %arg37: memref<10x64xf32, #tpu.memory_space<vmem>>, %arg38: memref<6x64xf32, #tpu.memory_space<vmem>>, %arg39: memref<6x128xf32, #tpu.memory_space<vmem>>) attributes {dimension_semantics = [#tpu.dimension_semantics<parallel>], iteration_bounds = array<i64: 2>, scalar_prefetch = 0 : i64, scratch_operands = 9 : i64, tpu.core_type = #tpu.core_type<tc>, window_params = [{transform_indices = @transform_0, window_bounds = array<i64: 1, 70, 4>}, {pipeline_mode = #tpu.pipeline_mode<synchronous>, transform_indices = @transform_1, window_bounds = array<i64: 7, 4, 8>}, {pipeline_mode = #tpu.pipeline_mode<synchronous>, transform_indices = @transform_2, window_bounds = array<i64: 1, 8>}, {pipeline_mode = #tpu.pipeline_mode<synchronous>, transform_indices = @transform_3, window_bounds = array<i64: 3, 8, 8>}, {pipeline_mode = #tpu.pipeline_mode<synchronous>, transform_indices = @transform_4, window_bounds = array<i64: 1, 8>}, {pipeline_mode = #tpu.pipeline_mode<synchronous>, transform_indices = @transform_5, window_bounds = array<i64: 3, 8, 16>}, {pipeline_mode = #tpu.pipeline_mode<synchronous>, transform_indices = @transform_6, window_bounds = array<i64: 1, 16>}, {pipeline_mode = #tpu.pipeline_mode<synchronous>, transform_indices = @transform_7, window_bounds = array<i64: 3, 8, 16>}, {pipeline_mode = #tpu.pipeline_mode<synchronous>, transform_indices = @transform_8, window_bounds = array<i64: 1, 16>}, {pipeline_mode = #tpu.pipeline_mode<synchronous>, transform_indices = @transform_9, window_bounds = array<i64: 3, 16, 16>}, {pipeline_mode = #tpu.pipeline_mode<synchronous>, transform_indices = @transform_10, window_bounds = array<i64: 1, 16>}, {pipeline_mode = #tpu.pipeline_mode<synchronous>, transform_indices = @transform_11, window_bounds = array<i64: 3, 16, 32>}, {pipeline_mode = #tpu.pipeline_mode<synchronous>, transform_indices = @transform_12, window_bounds = array<i64: 1, 32>}, {pipeline_mode = #tpu.pipeline_mode<synchronous>, transform_indices = @transform_13, window_bounds = array<i64: 3, 16, 32>}, {pipeline_mode = #tpu.pipeline_mode<synchronous>, transform_indices = @transform_14, window_bounds = array<i64: 1, 32>}, {pipeline_mode = #tpu.pipeline_mode<synchronous>, transform_indices = @transform_15, window_bounds = array<i64: 3, 32, 32>}, {pipeline_mode = #tpu.pipeline_mode<synchronous>, transform_indices = @transform_16, window_bounds = array<i64: 1, 32>}, {pipeline_mode = #tpu.pipeline_mode<synchronous>, transform_indices = @transform_17, window_bounds = array<i64: 3, 32, 64>}, {pipeline_mode = #tpu.pipeline_mode<synchronous>, transform_indices = @transform_18, window_bounds = array<i64: 1, 64>}, {pipeline_mode = #tpu.pipeline_mode<synchronous>, transform_indices = @transform_19, window_bounds = array<i64: 3, 32, 64>}, {pipeline_mode = #tpu.pipeline_mode<synchronous>, transform_indices = @transform_20, window_bounds = array<i64: 1, 64>}, {pipeline_mode = #tpu.pipeline_mode<synchronous>, transform_indices = @transform_21, window_bounds = array<i64: 3, 64, 64>}, {pipeline_mode = #tpu.pipeline_mode<synchronous>, transform_indices = @transform_22, window_bounds = array<i64: 1, 64>}, {pipeline_mode = #tpu.pipeline_mode<synchronous>, transform_indices = @transform_23, window_bounds = array<i64: 3, 64, 128>}, {pipeline_mode = #tpu.pipeline_mode<synchronous>, transform_indices = @transform_24, window_bounds = array<i64: 1, 128>}, {pipeline_mode = #tpu.pipeline_mode<synchronous>, transform_indices = @transform_25, window_bounds = array<i64: 3, 64, 128>}, {pipeline_mode = #tpu.pipeline_mode<synchronous>, transform_indices = @transform_26, window_bounds = array<i64: 1, 128>}, {pipeline_mode = #tpu.pipeline_mode<synchronous>, transform_indices = @transform_27, window_bounds = array<i64: 4, 128, 32>}, {pipeline_mode = #tpu.pipeline_mode<synchronous>, transform_indices = @transform_28, window_bounds = array<i64: 1, 32>}, {transform_indices = @transform_29, window_bounds = array<i64: 1, 1, 32>}]} {
    %c0 = arith.constant 0 : index
    %c0_0 = arith.constant 0 : index
    %c0_1 = arith.constant 0 : index
    %0 = vector.load %arg1[%c0, %c0_0, %c0_1] : memref<1x70x4xf32, #tpu.memory_space<vmem>>, vector<1x64x4xf32>
    %1 = vector.shape_cast %0 : vector<1x64x4xf32> to vector<64x4xf32>
    %2 = arith.truncf %1 : vector<64x4xf32> to vector<64x4xbf16>
    %c0_2 = arith.constant 0 : index
    %c0_3 = arith.constant 0 : index
    %c0_4 = arith.constant 0 : index
    %3 = vector.load %arg2[%c0_2, %c0_3, %c0_4] : memref<7x4x8xbf16, #tpu.memory_space<vmem>>, vector<1x4x8xbf16>
    %4 = vector.shape_cast %3 : vector<1x4x8xbf16> to vector<4x8xbf16>
    %cst = arith.constant dense<0.000000e+00> : vector<64x8xf32>
    %5 = tpu.matmul %2, %4, %cst {dimension_numbers = #tpu.dot_dimension_numbers<[1], [0], [0], [1], [0, 0, 1, 1], [], []>} : vector<64x4xbf16>, vector<4x8xbf16>, vector<64x8xf32> -> vector<64x8xf32>
    %c0_5 = arith.constant 0 : index
    %c1 = arith.constant 1 : index
    %c0_6 = arith.constant 0 : index
    %6 = vector.load %arg1[%c0_5, %c1, %c0_6] : memref<1x70x4xf32, #tpu.memory_space<vmem>>, vector<1x64x4xf32>
    %7 = vector.shape_cast %6 : vector<1x64x4xf32> to vector<64x4xf32>
    %8 = arith.truncf %7 : vector<64x4xf32> to vector<64x4xbf16>
    %c1_7 = arith.constant 1 : index
    %c0_8 = arith.constant 0 : index
    %c0_9 = arith.constant 0 : index
    %9 = vector.load %arg2[%c1_7, %c0_8, %c0_9] : memref<7x4x8xbf16, #tpu.memory_space<vmem>>, vector<1x4x8xbf16>
    %10 = vector.shape_cast %9 : vector<1x4x8xbf16> to vector<4x8xbf16>
    %cst_10 = arith.constant dense<0.000000e+00> : vector<64x8xf32>
    %11 = tpu.matmul %8, %10, %cst_10 {dimension_numbers = #tpu.dot_dimension_numbers<[1], [0], [0], [1], [0, 0, 1, 1], [], []>} : vector<64x4xbf16>, vector<4x8xbf16>, vector<64x8xf32> -> vector<64x8xf32>
    %12 = arith.addf %5, %11 : vector<64x8xf32>
    %c0_11 = arith.constant 0 : index
    %c2 = arith.constant 2 : index
    %c0_12 = arith.constant 0 : index
    %13 = vector.load %arg1[%c0_11, %c2, %c0_12] : memref<1x70x4xf32, #tpu.memory_space<vmem>>, vector<1x64x4xf32>
    %14 = vector.shape_cast %13 : vector<1x64x4xf32> to vector<64x4xf32>
    %15 = arith.truncf %14 : vector<64x4xf32> to vector<64x4xbf16>
    %c2_13 = arith.constant 2 : index
    %c0_14 = arith.constant 0 : index
    %c0_15 = arith.constant 0 : index
    %16 = vector.load %arg2[%c2_13, %c0_14, %c0_15] : memref<7x4x8xbf16, #tpu.memory_space<vmem>>, vector<1x4x8xbf16>
    %17 = vector.shape_cast %16 : vector<1x4x8xbf16> to vector<4x8xbf16>
    %cst_16 = arith.constant dense<0.000000e+00> : vector<64x8xf32>
    %18 = tpu.matmul %15, %17, %cst_16 {dimension_numbers = #tpu.dot_dimension_numbers<[1], [0], [0], [1], [0, 0, 1, 1], [], []>} : vector<64x4xbf16>, vector<4x8xbf16>, vector<64x8xf32> -> vector<64x8xf32>
    %19 = arith.addf %12, %18 : vector<64x8xf32>
    %c0_17 = arith.constant 0 : index
    %c3 = arith.constant 3 : index
    %c0_18 = arith.constant 0 : index
    %20 = vector.load %arg1[%c0_17, %c3, %c0_18] : memref<1x70x4xf32, #tpu.memory_space<vmem>>, vector<1x64x4xf32>
    %21 = vector.shape_cast %20 : vector<1x64x4xf32> to vector<64x4xf32>
    %22 = arith.truncf %21 : vector<64x4xf32> to vector<64x4xbf16>
    %c3_19 = arith.constant 3 : index
    %c0_20 = arith.constant 0 : index
    %c0_21 = arith.constant 0 : index
    %23 = vector.load %arg2[%c3_19, %c0_20, %c0_21] : memref<7x4x8xbf16, #tpu.memory_space<vmem>>, vector<1x4x8xbf16>
    %24 = vector.shape_cast %23 : vector<1x4x8xbf16> to vector<4x8xbf16>
    %cst_22 = arith.constant dense<0.000000e+00> : vector<64x8xf32>
    %25 = tpu.matmul %22, %24, %cst_22 {dimension_numbers = #tpu.dot_dimension_numbers<[1], [0], [0], [1], [0, 0, 1, 1], [], []>} : vector<64x4xbf16>, vector<4x8xbf16>, vector<64x8xf32> -> vector<64x8xf32>
    %26 = arith.addf %19, %25 : vector<64x8xf32>
    %c0_23 = arith.constant 0 : index
    %c4 = arith.constant 4 : index
    %c0_24 = arith.constant 0 : index
    %27 = vector.load %arg1[%c0_23, %c4, %c0_24] : memref<1x70x4xf32, #tpu.memory_space<vmem>>, vector<1x64x4xf32>
    %28 = vector.shape_cast %27 : vector<1x64x4xf32> to vector<64x4xf32>
    %29 = arith.truncf %28 : vector<64x4xf32> to vector<64x4xbf16>
    %c4_25 = arith.constant 4 : index
    %c0_26 = arith.constant 0 : index
    %c0_27 = arith.constant 0 : index
    %30 = vector.load %arg2[%c4_25, %c0_26, %c0_27] : memref<7x4x8xbf16, #tpu.memory_space<vmem>>, vector<1x4x8xbf16>
    %31 = vector.shape_cast %30 : vector<1x4x8xbf16> to vector<4x8xbf16>
    %cst_28 = arith.constant dense<0.000000e+00> : vector<64x8xf32>
    %32 = tpu.matmul %29, %31, %cst_28 {dimension_numbers = #tpu.dot_dimension_numbers<[1], [0], [0], [1], [0, 0, 1, 1], [], []>} : vector<64x4xbf16>, vector<4x8xbf16>, vector<64x8xf32> -> vector<64x8xf32>
    %33 = arith.addf %26, %32 : vector<64x8xf32>
    %c0_29 = arith.constant 0 : index
    %c5 = arith.constant 5 : index
    %c0_30 = arith.constant 0 : index
    %34 = vector.load %arg1[%c0_29, %c5, %c0_30] : memref<1x70x4xf32, #tpu.memory_space<vmem>>, vector<1x64x4xf32>
    %35 = vector.shape_cast %34 : vector<1x64x4xf32> to vector<64x4xf32>
    %36 = arith.truncf %35 : vector<64x4xf32> to vector<64x4xbf16>
    %c5_31 = arith.constant 5 : index
    %c0_32 = arith.constant 0 : index
    %c0_33 = arith.constant 0 : index
    %37 = vector.load %arg2[%c5_31, %c0_32, %c0_33] : memref<7x4x8xbf16, #tpu.memory_space<vmem>>, vector<1x4x8xbf16>
    %38 = vector.shape_cast %37 : vector<1x4x8xbf16> to vector<4x8xbf16>
    %cst_34 = arith.constant dense<0.000000e+00> : vector<64x8xf32>
    %39 = tpu.matmul %36, %38, %cst_34 {dimension_numbers = #tpu.dot_dimension_numbers<[1], [0], [0], [1], [0, 0, 1, 1], [], []>} : vector<64x4xbf16>, vector<4x8xbf16>, vector<64x8xf32> -> vector<64x8xf32>
    %40 = arith.addf %33, %39 : vector<64x8xf32>
    %c0_35 = arith.constant 0 : index
    %c6 = arith.constant 6 : index
    %c0_36 = arith.constant 0 : index
    %41 = vector.load %arg1[%c0_35, %c6, %c0_36] : memref<1x70x4xf32, #tpu.memory_space<vmem>>, vector<1x64x4xf32>
    %42 = vector.shape_cast %41 : vector<1x64x4xf32> to vector<64x4xf32>
    %43 = arith.truncf %42 : vector<64x4xf32> to vector<64x4xbf16>
    %c6_37 = arith.constant 6 : index
    %c0_38 = arith.constant 0 : index
    %c0_39 = arith.constant 0 : index
    %44 = vector.load %arg2[%c6_37, %c0_38, %c0_39] : memref<7x4x8xbf16, #tpu.memory_space<vmem>>, vector<1x4x8xbf16>
    %45 = vector.shape_cast %44 : vector<1x4x8xbf16> to vector<4x8xbf16>
    %cst_40 = arith.constant dense<0.000000e+00> : vector<64x8xf32>
    %46 = tpu.matmul %43, %45, %cst_40 {dimension_numbers = #tpu.dot_dimension_numbers<[1], [0], [0], [1], [0, 0, 1, 1], [], []>} : vector<64x4xbf16>, vector<4x8xbf16>, vector<64x8xf32> -> vector<64x8xf32>
    %47 = arith.addf %40, %46 : vector<64x8xf32>
    %c0_41 = arith.constant 0 : index
    %c0_42 = arith.constant 0 : index
    %48 = vector.load %arg3[%c0_41, %c0_42] : memref<1x8xf32, #tpu.memory_space<vmem>>, vector<1x8xf32>
    %49 = vector.broadcast %48 : vector<1x8xf32> to vector<64x8xf32>
    %50 = arith.addf %47, %49 : vector<64x8xf32>
    %51 = arith.negf %50 : vector<64x8xf32>
    %52 = math.exp %51 : vector<64x8xf32>
    %cst_43 = arith.constant 1.000000e+00 : f32
    %53 = vector.broadcast %cst_43 : f32 to vector<64x8xf32>
    %54 = arith.addf %53, %52 : vector<64x8xf32>
    %55 = arith.divf %53, %54 : vector<64x8xf32>
    %56 = arith.mulf %50, %55 : vector<64x8xf32>
    %cst_44 = arith.constant 0.000000e+00 : f32
    %57 = vector.broadcast %cst_44 : f32 to vector<66x8xf32>
    %c0_45 = arith.constant 0 : index
    %c0_46 = arith.constant 0 : index
    %58 = vector.load %arg31[%c0_45, %c0_46] : memref<66x8xf32, #tpu.memory_space<vmem>>, vector<66x8xf32>
    tpu.vector_store %arg31[%c0_45, %c0_46], %57 {strides = array<i32>} : memref<66x8xf32, #tpu.memory_space<vmem>>, vector<66x8xf32>,
    %c1_47 = arith.constant 1 : index
    %c0_48 = arith.constant 0 : index
    %59 = vector.load %arg31[%c1_47, %c0_48] : memref<66x8xf32, #tpu.memory_space<vmem>>, vector<64x8xf32>
    tpu.vector_store %arg31[%c1_47, %c0_48], %56 {strides = array<i32>} : memref<66x8xf32, #tpu.memory_space<vmem>>, vector<64x8xf32>,
    %c0_49 = arith.constant 0 : index
    %c0_50 = arith.constant 0 : index
    %60 = tpu.strided_load %arg31[%c0_49, %c0_50] {strides = array<i32: 2, 1>} : memref<66x8xf32, #tpu.memory_space<vmem>>, vector<32x8xf32>
    %61 = arith.truncf %60 : vector<32x8xf32> to vector<32x8xbf16>
    %c0_51 = arith.constant 0 : index
    %c0_52 = arith.constant 0 : index
    %c0_53 = arith.constant 0 : index
    %62 = vector.load %arg4[%c0_51, %c0_52, %c0_53] : memref<3x8x8xbf16, #tpu.memory_space<vmem>>, vector<1x8x8xbf16>
    %63 = vector.shape_cast %62 : vector<1x8x8xbf16> to vector<8x8xbf16>
    %cst_54 = arith.constant dense<0.000000e+00> : vector<32x8xf32>
    %64 = tpu.matmul %61, %63, %cst_54 {dimension_numbers = #tpu.dot_dimension_numbers<[1], [0], [0], [1], [0, 0, 1, 1], [], []>} : vector<32x8xbf16>, vector<8x8xbf16>, vector<32x8xf32> -> vector<32x8xf32>
    %c1_55 = arith.constant 1 : index
    %c0_56 = arith.constant 0 : index
    %65 = tpu.strided_load %arg31[%c1_55, %c0_56] {strides = array<i32: 2, 1>} : memref<66x8xf32, #tpu.memory_space<vmem>>, vector<32x8xf32>
    %66 = arith.truncf %65 : vector<32x8xf32> to vector<32x8xbf16>
    %c1_57 = arith.constant 1 : index
    %c0_58 = arith.constant 0 : index
    %c0_59 = arith.constant 0 : index
    %67 = vector.load %arg4[%c1_57, %c0_58, %c0_59] : memref<3x8x8xbf16, #tpu.memory_space<vmem>>, vector<1x8x8xbf16>
    %68 = vector.shape_cast %67 : vector<1x8x8xbf16> to vector<8x8xbf16>
    %cst_60 = arith.constant dense<0.000000e+00> : vector<32x8xf32>
    %69 = tpu.matmul %66, %68, %cst_60 {dimension_numbers = #tpu.dot_dimension_numbers<[1], [0], [0], [1], [0, 0, 1, 1], [], []>} : vector<32x8xbf16>, vector<8x8xbf16>, vector<32x8xf32> -> vector<32x8xf32>
    %70 = arith.addf %64, %69 : vector<32x8xf32>
    %c2_61 = arith.constant 2 : index
    %c0_62 = arith.constant 0 : index
    %71 = tpu.strided_load %arg31[%c2_61, %c0_62] {strides = array<i32: 2, 1>} : memref<66x8xf32, #tpu.memory_space<vmem>>, vector<32x8xf32>
    %72 = arith.truncf %71 : vector<32x8xf32> to vector<32x8xbf16>
    %c2_63 = arith.constant 2 : index
    %c0_64 = arith.constant 0 : index
    %c0_65 = arith.constant 0 : index
    %73 = vector.load %arg4[%c2_63, %c0_64, %c0_65] : memref<3x8x8xbf16, #tpu.memory_space<vmem>>, vector<1x8x8xbf16>
    %74 = vector.shape_cast %73 : vector<1x8x8xbf16> to vector<8x8xbf16>
    %cst_66 = arith.constant dense<0.000000e+00> : vector<32x8xf32>
    %75 = tpu.matmul %72, %74, %cst_66 {dimension_numbers = #tpu.dot_dimension_numbers<[1], [0], [0], [1], [0, 0, 1, 1], [], []>} : vector<32x8xbf16>, vector<8x8xbf16>, vector<32x8xf32> -> vector<32x8xf32>
    %76 = arith.addf %70, %75 : vector<32x8xf32>
    %c0_67 = arith.constant 0 : index
    %c0_68 = arith.constant 0 : index
    %77 = vector.load %arg5[%c0_67, %c0_68] : memref<1x8xf32, #tpu.memory_space<vmem>>, vector<1x8xf32>
    %78 = vector.broadcast %77 : vector<1x8xf32> to vector<32x8xf32>
    %79 = arith.addf %76, %78 : vector<32x8xf32>
    %80 = arith.negf %79 : vector<32x8xf32>
    %81 = math.exp %80 : vector<32x8xf32>
    %cst_69 = arith.constant 1.000000e+00 : f32
    %82 = vector.broadcast %cst_69 : f32 to vector<32x8xf32>
    %83 = arith.addf %82, %81 : vector<32x8xf32>
    %84 = arith.divf %82, %83 : vector<32x8xf32>
    %85 = arith.mulf %79, %84 : vector<32x8xf32>
    %cst_70 = arith.constant 0.000000e+00 : f32
    %86 = vector.broadcast %cst_70 : f32 to vector<34x8xf32>
    %c0_71 = arith.constant 0 : index
    %c0_72 = arith.constant 0 : index
    %87 = vector.load %arg32[%c0_71, %c0_72] : memref<34x8xf32, #tpu.memory_space<vmem>>, vector<34x8xf32>
    tpu.vector_store %arg32[%c0_71, %c0_72], %86 {strides = array<i32>} : memref<34x8xf32, #tpu.memory_space<vmem>>, vector<34x8xf32>,
    %c1_73 = arith.constant 1 : index
    %c0_74 = arith.constant 0 : index
    %88 = vector.load %arg32[%c1_73, %c0_74] : memref<34x8xf32, #tpu.memory_space<vmem>>, vector<32x8xf32>
    tpu.vector_store %arg32[%c1_73, %c0_74], %85 {strides = array<i32>} : memref<34x8xf32, #tpu.memory_space<vmem>>, vector<32x8xf32>,
    %c0_75 = arith.constant 0 : index
    %c0_76 = arith.constant 0 : index
    %89 = tpu.strided_load %arg31[%c0_75, %c0_76] {strides = array<i32: 2, 1>} : memref<66x8xf32, #tpu.memory_space<vmem>>, vector<32x8xf32>
    %90 = arith.truncf %89 : vector<32x8xf32> to vector<32x8xbf16>
    %c0_77 = arith.constant 0 : index
    %c0_78 = arith.constant 0 : index
    %c0_79 = arith.constant 0 : index
    %91 = vector.load %arg8[%c0_77, %c0_78, %c0_79] : memref<3x8x16xbf16, #tpu.memory_space<vmem>>, vector<1x8x16xbf16>
    %92 = vector.shape_cast %91 : vector<1x8x16xbf16> to vector<8x16xbf16>
    %cst_80 = arith.constant dense<0.000000e+00> : vector<32x16xf32>
    %93 = tpu.matmul %90, %92, %cst_80 {dimension_numbers = #tpu.dot_dimension_numbers<[1], [0], [0], [1], [0, 0, 1, 1], [], []>} : vector<32x8xbf16>, vector<8x16xbf16>, vector<32x16xf32> -> vector<32x16xf32>
    %c1_81 = arith.constant 1 : index
    %c0_82 = arith.constant 0 : index
    %94 = tpu.strided_load %arg31[%c1_81, %c0_82] {strides = array<i32: 2, 1>} : memref<66x8xf32, #tpu.memory_space<vmem>>, vector<32x8xf32>
    %95 = arith.truncf %94 : vector<32x8xf32> to vector<32x8xbf16>
    %c1_83 = arith.constant 1 : index
    %c0_84 = arith.constant 0 : index
    %c0_85 = arith.constant 0 : index
    %96 = vector.load %arg8[%c1_83, %c0_84, %c0_85] : memref<3x8x16xbf16, #tpu.memory_space<vmem>>, vector<1x8x16xbf16>
    %97 = vector.shape_cast %96 : vector<1x8x16xbf16> to vector<8x16xbf16>
    %cst_86 = arith.constant dense<0.000000e+00> : vector<32x16xf32>
    %98 = tpu.matmul %95, %97, %cst_86 {dimension_numbers = #tpu.dot_dimension_numbers<[1], [0], [0], [1], [0, 0, 1, 1], [], []>} : vector<32x8xbf16>, vector<8x16xbf16>, vector<32x16xf32> -> vector<32x16xf32>
    %99 = arith.addf %93, %98 : vector<32x16xf32>
    %c2_87 = arith.constant 2 : index
    %c0_88 = arith.constant 0 : index
    %100 = tpu.strided_load %arg31[%c2_87, %c0_88] {strides = array<i32: 2, 1>} : memref<66x8xf32, #tpu.memory_space<vmem>>, vector<32x8xf32>
    %101 = arith.truncf %100 : vector<32x8xf32> to vector<32x8xbf16>
    %c2_89 = arith.constant 2 : index
    %c0_90 = arith.constant 0 : index
    %c0_91 = arith.constant 0 : index
    %102 = vector.load %arg8[%c2_89, %c0_90, %c0_91] : memref<3x8x16xbf16, #tpu.memory_space<vmem>>, vector<1x8x16xbf16>
    %103 = vector.shape_cast %102 : vector<1x8x16xbf16> to vector<8x16xbf16>
    %cst_92 = arith.constant dense<0.000000e+00> : vector<32x16xf32>
    %104 = tpu.matmul %101, %103, %cst_92 {dimension_numbers = #tpu.dot_dimension_numbers<[1], [0], [0], [1], [0, 0, 1, 1], [], []>} : vector<32x8xbf16>, vector<8x16xbf16>, vector<32x16xf32> -> vector<32x16xf32>
    %105 = arith.addf %99, %104 : vector<32x16xf32>
    %c0_93 = arith.constant 0 : index
    %c0_94 = arith.constant 0 : index
    %106 = vector.load %arg9[%c0_93, %c0_94] : memref<1x16xf32, #tpu.memory_space<vmem>>, vector<1x16xf32>
    %107 = vector.broadcast %106 : vector<1x16xf32> to vector<32x16xf32>
    %108 = arith.addf %105, %107 : vector<32x16xf32>
    %c0_95 = arith.constant 0 : index
    %c0_96 = arith.constant 0 : index
    %109 = vector.load %arg32[%c0_95, %c0_96] : memref<34x8xf32, #tpu.memory_space<vmem>>, vector<32x8xf32>
    %110 = arith.truncf %109 : vector<32x8xf32> to vector<32x8xbf16>
    %c0_97 = arith.constant 0 : index
    %c0_98 = arith.constant 0 : index
    %c0_99 = arith.constant 0 : index
    %111 = vector.load %arg6[%c0_97, %c0_98, %c0_99] : memref<3x8x16xbf16, #tpu.memory_space<vmem>>, vector<1x8x16xbf16>
    %112 = vector.shape_cast %111 : vector<1x8x16xbf16> to vector<8x16xbf16>
    %cst_100 = arith.constant dense<0.000000e+00> : vector<32x16xf32>
    %113 = tpu.matmul %110, %112, %cst_100 {dimension_numbers = #tpu.dot_dimension_numbers<[1], [0], [0], [1], [0, 0, 1, 1], [], []>} : vector<32x8xbf16>, vector<8x16xbf16>, vector<32x16xf32> -> vector<32x16xf32>
    %c1_101 = arith.constant 1 : index
    %c0_102 = arith.constant 0 : index
    %114 = vector.load %arg32[%c1_101, %c0_102] : memref<34x8xf32, #tpu.memory_space<vmem>>, vector<32x8xf32>
    %115 = arith.truncf %114 : vector<32x8xf32> to vector<32x8xbf16>
    %c1_103 = arith.constant 1 : index
    %c0_104 = arith.constant 0 : index
    %c0_105 = arith.constant 0 : index
    %116 = vector.load %arg6[%c1_103, %c0_104, %c0_105] : memref<3x8x16xbf16, #tpu.memory_space<vmem>>, vector<1x8x16xbf16>
    %117 = vector.shape_cast %116 : vector<1x8x16xbf16> to vector<8x16xbf16>
    %cst_106 = arith.constant dense<0.000000e+00> : vector<32x16xf32>
    %118 = tpu.matmul %115, %117, %cst_106 {dimension_numbers = #tpu.dot_dimension_numbers<[1], [0], [0], [1], [0, 0, 1, 1], [], []>} : vector<32x8xbf16>, vector<8x16xbf16>, vector<32x16xf32> -> vector<32x16xf32>
    %119 = arith.addf %113, %118 : vector<32x16xf32>
    %c2_107 = arith.constant 2 : index
    %c0_108 = arith.constant 0 : index
    %120 = vector.load %arg32[%c2_107, %c0_108] : memref<34x8xf32, #tpu.memory_space<vmem>>, vector<32x8xf32>
    %121 = arith.truncf %120 : vector<32x8xf32> to vector<32x8xbf16>
    %c2_109 = arith.constant 2 : index
    %c0_110 = arith.constant 0 : index
    %c0_111 = arith.constant 0 : index
    %122 = vector.load %arg6[%c2_109, %c0_110, %c0_111] : memref<3x8x16xbf16, #tpu.memory_space<vmem>>, vector<1x8x16xbf16>
    %123 = vector.shape_cast %122 : vector<1x8x16xbf16> to vector<8x16xbf16>
    %cst_112 = arith.constant dense<0.000000e+00> : vector<32x16xf32>
    %124 = tpu.matmul %121, %123, %cst_112 {dimension_numbers = #tpu.dot_dimension_numbers<[1], [0], [0], [1], [0, 0, 1, 1], [], []>} : vector<32x8xbf16>, vector<8x16xbf16>, vector<32x16xf32> -> vector<32x16xf32>
    %125 = arith.addf %119, %124 : vector<32x16xf32>
    %c0_113 = arith.constant 0 : index
    %c0_114 = arith.constant 0 : index
    %126 = vector.load %arg7[%c0_113, %c0_114] : memref<1x16xf32, #tpu.memory_space<vmem>>, vector<1x16xf32>
    %127 = vector.broadcast %126 : vector<1x16xf32> to vector<32x16xf32>
    %128 = arith.addf %125, %127 : vector<32x16xf32>
    %129 = arith.addf %128, %108 : vector<32x16xf32>
    %130 = arith.negf %129 : vector<32x16xf32>
    %131 = math.exp %130 : vector<32x16xf32>
    %cst_115 = arith.constant 1.000000e+00 : f32
    %132 = vector.broadcast %cst_115 : f32 to vector<32x16xf32>
    %133 = arith.addf %132, %131 : vector<32x16xf32>
    %134 = arith.divf %132, %133 : vector<32x16xf32>
    %135 = arith.mulf %129, %134 : vector<32x16xf32>
    %cst_116 = arith.constant 0.000000e+00 : f32
    %136 = vector.broadcast %cst_116 : f32 to vector<34x16xf32>
    %c0_117 = arith.constant 0 : index
    %c0_118 = arith.constant 0 : index
    %137 = vector.load %arg33[%c0_117, %c0_118] : memref<34x16xf32, #tpu.memory_space<vmem>>, vector<34x16xf32>
    tpu.vector_store %arg33[%c0_117, %c0_118], %136 {strides = array<i32>} : memref<34x16xf32, #tpu.memory_space<vmem>>, vector<34x16xf32>,
    %c1_119 = arith.constant 1 : index
    %c0_120 = arith.constant 0 : index
    %138 = vector.load %arg33[%c1_119, %c0_120] : memref<34x16xf32, #tpu.memory_space<vmem>>, vector<32x16xf32>
    tpu.vector_store %arg33[%c1_119, %c0_120], %135 {strides = array<i32>} : memref<34x16xf32, #tpu.memory_space<vmem>>, vector<32x16xf32>,
    %c0_121 = arith.constant 0 : index
    %c0_122 = arith.constant 0 : index
    %139 = tpu.strided_load %arg33[%c0_121, %c0_122] {strides = array<i32: 2, 1>} : memref<34x16xf32, #tpu.memory_space<vmem>>, vector<16x16xf32>
    %140 = arith.truncf %139 : vector<16x16xf32> to vector<16x16xbf16>
    %c0_123 = arith.constant 0 : index
    %c0_124 = arith.constant 0 : index
    %c0_125 = arith.constant 0 : index
    %141 = vector.load %arg10[%c0_123, %c0_124, %c0_125] : memref<3x16x16xbf16, #tpu.memory_space<vmem>>, vector<1x16x16xbf16>
    %142 = vector.shape_cast %141 : vector<1x16x16xbf16> to vector<16x16xbf16>
    %cst_126 = arith.constant dense<0.000000e+00> : vector<16x16xf32>
    %143 = tpu.matmul %140, %142, %cst_126 {dimension_numbers = #tpu.dot_dimension_numbers<[1], [0], [0], [1], [0, 0, 1, 1], [], []>} : vector<16x16xbf16>, vector<16x16xbf16>, vector<16x16xf32> -> vector<16x16xf32>
    %c1_127 = arith.constant 1 : index
    %c0_128 = arith.constant 0 : index
    %144 = tpu.strided_load %arg33[%c1_127, %c0_128] {strides = array<i32: 2, 1>} : memref<34x16xf32, #tpu.memory_space<vmem>>, vector<16x16xf32>
    %145 = arith.truncf %144 : vector<16x16xf32> to vector<16x16xbf16>
    %c1_129 = arith.constant 1 : index
    %c0_130 = arith.constant 0 : index
    %c0_131 = arith.constant 0 : index
    %146 = vector.load %arg10[%c1_129, %c0_130, %c0_131] : memref<3x16x16xbf16, #tpu.memory_space<vmem>>, vector<1x16x16xbf16>
    %147 = vector.shape_cast %146 : vector<1x16x16xbf16> to vector<16x16xbf16>
    %cst_132 = arith.constant dense<0.000000e+00> : vector<16x16xf32>
    %148 = tpu.matmul %145, %147, %cst_132 {dimension_numbers = #tpu.dot_dimension_numbers<[1], [0], [0], [1], [0, 0, 1, 1], [], []>} : vector<16x16xbf16>, vector<16x16xbf16>, vector<16x16xf32> -> vector<16x16xf32>
    %149 = arith.addf %143, %148 : vector<16x16xf32>
    %c2_133 = arith.constant 2 : index
    %c0_134 = arith.constant 0 : index
    %150 = tpu.strided_load %arg33[%c2_133, %c0_134] {strides = array<i32: 2, 1>} : memref<34x16xf32, #tpu.memory_space<vmem>>, vector<16x16xf32>
    %151 = arith.truncf %150 : vector<16x16xf32> to vector<16x16xbf16>
    %c2_135 = arith.constant 2 : index
    %c0_136 = arith.constant 0 : index
    %c0_137 = arith.constant 0 : index
    %152 = vector.load %arg10[%c2_135, %c0_136, %c0_137] : memref<3x16x16xbf16, #tpu.memory_space<vmem>>, vector<1x16x16xbf16>
    %153 = vector.shape_cast %152 : vector<1x16x16xbf16> to vector<16x16xbf16>
    %cst_138 = arith.constant dense<0.000000e+00> : vector<16x16xf32>
    %154 = tpu.matmul %151, %153, %cst_138 {dimension_numbers = #tpu.dot_dimension_numbers<[1], [0], [0], [1], [0, 0, 1, 1], [], []>} : vector<16x16xbf16>, vector<16x16xbf16>, vector<16x16xf32> -> vector<16x16xf32>
    %155 = arith.addf %149, %154 : vector<16x16xf32>
    %c0_139 = arith.constant 0 : index
    %c0_140 = arith.constant 0 : index
    %156 = vector.load %arg11[%c0_139, %c0_140] : memref<1x16xf32, #tpu.memory_space<vmem>>, vector<1x16xf32>
    %157 = vector.broadcast %156 : vector<1x16xf32> to vector<16x16xf32>
    %158 = arith.addf %155, %157 : vector<16x16xf32>
    %159 = arith.negf %158 : vector<16x16xf32>
    %160 = math.exp %159 : vector<16x16xf32>
    %cst_141 = arith.constant 1.000000e+00 : f32
    %161 = vector.broadcast %cst_141 : f32 to vector<16x16xf32>
    %162 = arith.addf %161, %160 : vector<16x16xf32>
    %163 = arith.divf %161, %162 : vector<16x16xf32>
    %164 = arith.mulf %158, %163 : vector<16x16xf32>
    %cst_142 = arith.constant 0.000000e+00 : f32
    %165 = vector.broadcast %cst_142 : f32 to vector<18x16xf32>
    %c0_143 = arith.constant 0 : index
    %c0_144 = arith.constant 0 : index
    %166 = vector.load %arg34[%c0_143, %c0_144] : memref<18x16xf32, #tpu.memory_space<vmem>>, vector<18x16xf32>
    tpu.vector_store %arg34[%c0_143, %c0_144], %165 {strides = array<i32>} : memref<18x16xf32, #tpu.memory_space<vmem>>, vector<18x16xf32>,
    %c1_145 = arith.constant 1 : index
    %c0_146 = arith.constant 0 : index
    %167 = vector.load %arg34[%c1_145, %c0_146] : memref<18x16xf32, #tpu.memory_space<vmem>>, vector<16x16xf32>
    tpu.vector_store %arg34[%c1_145, %c0_146], %164 {strides = array<i32>} : memref<18x16xf32, #tpu.memory_space<vmem>>, vector<16x16xf32>,
    %c0_147 = arith.constant 0 : index
    %c0_148 = arith.constant 0 : index
    %168 = tpu.strided_load %arg33[%c0_147, %c0_148] {strides = array<i32: 2, 1>} : memref<34x16xf32, #tpu.memory_space<vmem>>, vector<16x16xf32>
    %169 = arith.truncf %168 : vector<16x16xf32> to vector<16x16xbf16>
    %c0_149 = arith.constant 0 : index
    %c0_150 = arith.constant 0 : index
    %c0_151 = arith.constant 0 : index
    %170 = vector.load %arg14[%c0_149, %c0_150, %c0_151] : memref<3x16x32xbf16, #tpu.memory_space<vmem>>, vector<1x16x32xbf16>
    %171 = vector.shape_cast %170 : vector<1x16x32xbf16> to vector<16x32xbf16>
    %cst_152 = arith.constant dense<0.000000e+00> : vector<16x32xf32>
    %172 = tpu.matmul %169, %171, %cst_152 {dimension_numbers = #tpu.dot_dimension_numbers<[1], [0], [0], [1], [0, 0, 1, 1], [], []>} : vector<16x16xbf16>, vector<16x32xbf16>, vector<16x32xf32> -> vector<16x32xf32>
    %c1_153 = arith.constant 1 : index
    %c0_154 = arith.constant 0 : index
    %173 = tpu.strided_load %arg33[%c1_153, %c0_154] {strides = array<i32: 2, 1>} : memref<34x16xf32, #tpu.memory_space<vmem>>, vector<16x16xf32>
    %174 = arith.truncf %173 : vector<16x16xf32> to vector<16x16xbf16>
    %c1_155 = arith.constant 1 : index
    %c0_156 = arith.constant 0 : index
    %c0_157 = arith.constant 0 : index
    %175 = vector.load %arg14[%c1_155, %c0_156, %c0_157] : memref<3x16x32xbf16, #tpu.memory_space<vmem>>, vector<1x16x32xbf16>
    %176 = vector.shape_cast %175 : vector<1x16x32xbf16> to vector<16x32xbf16>
    %cst_158 = arith.constant dense<0.000000e+00> : vector<16x32xf32>
    %177 = tpu.matmul %174, %176, %cst_158 {dimension_numbers = #tpu.dot_dimension_numbers<[1], [0], [0], [1], [0, 0, 1, 1], [], []>} : vector<16x16xbf16>, vector<16x32xbf16>, vector<16x32xf32> -> vector<16x32xf32>
    %178 = arith.addf %172, %177 : vector<16x32xf32>
    %c2_159 = arith.constant 2 : index
    %c0_160 = arith.constant 0 : index
    %179 = tpu.strided_load %arg33[%c2_159, %c0_160] {strides = array<i32: 2, 1>} : memref<34x16xf32, #tpu.memory_space<vmem>>, vector<16x16xf32>
    %180 = arith.truncf %179 : vector<16x16xf32> to vector<16x16xbf16>
    %c2_161 = arith.constant 2 : index
    %c0_162 = arith.constant 0 : index
    %c0_163 = arith.constant 0 : index
    %181 = vector.load %arg14[%c2_161, %c0_162, %c0_163] : memref<3x16x32xbf16, #tpu.memory_space<vmem>>, vector<1x16x32xbf16>
    %182 = vector.shape_cast %181 : vector<1x16x32xbf16> to vector<16x32xbf16>
    %cst_164 = arith.constant dense<0.000000e+00> : vector<16x32xf32>
    %183 = tpu.matmul %180, %182, %cst_164 {dimension_numbers = #tpu.dot_dimension_numbers<[1], [0], [0], [1], [0, 0, 1, 1], [], []>} : vector<16x16xbf16>, vector<16x32xbf16>, vector<16x32xf32> -> vector<16x32xf32>
    %184 = arith.addf %178, %183 : vector<16x32xf32>
    %c0_165 = arith.constant 0 : index
    %c0_166 = arith.constant 0 : index
    %185 = vector.load %arg15[%c0_165, %c0_166] : memref<1x32xf32, #tpu.memory_space<vmem>>, vector<1x32xf32>
    %186 = vector.broadcast %185 : vector<1x32xf32> to vector<16x32xf32>
    %187 = arith.addf %184, %186 : vector<16x32xf32>
    %c0_167 = arith.constant 0 : index
    %c0_168 = arith.constant 0 : index
    %188 = vector.load %arg34[%c0_167, %c0_168] : memref<18x16xf32, #tpu.memory_space<vmem>>, vector<16x16xf32>
    %189 = arith.truncf %188 : vector<16x16xf32> to vector<16x16xbf16>
    %c0_169 = arith.constant 0 : index
    %c0_170 = arith.constant 0 : index
    %c0_171 = arith.constant 0 : index
    %190 = vector.load %arg12[%c0_169, %c0_170, %c0_171] : memref<3x16x32xbf16, #tpu.memory_space<vmem>>, vector<1x16x32xbf16>
    %191 = vector.shape_cast %190 : vector<1x16x32xbf16> to vector<16x32xbf16>
    %cst_172 = arith.constant dense<0.000000e+00> : vector<16x32xf32>
    %192 = tpu.matmul %189, %191, %cst_172 {dimension_numbers = #tpu.dot_dimension_numbers<[1], [0], [0], [1], [0, 0, 1, 1], [], []>} : vector<16x16xbf16>, vector<16x32xbf16>, vector<16x32xf32> -> vector<16x32xf32>
    %c1_173 = arith.constant 1 : index
    %c0_174 = arith.constant 0 : index
    %193 = vector.load %arg34[%c1_173, %c0_174] : memref<18x16xf32, #tpu.memory_space<vmem>>, vector<16x16xf32>
    %194 = arith.truncf %193 : vector<16x16xf32> to vector<16x16xbf16>
    %c1_175 = arith.constant 1 : index
    %c0_176 = arith.constant 0 : index
    %c0_177 = arith.constant 0 : index
    %195 = vector.load %arg12[%c1_175, %c0_176, %c0_177] : memref<3x16x32xbf16, #tpu.memory_space<vmem>>, vector<1x16x32xbf16>
    %196 = vector.shape_cast %195 : vector<1x16x32xbf16> to vector<16x32xbf16>
    %cst_178 = arith.constant dense<0.000000e+00> : vector<16x32xf32>
    %197 = tpu.matmul %194, %196, %cst_178 {dimension_numbers = #tpu.dot_dimension_numbers<[1], [0], [0], [1], [0, 0, 1, 1], [], []>} : vector<16x16xbf16>, vector<16x32xbf16>, vector<16x32xf32> -> vector<16x32xf32>
    %198 = arith.addf %192, %197 : vector<16x32xf32>
    %c2_179 = arith.constant 2 : index
    %c0_180 = arith.constant 0 : index
    %199 = vector.load %arg34[%c2_179, %c0_180] : memref<18x16xf32, #tpu.memory_space<vmem>>, vector<16x16xf32>
    %200 = arith.truncf %199 : vector<16x16xf32> to vector<16x16xbf16>
    %c2_181 = arith.constant 2 : index
    %c0_182 = arith.constant 0 : index
    %c0_183 = arith.constant 0 : index
    %201 = vector.load %arg12[%c2_181, %c0_182, %c0_183] : memref<3x16x32xbf16, #tpu.memory_space<vmem>>, vector<1x16x32xbf16>
    %202 = vector.shape_cast %201 : vector<1x16x32xbf16> to vector<16x32xbf16>
    %cst_184 = arith.constant dense<0.000000e+00> : vector<16x32xf32>
    %203 = tpu.matmul %200, %202, %cst_184 {dimension_numbers = #tpu.dot_dimension_numbers<[1], [0], [0], [1], [0, 0, 1, 1], [], []>} : vector<16x16xbf16>, vector<16x32xbf16>, vector<16x32xf32> -> vector<16x32xf32>
    %204 = arith.addf %198, %203 : vector<16x32xf32>
    %c0_185 = arith.constant 0 : index
    %c0_186 = arith.constant 0 : index
    %205 = vector.load %arg13[%c0_185, %c0_186] : memref<1x32xf32, #tpu.memory_space<vmem>>, vector<1x32xf32>
    %206 = vector.broadcast %205 : vector<1x32xf32> to vector<16x32xf32>
    %207 = arith.addf %204, %206 : vector<16x32xf32>
    %208 = arith.addf %207, %187 : vector<16x32xf32>
    %209 = arith.negf %208 : vector<16x32xf32>
    %210 = math.exp %209 : vector<16x32xf32>
    %cst_187 = arith.constant 1.000000e+00 : f32
    %211 = vector.broadcast %cst_187 : f32 to vector<16x32xf32>
    %212 = arith.addf %211, %210 : vector<16x32xf32>
    %213 = arith.divf %211, %212 : vector<16x32xf32>
    %214 = arith.mulf %208, %213 : vector<16x32xf32>
    %cst_188 = arith.constant 0.000000e+00 : f32
    %215 = vector.broadcast %cst_188 : f32 to vector<18x32xf32>
    %c0_189 = arith.constant 0 : index
    %c0_190 = arith.constant 0 : index
    %216 = vector.load %arg35[%c0_189, %c0_190] : memref<18x32xf32, #tpu.memory_space<vmem>>, vector<18x32xf32>
    tpu.vector_store %arg35[%c0_189, %c0_190], %215 {strides = array<i32>} : memref<18x32xf32, #tpu.memory_space<vmem>>, vector<18x32xf32>,
    %c1_191 = arith.constant 1 : index
    %c0_192 = arith.constant 0 : index
    %217 = vector.load %arg35[%c1_191, %c0_192] : memref<18x32xf32, #tpu.memory_space<vmem>>, vector<16x32xf32>
    tpu.vector_store %arg35[%c1_191, %c0_192], %214 {strides = array<i32>} : memref<18x32xf32, #tpu.memory_space<vmem>>, vector<16x32xf32>,
    %c0_193 = arith.constant 0 : index
    %c0_194 = arith.constant 0 : index
    %218 = tpu.strided_load %arg35[%c0_193, %c0_194] {strides = array<i32: 2, 1>} : memref<18x32xf32, #tpu.memory_space<vmem>>, vector<8x32xf32>
    %219 = arith.truncf %218 : vector<8x32xf32> to vector<8x32xbf16>
    %c0_195 = arith.constant 0 : index
    %c0_196 = arith.constant 0 : index
    %c0_197 = arith.constant 0 : index
    %220 = vector.load %arg16[%c0_195, %c0_196, %c0_197] : memref<3x32x32xbf16, #tpu.memory_space<vmem>>, vector<1x32x32xbf16>
    %221 = vector.shape_cast %220 : vector<1x32x32xbf16> to vector<32x32xbf16>
    %cst_198 = arith.constant dense<0.000000e+00> : vector<8x32xf32>
    %222 = tpu.matmul %219, %221, %cst_198 {dimension_numbers = #tpu.dot_dimension_numbers<[1], [0], [0], [1], [0, 0, 1, 1], [], []>} : vector<8x32xbf16>, vector<32x32xbf16>, vector<8x32xf32> -> vector<8x32xf32>
    %c1_199 = arith.constant 1 : index
    %c0_200 = arith.constant 0 : index
    %223 = tpu.strided_load %arg35[%c1_199, %c0_200] {strides = array<i32: 2, 1>} : memref<18x32xf32, #tpu.memory_space<vmem>>, vector<8x32xf32>
    %224 = arith.truncf %223 : vector<8x32xf32> to vector<8x32xbf16>
    %c1_201 = arith.constant 1 : index
    %c0_202 = arith.constant 0 : index
    %c0_203 = arith.constant 0 : index
    %225 = vector.load %arg16[%c1_201, %c0_202, %c0_203] : memref<3x32x32xbf16, #tpu.memory_space<vmem>>, vector<1x32x32xbf16>
    %226 = vector.shape_cast %225 : vector<1x32x32xbf16> to vector<32x32xbf16>
    %cst_204 = arith.constant dense<0.000000e+00> : vector<8x32xf32>
    %227 = tpu.matmul %224, %226, %cst_204 {dimension_numbers = #tpu.dot_dimension_numbers<[1], [0], [0], [1], [0, 0, 1, 1], [], []>} : vector<8x32xbf16>, vector<32x32xbf16>, vector<8x32xf32> -> vector<8x32xf32>
    %228 = arith.addf %222, %227 : vector<8x32xf32>
    %c2_205 = arith.constant 2 : index
    %c0_206 = arith.constant 0 : index
    %229 = tpu.strided_load %arg35[%c2_205, %c0_206] {strides = array<i32: 2, 1>} : memref<18x32xf32, #tpu.memory_space<vmem>>, vector<8x32xf32>
    %230 = arith.truncf %229 : vector<8x32xf32> to vector<8x32xbf16>
    %c2_207 = arith.constant 2 : index
    %c0_208 = arith.constant 0 : index
    %c0_209 = arith.constant 0 : index
    %231 = vector.load %arg16[%c2_207, %c0_208, %c0_209] : memref<3x32x32xbf16, #tpu.memory_space<vmem>>, vector<1x32x32xbf16>
    %232 = vector.shape_cast %231 : vector<1x32x32xbf16> to vector<32x32xbf16>
    %cst_210 = arith.constant dense<0.000000e+00> : vector<8x32xf32>
    %233 = tpu.matmul %230, %232, %cst_210 {dimension_numbers = #tpu.dot_dimension_numbers<[1], [0], [0], [1], [0, 0, 1, 1], [], []>} : vector<8x32xbf16>, vector<32x32xbf16>, vector<8x32xf32> -> vector<8x32xf32>
    %234 = arith.addf %228, %233 : vector<8x32xf32>
    %c0_211 = arith.constant 0 : index
    %c0_212 = arith.constant 0 : index
    %235 = vector.load %arg17[%c0_211, %c0_212] : memref<1x32xf32, #tpu.memory_space<vmem>>, vector<1x32xf32>
    %236 = vector.broadcast %235 : vector<1x32xf32> to vector<8x32xf32>
    %237 = arith.addf %234, %236 : vector<8x32xf32>
    %238 = arith.negf %237 : vector<8x32xf32>
    %239 = math.exp %238 : vector<8x32xf32>
    %cst_213 = arith.constant 1.000000e+00 : f32
    %240 = vector.broadcast %cst_213 : f32 to vector<8x32xf32>
    %241 = arith.addf %240, %239 : vector<8x32xf32>
    %242 = arith.divf %240, %241 : vector<8x32xf32>
    %243 = arith.mulf %237, %242 : vector<8x32xf32>
    %cst_214 = arith.constant 0.000000e+00 : f32
    %244 = vector.broadcast %cst_214 : f32 to vector<10x32xf32>
    %c0_215 = arith.constant 0 : index
    %c0_216 = arith.constant 0 : index
    %245 = vector.load %arg36[%c0_215, %c0_216] : memref<10x32xf32, #tpu.memory_space<vmem>>, vector<10x32xf32>
    tpu.vector_store %arg36[%c0_215, %c0_216], %244 {strides = array<i32>} : memref<10x32xf32, #tpu.memory_space<vmem>>, vector<10x32xf32>,
    %c1_217 = arith.constant 1 : index
    %c0_218 = arith.constant 0 : index
    %246 = vector.load %arg36[%c1_217, %c0_218] : memref<10x32xf32, #tpu.memory_space<vmem>>, vector<8x32xf32>
    tpu.vector_store %arg36[%c1_217, %c0_218], %243 {strides = array<i32>} : memref<10x32xf32, #tpu.memory_space<vmem>>, vector<8x32xf32>,
    %c0_219 = arith.constant 0 : index
    %c0_220 = arith.constant 0 : index
    %247 = tpu.strided_load %arg35[%c0_219, %c0_220] {strides = array<i32: 2, 1>} : memref<18x32xf32, #tpu.memory_space<vmem>>, vector<8x32xf32>
    %248 = arith.truncf %247 : vector<8x32xf32> to vector<8x32xbf16>
    %c0_221 = arith.constant 0 : index
    %c0_222 = arith.constant 0 : index
    %c0_223 = arith.constant 0 : index
    %249 = vector.load %arg20[%c0_221, %c0_222, %c0_223] : memref<3x32x64xbf16, #tpu.memory_space<vmem>>, vector<1x32x64xbf16>
    %250 = vector.shape_cast %249 : vector<1x32x64xbf16> to vector<32x64xbf16>
    %cst_224 = arith.constant dense<0.000000e+00> : vector<8x64xf32>
    %251 = tpu.matmul %248, %250, %cst_224 {dimension_numbers = #tpu.dot_dimension_numbers<[1], [0], [0], [1], [0, 0, 1, 1], [], []>} : vector<8x32xbf16>, vector<32x64xbf16>, vector<8x64xf32> -> vector<8x64xf32>
    %c1_225 = arith.constant 1 : index
    %c0_226 = arith.constant 0 : index
    %252 = tpu.strided_load %arg35[%c1_225, %c0_226] {strides = array<i32: 2, 1>} : memref<18x32xf32, #tpu.memory_space<vmem>>, vector<8x32xf32>
    %253 = arith.truncf %252 : vector<8x32xf32> to vector<8x32xbf16>
    %c1_227 = arith.constant 1 : index
    %c0_228 = arith.constant 0 : index
    %c0_229 = arith.constant 0 : index
    %254 = vector.load %arg20[%c1_227, %c0_228, %c0_229] : memref<3x32x64xbf16, #tpu.memory_space<vmem>>, vector<1x32x64xbf16>
    %255 = vector.shape_cast %254 : vector<1x32x64xbf16> to vector<32x64xbf16>
    %cst_230 = arith.constant dense<0.000000e+00> : vector<8x64xf32>
    %256 = tpu.matmul %253, %255, %cst_230 {dimension_numbers = #tpu.dot_dimension_numbers<[1], [0], [0], [1], [0, 0, 1, 1], [], []>} : vector<8x32xbf16>, vector<32x64xbf16>, vector<8x64xf32> -> vector<8x64xf32>
    %257 = arith.addf %251, %256 : vector<8x64xf32>
    %c2_231 = arith.constant 2 : index
    %c0_232 = arith.constant 0 : index
    %258 = tpu.strided_load %arg35[%c2_231, %c0_232] {strides = array<i32: 2, 1>} : memref<18x32xf32, #tpu.memory_space<vmem>>, vector<8x32xf32>
    %259 = arith.truncf %258 : vector<8x32xf32> to vector<8x32xbf16>
    %c2_233 = arith.constant 2 : index
    %c0_234 = arith.constant 0 : index
    %c0_235 = arith.constant 0 : index
    %260 = vector.load %arg20[%c2_233, %c0_234, %c0_235] : memref<3x32x64xbf16, #tpu.memory_space<vmem>>, vector<1x32x64xbf16>
    %261 = vector.shape_cast %260 : vector<1x32x64xbf16> to vector<32x64xbf16>
    %cst_236 = arith.constant dense<0.000000e+00> : vector<8x64xf32>
    %262 = tpu.matmul %259, %261, %cst_236 {dimension_numbers = #tpu.dot_dimension_numbers<[1], [0], [0], [1], [0, 0, 1, 1], [], []>} : vector<8x32xbf16>, vector<32x64xbf16>, vector<8x64xf32> -> vector<8x64xf32>
    %263 = arith.addf %257, %262 : vector<8x64xf32>
    %c0_237 = arith.constant 0 : index
    %c0_238 = arith.constant 0 : index
    %264 = vector.load %arg21[%c0_237, %c0_238] : memref<1x64xf32, #tpu.memory_space<vmem>>, vector<1x64xf32>
    %265 = vector.broadcast %264 : vector<1x64xf32> to vector<8x64xf32>
    %266 = arith.addf %263, %265 : vector<8x64xf32>
    %c0_239 = arith.constant 0 : index
    %c0_240 = arith.constant 0 : index
    %267 = vector.load %arg36[%c0_239, %c0_240] : memref<10x32xf32, #tpu.memory_space<vmem>>, vector<8x32xf32>
    %268 = arith.truncf %267 : vector<8x32xf32> to vector<8x32xbf16>
    %c0_241 = arith.constant 0 : index
    %c0_242 = arith.constant 0 : index
    %c0_243 = arith.constant 0 : index
    %269 = vector.load %arg18[%c0_241, %c0_242, %c0_243] : memref<3x32x64xbf16, #tpu.memory_space<vmem>>, vector<1x32x64xbf16>
    %270 = vector.shape_cast %269 : vector<1x32x64xbf16> to vector<32x64xbf16>
    %cst_244 = arith.constant dense<0.000000e+00> : vector<8x64xf32>
    %271 = tpu.matmul %268, %270, %cst_244 {dimension_numbers = #tpu.dot_dimension_numbers<[1], [0], [0], [1], [0, 0, 1, 1], [], []>} : vector<8x32xbf16>, vector<32x64xbf16>, vector<8x64xf32> -> vector<8x64xf32>
    %c1_245 = arith.constant 1 : index
    %c0_246 = arith.constant 0 : index
    %272 = vector.load %arg36[%c1_245, %c0_246] : memref<10x32xf32, #tpu.memory_space<vmem>>, vector<8x32xf32>
    %273 = arith.truncf %272 : vector<8x32xf32> to vector<8x32xbf16>
    %c1_247 = arith.constant 1 : index
    %c0_248 = arith.constant 0 : index
    %c0_249 = arith.constant 0 : index
    %274 = vector.load %arg18[%c1_247, %c0_248, %c0_249] : memref<3x32x64xbf16, #tpu.memory_space<vmem>>, vector<1x32x64xbf16>
    %275 = vector.shape_cast %274 : vector<1x32x64xbf16> to vector<32x64xbf16>
    %cst_250 = arith.constant dense<0.000000e+00> : vector<8x64xf32>
    %276 = tpu.matmul %273, %275, %cst_250 {dimension_numbers = #tpu.dot_dimension_numbers<[1], [0], [0], [1], [0, 0, 1, 1], [], []>} : vector<8x32xbf16>, vector<32x64xbf16>, vector<8x64xf32> -> vector<8x64xf32>
    %277 = arith.addf %271, %276 : vector<8x64xf32>
    %c2_251 = arith.constant 2 : index
    %c0_252 = arith.constant 0 : index
    %278 = vector.load %arg36[%c2_251, %c0_252] : memref<10x32xf32, #tpu.memory_space<vmem>>, vector<8x32xf32>
    %279 = arith.truncf %278 : vector<8x32xf32> to vector<8x32xbf16>
    %c2_253 = arith.constant 2 : index
    %c0_254 = arith.constant 0 : index
    %c0_255 = arith.constant 0 : index
    %280 = vector.load %arg18[%c2_253, %c0_254, %c0_255] : memref<3x32x64xbf16, #tpu.memory_space<vmem>>, vector<1x32x64xbf16>
    %281 = vector.shape_cast %280 : vector<1x32x64xbf16> to vector<32x64xbf16>
    %cst_256 = arith.constant dense<0.000000e+00> : vector<8x64xf32>
    %282 = tpu.matmul %279, %281, %cst_256 {dimension_numbers = #tpu.dot_dimension_numbers<[1], [0], [0], [1], [0, 0, 1, 1], [], []>} : vector<8x32xbf16>, vector<32x64xbf16>, vector<8x64xf32> -> vector<8x64xf32>
    %283 = arith.addf %277, %282 : vector<8x64xf32>
    %c0_257 = arith.constant 0 : index
    %c0_258 = arith.constant 0 : index
    %284 = vector.load %arg19[%c0_257, %c0_258] : memref<1x64xf32, #tpu.memory_space<vmem>>, vector<1x64xf32>
    %285 = vector.broadcast %284 : vector<1x64xf32> to vector<8x64xf32>
    %286 = arith.addf %283, %285 : vector<8x64xf32>
    %287 = arith.addf %286, %266 : vector<8x64xf32>
    %288 = arith.negf %287 : vector<8x64xf32>
    %289 = math.exp %288 : vector<8x64xf32>
    %cst_259 = arith.constant 1.000000e+00 : f32
    %290 = vector.broadcast %cst_259 : f32 to vector<8x64xf32>
    %291 = arith.addf %290, %289 : vector<8x64xf32>
    %292 = arith.divf %290, %291 : vector<8x64xf32>
    %293 = arith.mulf %287, %292 : vector<8x64xf32>
    %cst_260 = arith.constant 0.000000e+00 : f32
    %294 = vector.broadcast %cst_260 : f32 to vector<10x64xf32>
    %c0_261 = arith.constant 0 : index
    %c0_262 = arith.constant 0 : index
    %295 = vector.load %arg37[%c0_261, %c0_262] : memref<10x64xf32, #tpu.memory_space<vmem>>, vector<10x64xf32>
    tpu.vector_store %arg37[%c0_261, %c0_262], %294 {strides = array<i32>} : memref<10x64xf32, #tpu.memory_space<vmem>>, vector<10x64xf32>,
    %c1_263 = arith.constant 1 : index
    %c0_264 = arith.constant 0 : index
    %296 = vector.load %arg37[%c1_263, %c0_264] : memref<10x64xf32, #tpu.memory_space<vmem>>, vector<8x64xf32>
    tpu.vector_store %arg37[%c1_263, %c0_264], %293 {strides = array<i32>} : memref<10x64xf32, #tpu.memory_space<vmem>>, vector<8x64xf32>,
    %c0_265 = arith.constant 0 : index
    %c0_266 = arith.constant 0 : index
    %297 = tpu.strided_load %arg37[%c0_265, %c0_266] {strides = array<i32: 2, 1>} : memref<10x64xf32, #tpu.memory_space<vmem>>, vector<4x64xf32>
    %298 = arith.truncf %297 : vector<4x64xf32> to vector<4x64xbf16>
    %c0_267 = arith.constant 0 : index
    %c0_268 = arith.constant 0 : index
    %c0_269 = arith.constant 0 : index
    %299 = vector.load %arg22[%c0_267, %c0_268, %c0_269] : memref<3x64x64xbf16, #tpu.memory_space<vmem>>, vector<1x64x64xbf16>
    %300 = vector.shape_cast %299 : vector<1x64x64xbf16> to vector<64x64xbf16>
    %cst_270 = arith.constant dense<0.000000e+00> : vector<4x64xf32>
    %301 = tpu.matmul %298, %300, %cst_270 {dimension_numbers = #tpu.dot_dimension_numbers<[1], [0], [0], [1], [0, 0, 1, 1], [], []>} : vector<4x64xbf16>, vector<64x64xbf16>, vector<4x64xf32> -> vector<4x64xf32>
    %c1_271 = arith.constant 1 : index
    %c0_272 = arith.constant 0 : index
    %302 = tpu.strided_load %arg37[%c1_271, %c0_272] {strides = array<i32: 2, 1>} : memref<10x64xf32, #tpu.memory_space<vmem>>, vector<4x64xf32>
    %303 = arith.truncf %302 : vector<4x64xf32> to vector<4x64xbf16>
    %c1_273 = arith.constant 1 : index
    %c0_274 = arith.constant 0 : index
    %c0_275 = arith.constant 0 : index
    %304 = vector.load %arg22[%c1_273, %c0_274, %c0_275] : memref<3x64x64xbf16, #tpu.memory_space<vmem>>, vector<1x64x64xbf16>
    %305 = vector.shape_cast %304 : vector<1x64x64xbf16> to vector<64x64xbf16>
    %cst_276 = arith.constant dense<0.000000e+00> : vector<4x64xf32>
    %306 = tpu.matmul %303, %305, %cst_276 {dimension_numbers = #tpu.dot_dimension_numbers<[1], [0], [0], [1], [0, 0, 1, 1], [], []>} : vector<4x64xbf16>, vector<64x64xbf16>, vector<4x64xf32> -> vector<4x64xf32>
    %307 = arith.addf %301, %306 : vector<4x64xf32>
    %c2_277 = arith.constant 2 : index
    %c0_278 = arith.constant 0 : index
    %308 = tpu.strided_load %arg37[%c2_277, %c0_278] {strides = array<i32: 2, 1>} : memref<10x64xf32, #tpu.memory_space<vmem>>, vector<4x64xf32>
    %309 = arith.truncf %308 : vector<4x64xf32> to vector<4x64xbf16>
    %c2_279 = arith.constant 2 : index
    %c0_280 = arith.constant 0 : index
    %c0_281 = arith.constant 0 : index
    %310 = vector.load %arg22[%c2_279, %c0_280, %c0_281] : memref<3x64x64xbf16, #tpu.memory_space<vmem>>, vector<1x64x64xbf16>
    %311 = vector.shape_cast %310 : vector<1x64x64xbf16> to vector<64x64xbf16>
    %cst_282 = arith.constant dense<0.000000e+00> : vector<4x64xf32>
    %312 = tpu.matmul %309, %311, %cst_282 {dimension_numbers = #tpu.dot_dimension_numbers<[1], [0], [0], [1], [0, 0, 1, 1], [], []>} : vector<4x64xbf16>, vector<64x64xbf16>, vector<4x64xf32> -> vector<4x64xf32>
    %313 = arith.addf %307, %312 : vector<4x64xf32>
    %c0_283 = arith.constant 0 : index
    %c0_284 = arith.constant 0 : index
    %314 = vector.load %arg23[%c0_283, %c0_284] : memref<1x64xf32, #tpu.memory_space<vmem>>, vector<1x64xf32>
    %315 = vector.broadcast %314 : vector<1x64xf32> to vector<4x64xf32>
    %316 = arith.addf %313, %315 : vector<4x64xf32>
    %317 = arith.negf %316 : vector<4x64xf32>
    %318 = math.exp %317 : vector<4x64xf32>
    %cst_285 = arith.constant 1.000000e+00 : f32
    %319 = vector.broadcast %cst_285 : f32 to vector<4x64xf32>
    %320 = arith.addf %319, %318 : vector<4x64xf32>
    %321 = arith.divf %319, %320 : vector<4x64xf32>
    %322 = arith.mulf %316, %321 : vector<4x64xf32>
    %cst_286 = arith.constant 0.000000e+00 : f32
    %323 = vector.broadcast %cst_286 : f32 to vector<6x64xf32>
    %c0_287 = arith.constant 0 : index
    %c0_288 = arith.constant 0 : index
    %324 = vector.load %arg38[%c0_287, %c0_288] : memref<6x64xf32, #tpu.memory_space<vmem>>, vector<6x64xf32>
    tpu.vector_store %arg38[%c0_287, %c0_288], %323 {strides = array<i32>} : memref<6x64xf32, #tpu.memory_space<vmem>>, vector<6x64xf32>,
    %c1_289 = arith.constant 1 : index
    %c0_290 = arith.constant 0 : index
    %325 = vector.load %arg38[%c1_289, %c0_290] : memref<6x64xf32, #tpu.memory_space<vmem>>, vector<4x64xf32>
    tpu.vector_store %arg38[%c1_289, %c0_290], %322 {strides = array<i32>} : memref<6x64xf32, #tpu.memory_space<vmem>>, vector<4x64xf32>,
    %c0_291 = arith.constant 0 : index
    %c0_292 = arith.constant 0 : index
    %326 = tpu.strided_load %arg37[%c0_291, %c0_292] {strides = array<i32: 2, 1>} : memref<10x64xf32, #tpu.memory_space<vmem>>, vector<4x64xf32>
    %327 = arith.truncf %326 : vector<4x64xf32> to vector<4x64xbf16>
    %c0_293 = arith.constant 0 : index
    %c0_294 = arith.constant 0 : index
    %c0_295 = arith.constant 0 : index
    %328 = vector.load %arg26[%c0_293, %c0_294, %c0_295] : memref<3x64x128xbf16, #tpu.memory_space<vmem>>, vector<1x64x128xbf16>
    %329 = vector.shape_cast %328 : vector<1x64x128xbf16> to vector<64x128xbf16>
    %cst_296 = arith.constant dense<0.000000e+00> : vector<4x128xf32>
    %330 = tpu.matmul %327, %329, %cst_296 {dimension_numbers = #tpu.dot_dimension_numbers<[1], [0], [0], [1], [0, 0, 1, 1], [], []>} : vector<4x64xbf16>, vector<64x128xbf16>, vector<4x128xf32> -> vector<4x128xf32>
    %c1_297 = arith.constant 1 : index
    %c0_298 = arith.constant 0 : index
    %331 = tpu.strided_load %arg37[%c1_297, %c0_298] {strides = array<i32: 2, 1>} : memref<10x64xf32, #tpu.memory_space<vmem>>, vector<4x64xf32>
    %332 = arith.truncf %331 : vector<4x64xf32> to vector<4x64xbf16>
    %c1_299 = arith.constant 1 : index
    %c0_300 = arith.constant 0 : index
    %c0_301 = arith.constant 0 : index
    %333 = vector.load %arg26[%c1_299, %c0_300, %c0_301] : memref<3x64x128xbf16, #tpu.memory_space<vmem>>, vector<1x64x128xbf16>
    %334 = vector.shape_cast %333 : vector<1x64x128xbf16> to vector<64x128xbf16>
    %cst_302 = arith.constant dense<0.000000e+00> : vector<4x128xf32>
    %335 = tpu.matmul %332, %334, %cst_302 {dimension_numbers = #tpu.dot_dimension_numbers<[1], [0], [0], [1], [0, 0, 1, 1], [], []>} : vector<4x64xbf16>, vector<64x128xbf16>, vector<4x128xf32> -> vector<4x128xf32>
    %336 = arith.addf %330, %335 : vector<4x128xf32>
    %c2_303 = arith.constant 2 : index
    %c0_304 = arith.constant 0 : index
    %337 = tpu.strided_load %arg37[%c2_303, %c0_304] {strides = array<i32: 2, 1>} : memref<10x64xf32, #tpu.memory_space<vmem>>, vector<4x64xf32>
    %338 = arith.truncf %337 : vector<4x64xf32> to vector<4x64xbf16>
    %c2_305 = arith.constant 2 : index
    %c0_306 = arith.constant 0 : index
    %c0_307 = arith.constant 0 : index
    %339 = vector.load %arg26[%c2_305, %c0_306, %c0_307] : memref<3x64x128xbf16, #tpu.memory_space<vmem>>, vector<1x64x128xbf16>
    %340 = vector.shape_cast %339 : vector<1x64x128xbf16> to vector<64x128xbf16>
    %cst_308 = arith.constant dense<0.000000e+00> : vector<4x128xf32>
    %341 = tpu.matmul %338, %340, %cst_308 {dimension_numbers = #tpu.dot_dimension_numbers<[1], [0], [0], [1], [0, 0, 1, 1], [], []>} : vector<4x64xbf16>, vector<64x128xbf16>, vector<4x128xf32> -> vector<4x128xf32>
    %342 = arith.addf %336, %341 : vector<4x128xf32>
    %c0_309 = arith.constant 0 : index
    %c0_310 = arith.constant 0 : index
    %343 = vector.load %arg27[%c0_309, %c0_310] : memref<1x128xf32, #tpu.memory_space<vmem>>, vector<1x128xf32>
    %344 = vector.broadcast %343 : vector<1x128xf32> to vector<4x128xf32>
    %345 = arith.addf %342, %344 : vector<4x128xf32>
    %c0_311 = arith.constant 0 : index
    %c0_312 = arith.constant 0 : index
    %346 = vector.load %arg38[%c0_311, %c0_312] : memref<6x64xf32, #tpu.memory_space<vmem>>, vector<4x64xf32>
    %347 = arith.truncf %346 : vector<4x64xf32> to vector<4x64xbf16>
    %c0_313 = arith.constant 0 : index
    %c0_314 = arith.constant 0 : index
    %c0_315 = arith.constant 0 : index
    %348 = vector.load %arg24[%c0_313, %c0_314, %c0_315] : memref<3x64x128xbf16, #tpu.memory_space<vmem>>, vector<1x64x128xbf16>
    %349 = vector.shape_cast %348 : vector<1x64x128xbf16> to vector<64x128xbf16>
    %cst_316 = arith.constant dense<0.000000e+00> : vector<4x128xf32>
    %350 = tpu.matmul %347, %349, %cst_316 {dimension_numbers = #tpu.dot_dimension_numbers<[1], [0], [0], [1], [0, 0, 1, 1], [], []>} : vector<4x64xbf16>, vector<64x128xbf16>, vector<4x128xf32> -> vector<4x128xf32>
    %c1_317 = arith.constant 1 : index
    %c0_318 = arith.constant 0 : index
    %351 = vector.load %arg38[%c1_317, %c0_318] : memref<6x64xf32, #tpu.memory_space<vmem>>, vector<4x64xf32>
    %352 = arith.truncf %351 : vector<4x64xf32> to vector<4x64xbf16>
    %c1_319 = arith.constant 1 : index
    %c0_320 = arith.constant 0 : index
    %c0_321 = arith.constant 0 : index
    %353 = vector.load %arg24[%c1_319, %c0_320, %c0_321] : memref<3x64x128xbf16, #tpu.memory_space<vmem>>, vector<1x64x128xbf16>
    %354 = vector.shape_cast %353 : vector<1x64x128xbf16> to vector<64x128xbf16>
    %cst_322 = arith.constant dense<0.000000e+00> : vector<4x128xf32>
    %355 = tpu.matmul %352, %354, %cst_322 {dimension_numbers = #tpu.dot_dimension_numbers<[1], [0], [0], [1], [0, 0, 1, 1], [], []>} : vector<4x64xbf16>, vector<64x128xbf16>, vector<4x128xf32> -> vector<4x128xf32>
    %356 = arith.addf %350, %355 : vector<4x128xf32>
    %c2_323 = arith.constant 2 : index
    %c0_324 = arith.constant 0 : index
    %357 = vector.load %arg38[%c2_323, %c0_324] : memref<6x64xf32, #tpu.memory_space<vmem>>, vector<4x64xf32>
    %358 = arith.truncf %357 : vector<4x64xf32> to vector<4x64xbf16>
    %c2_325 = arith.constant 2 : index
    %c0_326 = arith.constant 0 : index
    %c0_327 = arith.constant 0 : index
    %359 = vector.load %arg24[%c2_325, %c0_326, %c0_327] : memref<3x64x128xbf16, #tpu.memory_space<vmem>>, vector<1x64x128xbf16>
    %360 = vector.shape_cast %359 : vector<1x64x128xbf16> to vector<64x128xbf16>
    %cst_328 = arith.constant dense<0.000000e+00> : vector<4x128xf32>
    %361 = tpu.matmul %358, %360, %cst_328 {dimension_numbers = #tpu.dot_dimension_numbers<[1], [0], [0], [1], [0, 0, 1, 1], [], []>} : vector<4x64xbf16>, vector<64x128xbf16>, vector<4x128xf32> -> vector<4x128xf32>
    %362 = arith.addf %356, %361 : vector<4x128xf32>
    %c0_329 = arith.constant 0 : index
    %c0_330 = arith.constant 0 : index
    %363 = vector.load %arg25[%c0_329, %c0_330] : memref<1x128xf32, #tpu.memory_space<vmem>>, vector<1x128xf32>
    %364 = vector.broadcast %363 : vector<1x128xf32> to vector<4x128xf32>
    %365 = arith.addf %362, %364 : vector<4x128xf32>
    %366 = arith.addf %365, %345 : vector<4x128xf32>
    %367 = arith.negf %366 : vector<4x128xf32>
    %368 = math.exp %367 : vector<4x128xf32>
    %cst_331 = arith.constant 1.000000e+00 : f32
    %369 = vector.broadcast %cst_331 : f32 to vector<4x128xf32>
    %370 = arith.addf %369, %368 : vector<4x128xf32>
    %371 = arith.divf %369, %370 : vector<4x128xf32>
    %372 = arith.mulf %366, %371 : vector<4x128xf32>
    %cst_332 = arith.constant 0.000000e+00 : f32
    %373 = vector.broadcast %cst_332 : f32 to vector<6x128xf32>
    %c0_333 = arith.constant 0 : index
    %c0_334 = arith.constant 0 : index
    %374 = vector.load %arg39[%c0_333, %c0_334] : memref<6x128xf32, #tpu.memory_space<vmem>>, vector<6x128xf32>
    tpu.vector_store %arg39[%c0_333, %c0_334], %373 {strides = array<i32>} : memref<6x128xf32, #tpu.memory_space<vmem>>, vector<6x128xf32>,
    %c1_335 = arith.constant 1 : index
    %c0_336 = arith.constant 0 : index
    %375 = vector.load %arg39[%c1_335, %c0_336] : memref<6x128xf32, #tpu.memory_space<vmem>>, vector<4x128xf32>
    tpu.vector_store %arg39[%c1_335, %c0_336], %372 {strides = array<i32>} : memref<6x128xf32, #tpu.memory_space<vmem>>, vector<4x128xf32>,
    %c1_337 = arith.constant 1 : index
    %c0_338 = arith.constant 0 : index
    %376 = vector.load %arg39[%c1_337, %c0_338] : memref<6x128xf32, #tpu.memory_space<vmem>>, vector<1x128xf32>
    %377 = arith.truncf %376 : vector<1x128xf32> to vector<1x128xbf16>
    %c0_339 = arith.constant 0 : index
    %c0_340 = arith.constant 0 : index
    %c0_341 = arith.constant 0 : index
    %378 = vector.load %arg28[%c0_339, %c0_340, %c0_341] : memref<4x128x32xbf16, #tpu.memory_space<vmem>>, vector<1x128x32xbf16>
    %379 = vector.shape_cast %378 : vector<1x128x32xbf16> to vector<128x32xbf16>
    %cst_342 = arith.constant dense<0.000000e+00> : vector<1x32xf32>
    %380 = tpu.matmul %377, %379, %cst_342 {dimension_numbers = #tpu.dot_dimension_numbers<[1], [0], [0], [1], [0, 0, 1, 1], [], []>} : vector<1x128xbf16>, vector<128x32xbf16>, vector<1x32xf32> -> vector<1x32xf32>
    %c2_343 = arith.constant 2 : index
    %c0_344 = arith.constant 0 : index
    %381 = vector.load %arg39[%c2_343, %c0_344] : memref<6x128xf32, #tpu.memory_space<vmem>>, vector<1x128xf32>
    %382 = arith.truncf %381 : vector<1x128xf32> to vector<1x128xbf16>
    %c1_345 = arith.constant 1 : index
    %c0_346 = arith.constant 0 : index
    %c0_347 = arith.constant 0 : index
    %383 = vector.load %arg28[%c1_345, %c0_346, %c0_347] : memref<4x128x32xbf16, #tpu.memory_space<vmem>>, vector<1x128x32xbf16>
    %384 = vector.shape_cast %383 : vector<1x128x32xbf16> to vector<128x32xbf16>
    %cst_348 = arith.constant dense<0.000000e+00> : vector<1x32xf32>
    %385 = tpu.matmul %382, %384, %cst_348 {dimension_numbers = #tpu.dot_dimension_numbers<[1], [0], [0], [1], [0, 0, 1, 1], [], []>} : vector<1x128xbf16>, vector<128x32xbf16>, vector<1x32xf32> -> vector<1x32xf32>
    %386 = arith.addf %380, %385 : vector<1x32xf32>
    %c3_349 = arith.constant 3 : index
    %c0_350 = arith.constant 0 : index
    %387 = vector.load %arg39[%c3_349, %c0_350] : memref<6x128xf32, #tpu.memory_space<vmem>>, vector<1x128xf32>
    %388 = arith.truncf %387 : vector<1x128xf32> to vector<1x128xbf16>
    %c2_351 = arith.constant 2 : index
    %c0_352 = arith.constant 0 : index
    %c0_353 = arith.constant 0 : index
    %389 = vector.load %arg28[%c2_351, %c0_352, %c0_353] : memref<4x128x32xbf16, #tpu.memory_space<vmem>>, vector<1x128x32xbf16>
    %390 = vector.shape_cast %389 : vector<1x128x32xbf16> to vector<128x32xbf16>
    %cst_354 = arith.constant dense<0.000000e+00> : vector<1x32xf32>
    %391 = tpu.matmul %388, %390, %cst_354 {dimension_numbers = #tpu.dot_dimension_numbers<[1], [0], [0], [1], [0, 0, 1, 1], [], []>} : vector<1x128xbf16>, vector<128x32xbf16>, vector<1x32xf32> -> vector<1x32xf32>
    %392 = arith.addf %386, %391 : vector<1x32xf32>
    %c4_355 = arith.constant 4 : index
    %c0_356 = arith.constant 0 : index
    %393 = vector.load %arg39[%c4_355, %c0_356] : memref<6x128xf32, #tpu.memory_space<vmem>>, vector<1x128xf32>
    %394 = arith.truncf %393 : vector<1x128xf32> to vector<1x128xbf16>
    %c3_357 = arith.constant 3 : index
    %c0_358 = arith.constant 0 : index
    %c0_359 = arith.constant 0 : index
    %395 = vector.load %arg28[%c3_357, %c0_358, %c0_359] : memref<4x128x32xbf16, #tpu.memory_space<vmem>>, vector<1x128x32xbf16>
    %396 = vector.shape_cast %395 : vector<1x128x32xbf16> to vector<128x32xbf16>
    %cst_360 = arith.constant dense<0.000000e+00> : vector<1x32xf32>
    %397 = tpu.matmul %394, %396, %cst_360 {dimension_numbers = #tpu.dot_dimension_numbers<[1], [0], [0], [1], [0, 0, 1, 1], [], []>} : vector<1x128xbf16>, vector<128x32xbf16>, vector<1x32xf32> -> vector<1x32xf32>
    %398 = arith.addf %392, %397 : vector<1x32xf32>
    %c0_361 = arith.constant 0 : index
    %c0_362 = arith.constant 0 : index
    %399 = vector.load %arg29[%c0_361, %c0_362] : memref<1x32xf32, #tpu.memory_space<vmem>>, vector<1x32xf32>
    %400 = arith.addf %398, %399 : vector<1x32xf32>
    %c0_363 = arith.constant 0 : index
    %c0_364 = arith.constant 0 : index
    %c0_365 = arith.constant 0 : index
    %401 = vector.load %arg30[%c0_363, %c0_364, %c0_365] : memref<1x1x32xf32, #tpu.memory_space<vmem>>, vector<1x1x32xf32>
    %402 = vector.shape_cast %401 : vector<1x1x32xf32> to vector<1x32xf32>
    %403 = vector.shape_cast %400 : vector<1x32xf32> to vector<1x1x32xf32>
    tpu.vector_store %arg30[%c0_363, %c0_364, %c0_365], %403 {strides = array<i32>} : memref<1x1x32xf32, #tpu.memory_space<vmem>>, vector<1x1x32xf32>,
    return
  }
  func.func @transform_0(%arg0: i32) -> (i32, i32, i32) {
    %c0_i32 = arith.constant 0 : i32
    %c0_i32_0 = arith.constant 0 : i32
    %c0_i32_1 = arith.constant 0 : i32
    return %arg0, %c0_i32, %c0_i32_0 : i32, i32, i32
  }
  func.func @transform_1(%arg0: i32) -> (i32, i32, i32) {
    %c0_i32 = arith.constant 0 : i32
    %c0_i32_0 = arith.constant 0 : i32
    %c0_i32_1 = arith.constant 0 : i32
    %c0_i32_2 = arith.constant 0 : i32
    return %c0_i32, %c0_i32_0, %c0_i32_1 : i32, i32, i32
  }
  func.func @transform_2(%arg0: i32) -> (i32, i32) {
    %c0_i32 = arith.constant 0 : i32
    %c0_i32_0 = arith.constant 0 : i32
    %c0_i32_1 = arith.constant 0 : i32
    return %c0_i32, %c0_i32_0 : i32, i32
  }
  func.func @transform_3(%arg0: i32) -> (i32, i32, i32) {
    %c0_i32 = arith.constant 0 : i32
    %c0_i32_0 = arith.constant 0 : i32
    %c0_i32_1 = arith.constant 0 : i32
    %c0_i32_2 = arith.constant 0 : i32
    return %c0_i32, %c0_i32_0, %c0_i32_1 : i32, i32, i32
  }
  func.func @transform_4(%arg0: i32) -> (i32, i32) {
    %c0_i32 = arith.constant 0 : i32
    %c0_i32_0 = arith.constant 0 : i32
    %c0_i32_1 = arith.constant 0 : i32
    return %c0_i32, %c0_i32_0 : i32, i32
  }
  func.func @transform_5(%arg0: i32) -> (i32, i32, i32) {
    %c0_i32 = arith.constant 0 : i32
    %c0_i32_0 = arith.constant 0 : i32
    %c0_i32_1 = arith.constant 0 : i32
    %c0_i32_2 = arith.constant 0 : i32
    return %c0_i32, %c0_i32_0, %c0_i32_1 : i32, i32, i32
  }
  func.func @transform_6(%arg0: i32) -> (i32, i32) {
    %c0_i32 = arith.constant 0 : i32
    %c0_i32_0 = arith.constant 0 : i32
    %c0_i32_1 = arith.constant 0 : i32
    return %c0_i32, %c0_i32_0 : i32, i32
  }
  func.func @transform_7(%arg0: i32) -> (i32, i32, i32) {
    %c0_i32 = arith.constant 0 : i32
    %c0_i32_0 = arith.constant 0 : i32
    %c0_i32_1 = arith.constant 0 : i32
    %c0_i32_2 = arith.constant 0 : i32
    return %c0_i32, %c0_i32_0, %c0_i32_1 : i32, i32, i32
  }
  func.func @transform_8(%arg0: i32) -> (i32, i32) {
    %c0_i32 = arith.constant 0 : i32
    %c0_i32_0 = arith.constant 0 : i32
    %c0_i32_1 = arith.constant 0 : i32
    return %c0_i32, %c0_i32_0 : i32, i32
  }
  func.func @transform_9(%arg0: i32) -> (i32, i32, i32) {
    %c0_i32 = arith.constant 0 : i32
    %c0_i32_0 = arith.constant 0 : i32
    %c0_i32_1 = arith.constant 0 : i32
    %c0_i32_2 = arith.constant 0 : i32
    return %c0_i32, %c0_i32_0, %c0_i32_1 : i32, i32, i32
  }
  func.func @transform_10(%arg0: i32) -> (i32, i32) {
    %c0_i32 = arith.constant 0 : i32
    %c0_i32_0 = arith.constant 0 : i32
    %c0_i32_1 = arith.constant 0 : i32
    return %c0_i32, %c0_i32_0 : i32, i32
  }
  func.func @transform_11(%arg0: i32) -> (i32, i32, i32) {
    %c0_i32 = arith.constant 0 : i32
    %c0_i32_0 = arith.constant 0 : i32
    %c0_i32_1 = arith.constant 0 : i32
    %c0_i32_2 = arith.constant 0 : i32
    return %c0_i32, %c0_i32_0, %c0_i32_1 : i32, i32, i32
  }
  func.func @transform_12(%arg0: i32) -> (i32, i32) {
    %c0_i32 = arith.constant 0 : i32
    %c0_i32_0 = arith.constant 0 : i32
    %c0_i32_1 = arith.constant 0 : i32
    return %c0_i32, %c0_i32_0 : i32, i32
  }
  func.func @transform_13(%arg0: i32) -> (i32, i32, i32) {
    %c0_i32 = arith.constant 0 : i32
    %c0_i32_0 = arith.constant 0 : i32
    %c0_i32_1 = arith.constant 0 : i32
    %c0_i32_2 = arith.constant 0 : i32
    return %c0_i32, %c0_i32_0, %c0_i32_1 : i32, i32, i32
  }
  func.func @transform_14(%arg0: i32) -> (i32, i32) {
    %c0_i32 = arith.constant 0 : i32
    %c0_i32_0 = arith.constant 0 : i32
    %c0_i32_1 = arith.constant 0 : i32
    return %c0_i32, %c0_i32_0 : i32, i32
  }
  func.func @transform_15(%arg0: i32) -> (i32, i32, i32) {
    %c0_i32 = arith.constant 0 : i32
    %c0_i32_0 = arith.constant 0 : i32
    %c0_i32_1 = arith.constant 0 : i32
    %c0_i32_2 = arith.constant 0 : i32
    return %c0_i32, %c0_i32_0, %c0_i32_1 : i32, i32, i32
  }
  func.func @transform_16(%arg0: i32) -> (i32, i32) {
    %c0_i32 = arith.constant 0 : i32
    %c0_i32_0 = arith.constant 0 : i32
    %c0_i32_1 = arith.constant 0 : i32
    return %c0_i32, %c0_i32_0 : i32, i32
  }
  func.func @transform_17(%arg0: i32) -> (i32, i32, i32) {
    %c0_i32 = arith.constant 0 : i32
    %c0_i32_0 = arith.constant 0 : i32
    %c0_i32_1 = arith.constant 0 : i32
    %c0_i32_2 = arith.constant 0 : i32
    return %c0_i32, %c0_i32_0, %c0_i32_1 : i32, i32, i32
  }
  func.func @transform_18(%arg0: i32) -> (i32, i32) {
    %c0_i32 = arith.constant 0 : i32
    %c0_i32_0 = arith.constant 0 : i32
    %c0_i32_1 = arith.constant 0 : i32
    return %c0_i32, %c0_i32_0 : i32, i32
  }
  func.func @transform_19(%arg0: i32) -> (i32, i32, i32) {
    %c0_i32 = arith.constant 0 : i32
    %c0_i32_0 = arith.constant 0 : i32
    %c0_i32_1 = arith.constant 0 : i32
    %c0_i32_2 = arith.constant 0 : i32
    return %c0_i32, %c0_i32_0, %c0_i32_1 : i32, i32, i32
  }
  func.func @transform_20(%arg0: i32) -> (i32, i32) {
    %c0_i32 = arith.constant 0 : i32
    %c0_i32_0 = arith.constant 0 : i32
    %c0_i32_1 = arith.constant 0 : i32
    return %c0_i32, %c0_i32_0 : i32, i32
  }
  func.func @transform_21(%arg0: i32) -> (i32, i32, i32) {
    %c0_i32 = arith.constant 0 : i32
    %c0_i32_0 = arith.constant 0 : i32
    %c0_i32_1 = arith.constant 0 : i32
    %c0_i32_2 = arith.constant 0 : i32
    return %c0_i32, %c0_i32_0, %c0_i32_1 : i32, i32, i32
  }
  func.func @transform_22(%arg0: i32) -> (i32, i32) {
    %c0_i32 = arith.constant 0 : i32
    %c0_i32_0 = arith.constant 0 : i32
    %c0_i32_1 = arith.constant 0 : i32
    return %c0_i32, %c0_i32_0 : i32, i32
  }
  func.func @transform_23(%arg0: i32) -> (i32, i32, i32) {
    %c0_i32 = arith.constant 0 : i32
    %c0_i32_0 = arith.constant 0 : i32
    %c0_i32_1 = arith.constant 0 : i32
    %c0_i32_2 = arith.constant 0 : i32
    return %c0_i32, %c0_i32_0, %c0_i32_1 : i32, i32, i32
  }
  func.func @transform_24(%arg0: i32) -> (i32, i32) {
    %c0_i32 = arith.constant 0 : i32
    %c0_i32_0 = arith.constant 0 : i32
    %c0_i32_1 = arith.constant 0 : i32
    return %c0_i32, %c0_i32_0 : i32, i32
  }
  func.func @transform_25(%arg0: i32) -> (i32, i32, i32) {
    %c0_i32 = arith.constant 0 : i32
    %c0_i32_0 = arith.constant 0 : i32
    %c0_i32_1 = arith.constant 0 : i32
    %c0_i32_2 = arith.constant 0 : i32
    return %c0_i32, %c0_i32_0, %c0_i32_1 : i32, i32, i32
  }
  func.func @transform_26(%arg0: i32) -> (i32, i32) {
    %c0_i32 = arith.constant 0 : i32
    %c0_i32_0 = arith.constant 0 : i32
    %c0_i32_1 = arith.constant 0 : i32
    return %c0_i32, %c0_i32_0 : i32, i32
  }
  func.func @transform_27(%arg0: i32) -> (i32, i32, i32) {
    %c0_i32 = arith.constant 0 : i32
    %c0_i32_0 = arith.constant 0 : i32
    %c0_i32_1 = arith.constant 0 : i32
    %c0_i32_2 = arith.constant 0 : i32
    return %c0_i32, %c0_i32_0, %c0_i32_1 : i32, i32, i32
  }
  func.func @transform_28(%arg0: i32) -> (i32, i32) {
    %c0_i32 = arith.constant 0 : i32
    %c0_i32_0 = arith.constant 0 : i32
    %c0_i32_1 = arith.constant 0 : i32
    return %c0_i32, %c0_i32_0 : i32, i32
  }
  func.func @transform_29(%arg0: i32) -> (i32, i32, i32) {
    %c0_i32 = arith.constant 0 : i32
    %c0_i32_0 = arith.constant 0 : i32
    %c0_i32_1 = arith.constant 0 : i32
    return %arg0, %c0_i32, %c0_i32_0 : i32, i32, i32
  }
}

</mosaic_0001>

<bundles_post_ra>
// kernel: encoder_forward.1
= control target key start
LH: loop header
LB: loop body
LE: loop exit
PB: predicated region body
PF: predicated region fallthrough
CT: control target
= control target key end

     0   :  { %s6253_s6 = smov 1   ;;  %s6254_s10 = smov 2   ;;  %s6983_s0 = inlined_call_operand.smem [shape: u32[30], index: -1, kind: input, shape index: {}] }
   0x1   :  { %s6292_s5 = sld [smem:[%s6983_s0]]   ;;  %s6255_s14 = smov 3  }
   0x2   :  { %s6297_s9 = sld [smem:[%s6983_s0 + %s6253_s6]]   ;;  %s6256_s18 = smov 4  }
   0x3   :  { %s6302_s13 = sld [smem:[%s6983_s0 + %s6254_s10]]   ;;  %s6257_s22 = smov 5  }
   0x4   :  { %s6307_s17 = sld [smem:[%s6983_s0 + %s6255_s14]]   ;;  %s6258_s26 = smov 6  }
   0x5   :  { %s6312_s21 = sld [smem:[%s6983_s0 + %s6256_s18]]   ;;  %s6259_s30 = smov 7  }
   0x6   :  { %s6317_s25 = sld [smem:[%s6983_s0 + %s6257_s22]]   ;;  %s6260_s4 = smov 8  }
   0x7   :  { %s6322_s29 = sld [smem:[%s6983_s0 + %s6258_s26]]   ;;  %s6261_s10 = smov 9  }
   0x8   :  { %s6327_s3 = sld [smem:[%s6983_s0 + %s6259_s30]]   ;;  %s6262_s15 = smov 10  }
   0x9   :  { %s6332_s8 = sld [smem:[%s6983_s0 + %s6260_s4]]   ;;  %s6263_s20 = smov 11  }
   0xa   :  { %s6337_s14 = sld [smem:[%s6983_s0 + %s6261_s10]]   ;;  %s6264_s26 = smov 12  }
   0xb   :  { %s6342_s19 = sld [smem:[%s6983_s0 + %s6262_s15]]   ;;  %s6265_s1 = smov 13  }
   0xc   :  { %s6347_s24 = sld [smem:[%s6983_s0 + %s6263_s20]]   ;;  %s6266_s7 = smov 14  }
   0xd   :  { %s6352_s30 = sld [smem:[%s6983_s0 + %s6264_s26]]   ;;  %s6267_s15 = smov 15  }
   0xe   :  { %s6357_s6 = sld [smem:[%s6983_s0 + %s6265_s1]]   ;;  %s6268_s22 = smov 16  }
   0xf   :  { %s6362_s12 = sld [smem:[%s6983_s0 + %s6266_s7]]   ;;  %s6269_s28 = smov 17  }
  0x10   :  { %s6367_s20 = sld [smem:[%s6983_s0 + %s6267_s15]]   ;;  %s6270_s7 = smov 18  }
  0x11   :  { %s6372_s27 = sld [smem:[%s6983_s0 + %s6268_s22]]   ;;  %s6271_s15 = smov 19  }
  0x12   :  { %s6377_s4 = sld [smem:[%s6983_s0 + %s6269_s28]]   ;;  %s6272_s22 = smov 20  }
  0x13   :  { %6989 = sst [smem:[#allocation11_spill]] %s6352_s30  ;;  %s6273_s28 = smov 21  }
  0x14   :  { %s6382_s30 = sld [smem:[%s6983_s0 + %s6270_s7]]   ;;  %s6274_s7 = smov 22  }
  0x15   :  { %6990 = sst [smem:[#allocation12_spill]] %s6362_s12 }
  0x16   :  { %s6387_s12 = sld [smem:[%s6983_s0 + %s6271_s15]]   ;;  %s6275_s15 = smov 23  }
  0x17   :  { %6991 = sst [smem:[#allocation13_spill]] %s6372_s27 }
  0x18   :  { %6992 = sst [smem:[#allocation14_spill]] %s6377_s4 }
  0x19   :  { %s6392_s27 = sld [smem:[%s6983_s0 + %s6272_s22]]   ;;  %s6276_s22 = smov 24  }
  0x1a   :  { %6993 = sst [smem:[#allocation15_spill]] %s6382_s30 }
  0x1b   :  { %s6397_s4 = sld [smem:[%s6983_s0 + %s6273_s28]]   ;;  %s6277_s28 = smov 25  }
  0x1c   :  { %6994 = sst [smem:[#allocation16_spill]] %s6387_s12 }
  0x1d   :  { %s6402_s30 = sld [smem:[%s6983_s0 + %s6274_s7]]   ;;  %s6278_s7 = smov 26  }
  0x1e   :  { %s6407_s12 = sld [smem:[%s6983_s0 + %s6275_s15]]   ;;  %s6279_s15 = smov 27  }
  0x1f   :  { %6995 = sst [smem:[#allocation17_spill]] %s6392_s27 }
  0x20   :  { %s6412_s27 = sld [smem:[%s6983_s0 + %s6276_s22]]   ;;  %s6280_s22 = smov 28  }
  0x21   :  { %6996 = sst [smem:[#allocation18_spill]] %s6397_s4 }
  0x22   :  { %s6417_s4 = sld [smem:[%s6983_s0 + %s6277_s28]]   ;;  %s6281_s28 = smov 29  }
  0x23   :  { %6997 = sst [smem:[#allocation19_spill]] %s6402_s30 }
  0x24   :  { %6998 = sst [smem:[#allocation20_spill]] %s6407_s12 }
  0x25   :  { %s6422_s30 = sld [smem:[%s6983_s0 + %s6278_s7]]   ;;  %s6439_s7 = smov 0  }
  0x26   :  { %6999 = sst [smem:[#allocation21_spill]] %s6412_s27 }
  0x27   :  { %s6427_s12 = sld [smem:[%s6983_s0 + %s6279_s15]]  }
  0x28   :  { %7000 = sst [smem:[#allocation22_spill]] %s6417_s4 }
  0x29   :  { %s6432_s27 = sld [smem:[%s6983_s0 + %s6280_s22]]  }
  0x2a   :  { %s6437_s4 = sld [smem:[%s6983_s0 + %s6281_s28]]  }
  0x2b LB: > { %s4863_s10 = sadd.s32 4294967295, %s6251_s7   ;;  %p4867_p0 = scmp.ge.s32.totalorder %s6251_s7, 1  ;;  %s6251_s7 = sphi %s6439_s7, %s69_s7  }
  0x2c   : > { %p817_p1 = scmp.lt.s32.totalorder %s6251_s7, 3 }
  0x2e   : > { %p818_p2 = pnand %p4867_p0, %p817_p1 }
  0x2f   : > { %v912_v0 = vld [vmem:[%s6297_s9] sm:$0x3] (!%p818_p2)  ;;  %vm940_vm0 = vcmask (!%p818_p2), 1041408   ;;  %p891_p3 = scmp.lt.s32.totalorder (!%p818_p2), %s4863_s10, 1  ;;  %v4878_v2 = vld [vmem:[%s6297_s9 + $0x4] sm:$0x3] (!%p818_p2) }
  0x30   : > { %821 = sbr.rel (%p818_p2) target bundleno = 2924 (0xb6c), region = 136  ;;  %5999 = vmatprep.subr.msk.bf16.mxu0 (!%p818_p2), %vm940_vm0, %v912_v0  ;;  %v1022_v1 = vsel (!%p818_p2), %vm940_vm0, %v912_v0, 0  ;;  %v4869_v3 = vld [vmem:[%s6297_s9 + $0x2] sm:$0x3] (!%p818_p2)  ;;  %vm927_vm1 = vcmask (!%p818_p2), 31744   ;;  %v1116_v13 = vsel (!%p818_p2), %vm940_vm0, %v4878_v2, 0 }
  0x31   : > { %5419 = vmatpush3.bf16.msra.mxu0 (!%p818_p2), %v1022_v1  ;;  %5998 = vmatprep.subr.msk.bf16.mxu1 (!%p818_p2), %vm940_vm0, %v4869_v3  ;;  %v942_v4 = vsel (!%p818_p2), %vm940_vm0, %v4869_v3, 0  ;;  %v4883_v15 = vld [vmem:[%s6297_s9 + $0x6] sm:$0x3] (!%p818_p2)  ;;  %v4888_v24 = vld [vmem:[%s6297_s9 + $0x8] sm:$0x3] (!%p818_p2)  ;;  %vm1670_vm2 = vcmask (!%p818_p2), 64512  }
  0x32   : > { %6000 = vmatprep.subr.msk.bf16.mxu0 (!%p818_p2), %vm940_vm0, %v4878_v2  ;;  %5409 = vmatpush3.bf16.msra.mxu1 (!%p818_p2), %v942_v4  ;;  %v4893_v32 = vld [vmem:[%s6297_s9 + $0xa] sm:$0x3] (!%p818_p2)  ;;  %v4898_v33 = vld [vmem:[%s6297_s9 + $0xc] sm:$0x3] (!%p818_p2)  ;;  %v1218_v38 = vsel (!%p818_p2), %vm940_vm0, %v4883_v15, 0  ;;  %v1320_v40 = vsel (!%p818_p2), %vm940_vm0, %v4888_v24, 0 }
  0x33   : > { %v1422_v42 = vsel (!%p818_p2), %vm940_vm0, %v4893_v32, 0  ;;  %v6498_v43 = vsel (!%p818_p2), %vm940_vm0, %v4898_v33, 0  ;;  %vm1679_vm3 = vcmask (!%p818_p2), 58368   ;;  %vm1717_vm4 = vcmask (!%p818_p2), 1043456   ;;  %s7001_s15 = sld [smem:[#allocation12_spill]] (!%p818_p2)  ;;  %s7002_s16 = sld [smem:[#allocation11_spill]] (!%p818_p2) }
  0x34   : > { %vm2406_vm5 = vcmask (!%p818_p2), 130048   ;;  %vm2411_vm6 = vcmask (!%p818_p2), 123904   ;;  %vm6283_vm7 = vmmov (!%p818_p2), 0   ;;  %vm2991_vm8 = vcmask (!%p818_p2), 261120   ;;  %s7003_s18 = sld [smem:[#allocation16_spill]] (!%p818_p2)  ;;  %s7004_s22 = sld [smem:[#allocation14_spill]] (!%p818_p2) }
  0x35   : > { %vm2994_vm9 = vcmask (!%p818_p2), 254976   ;;  %s7005_s23 = sld [smem:[#allocation13_spill]] (!%p818_p2)  ;;  %s7006_s26 = sld [smem:[#allocation18_spill]] (!%p818_p2)  ;;  %vm3600_vm10 = vcmask (!%p818_p2), 523264   ;;  %vm3602_vm11 = vcmask (!%p818_p2), 517120   ;;  %vm3856_vm12 = vcmask (!%p818_p2), 521216  }
  0x36   : > { %s7007_s28 = sld [smem:[#allocation22_spill]] (!%p818_p2)  ;;  %s7008_s1 = sld [smem:[#allocation17_spill]] (!%p818_p2)  ;;  %vm3858_vm13 = vcmask (!%p818_p2), 519168   ;;  %vm4785_vm14 = vcmask (!%p818_p2), 253952  }
  0x37   : > { %s7014_s10 = smov (!%p891_p3, %s4863_s10), 1  ;;  %s7009_s2 = sld [smem:[#allocation15_spill]] }
  0x38   : > { %s6014_s0 = smul.u32 72, %s7014_s10 }
  0x3a   : > { %s6459_s11 = scalar_lea.vmem %s6292_s5, %s6014_s0  ;;  %s7010_s0 = sld [smem:[#allocation20_spill]] }
  0x3b   : > { %v900_v5 = vld [vmem:[%s6459_s11] sm:$0xff]  ;;  %v901_v6 = vld [vmem:[%s6459_s11 + $0x8] sm:$0xff]  ;;  %v902_v7 = vld [vmem:[%s6459_s11 + $0x10] sm:$0xff] }
  0x3c   : > { %v908_v8 = vpack.c.bf16 %v901_v6, %v900_v5  ;;  %v903_v9 = vld [vmem:[%s6459_s11 + $0x18] sm:$0xff]  ;;  %v904_v10 = vld [vmem:[%s6459_s11 + $0x20] sm:$0xff]  ;;  %v905_v11 = vld [vmem:[%s6459_s11 + $0x28] sm:$0xff] }
  0x3d   : > { %v909_v12 = vpack.c.bf16 %v903_v9, %v902_v7  ;;  %v910_v14 = vpack.c.bf16 %v905_v11, %v904_v10  ;;  %v906_v16 = vld [vmem:[%s6459_s11 + $0x30] sm:$0xff]  ;;  %v907_v17 = vld [vmem:[%s6459_s11 + $0x38] sm:$0xff]  ;;  %v1089_v18 = vld [vmem:[%s6459_s11 + $0x2] sm:$0xff] }
  0x3e   : > { %5420 = vmatprep.mubr.msk.bf16.mxu0 %vm927_vm1, %v908_v8  ;;  %v1090_v19 = vld [vmem:[%s6459_s11 + $0xa] sm:$0xff]  ;;  %v911_v20 = vpack.c.bf16 %v907_v17, %v906_v16  ;;  %v1091_v22 = vld [vmem:[%s6459_s11 + $0x12] sm:$0xff]  ;;  %v1092_v23 = vld [vmem:[%s6459_s11 + $0x1a] sm:$0xff] }
  0x3f   : > { %5421 = vmatmul.mubr.msk.bf16.vlgmr.msra.gmra.mrb[0].mxu0 %vm927_vm1, %v909_v12  ;;  %v1097_v21 = vpack.c.bf16 %v1090_v19, %v1089_v18  ;;  %v1093_v25 = vld [vmem:[%s6459_s11 + $0x22] sm:$0xff]  ;;  %v1094_v28 = vld [vmem:[%s6459_s11 + $0x2a] sm:$0xff]  ;;  %v916_v31 = vld [vmem:[%s6459_s11 + $0x19] sm:$0xff]  ;;  %v1098_v35 = vpack.c.bf16 %v1092_v23, %v1091_v22 }
  0x40   : > { %5429 = vmatpush3.bf16.msra.mxu0 %v1116_v13  ;;  %5424 = vmatprep.mubr.msk.bf16.mxu0 %vm927_vm1, %v910_v14  ;;  %v913_v26 = vld [vmem:[%s6459_s11 + $0x1] sm:$0xff]  ;;  %v914_v27 = vld [vmem:[%s6459_s11 + $0x9] sm:$0xff]  ;;  %v915_v30 = vld [vmem:[%s6459_s11 + $0x11] sm:$0xff]  ;;  %v1099_v39 = vpack.c.bf16 %v1094_v28, %v1093_v25 }
  0x41   : > { %6001 = vmatprep.subr.msk.bf16.mxu0 %vm940_vm0, %v4883_v15  ;;  %v921_v29 = vpack.c.bf16 %v914_v27, %v913_v26  ;;  %v922_v34 = vpack.c.bf16 %v916_v31, %v915_v30  ;;  %v917_v36 = vld [vmem:[%s6459_s11 + $0x21] sm:$0xff]  ;;  %v918_v37 = vld [vmem:[%s6459_s11 + $0x29] sm:$0xff]  ;;  %v919_v44 = vld [vmem:[%s6459_s11 + $0x31] sm:$0xff] }
  0x42   : > { %v923_v41 = vpack.c.bf16 %v918_v37, %v917_v36  ;;  %v920_v45 = vld [vmem:[%s6459_s11 + $0x39] sm:$0xff]  ;;  %v1191_v48 = vld [vmem:[%s6459_s11 + $0x3] sm:$0xff]  ;;  %v1192_v49 = vld [vmem:[%s6459_s11 + $0xb] sm:$0xff] }
  0x43   : > { %5410 = vmatprep.mubr.msk.bf16.mxu1 %vm927_vm1, %v921_v29  ;;  %v1095_v46 = vld [vmem:[%s6459_s11 + $0x32] sm:$0xff]  ;;  %v1096_v47 = vld [vmem:[%s6459_s11 + $0x3a] sm:$0xff]  ;;  %v924_v50 = vpack.c.bf16 %v920_v45, %v919_v44  ;;  %v1199_v52 = vpack.c.bf16 %v1192_v49, %v1191_v48  ;;  %v1195_v55 = vld [vmem:[%s6459_s11 + $0x23] sm:$0xff] }
  0x44   : > { %5411 = vmatmul.mubr.msk.bf16.vlgmr.msra.gmra.mrb[0].mxu1 %vm927_vm1, %v922_v34  ;;  %v1100_v51 = vpack.c.bf16 %v1096_v47, %v1095_v46  ;;  %v1193_v53 = vld [vmem:[%s6459_s11 + $0x13] sm:$0xff]  ;;  %v1194_v54 = vld [vmem:[%s6459_s11 + $0x1b] sm:$0xff]  ;;  %v1196_v56 = vld [vmem:[%s6459_s11 + $0x2b] sm:$0xff]  ;;  %v6282_v34 = vmov 0.0  }
  0x45   : > { %5414 = vmatprep.mubr.msk.bf16.mxu1 %vm927_vm1, %v923_v41  ;;  %v1200_v57 = vpack.c.bf16 %v1194_v54, %v1193_v53  ;;  %v1201_v58 = vpack.c.bf16 %v1196_v56, %v1195_v55  ;;  %v1197_v59 = vld [vmem:[%s6459_s11 + $0x33] sm:$0xff]  ;;  %v1198_v60 = vld [vmem:[%s6459_s11 + $0x3b] sm:$0xff]  ;;  %v1293_v61 = vld [vmem:[%s6459_s11 + $0x4] sm:$0xff]  ;;  %1673 = vst.msk [vmem:[#allocation2 + $0x10] sm:$0xff] %vm1670_vm2, %v6282_v34 }
  0x46   : > { %v1294_v62 = vld [vmem:[%s6459_s11 + $0xc] sm:$0xff]  ;;  %v1202_v63 = vpack.c.bf16 %v1198_v60, %v1197_v59  ;;  %v1295_v1 = vld [vmem:[%s6459_s11 + $0x14] sm:$0xff]  ;;  %v1296_v2 = vld [vmem:[%s6459_s11 + $0x1c] sm:$0xff]  ;;  %1674 = vst.msk [vmem:[#allocation2 + $0x18] sm:$0xff] %vm1670_vm2, %v6282_v34 }
  0x47   : > { %5425 = vmatmul.mubr.msk.bf16.gmra.mrb[4].mxu0 %vm927_vm1, %v911_v20  ;;  %v1301_v0 = vpack.c.bf16 %v1294_v62, %v1293_v61  ;;  %v1297_v3 = vld [vmem:[%s6459_s11 + $0x24] sm:$0xff]  ;;  %v1298_v4 = vld [vmem:[%s6459_s11 + $0x2c] sm:$0xff]  ;;  %v1302_v5 = vpack.c.bf16 %v1296_v2, %v1295_v1  ;;  %v1299_v7 = vld [vmem:[%s6459_s11 + $0x34] sm:$0xff]  ;;  %1671 = vst.msk [vmem:[#allocation2] sm:$0xff] %vm1670_vm2, %v6282_v34 }
  0x48   : > { %5430 = vmatprep.mubr.msk.bf16.mxu0 %vm927_vm1, %v1097_v21  ;;  %v1303_v6 = vpack.c.bf16 %v1298_v4, %v1297_v3  ;;  %v1300_v8 = vld [vmem:[%s6459_s11 + $0x3c] sm:$0xff]  ;;  %v1395_v9 = vld [vmem:[%s6459_s11 + $0x5] sm:$0xff]  ;;  %v1396_v10 = vld [vmem:[%s6459_s11 + $0xd] sm:$0xff]  ;;  %1672 = vst.msk [vmem:[#allocation2 + $0x8] sm:$0xff] %vm1670_vm2, %v6282_v34 }
  0x49   : > { %v1304_v11 = vpack.c.bf16 %v1300_v8, %v1299_v7  ;;  %v1403_v12 = vpack.c.bf16 %v1396_v10, %v1395_v9  ;;  %v1397_v13 = vld [vmem:[%s6459_s11 + $0x15] sm:$0xff]  ;;  %v1398_v14 = vld [vmem:[%s6459_s11 + $0x1d] sm:$0xff]  ;;  %v1399_v15 = vld [vmem:[%s6459_s11 + $0x25] sm:$0xff]  ;;  %1675 = vst.msk [vmem:[#allocation2 + $0x20] sm:$0xff] %vm1670_vm2, %v6282_v34 }
  0x4a   : > { %v1400_v16 = vld [vmem:[%s6459_s11 + $0x2d] sm:$0xff]  ;;  %v1404_v17 = vpack.c.bf16 %v1398_v14, %v1397_v13  ;;  %v1401_v19 = vld [vmem:[%s6459_s11 + $0x35] sm:$0xff]  ;;  %v1402_v20 = vld [vmem:[%s6459_s11 + $0x3d] sm:$0xff]  ;;  %1676 = vst.msk [vmem:[#allocation2 + $0x28] sm:$0xff] %vm1670_vm2, %v6282_v34 }
  0x4b   : > { %v1405_v18 = vpack.c.bf16 %v1400_v16, %v1399_v15  ;;  %v1497_v21 = vld [vmem:[%s6459_s11 + $0x6] sm:$0xff]  ;;  %v1498_v22 = vld [vmem:[%s6459_s11 + $0xe] sm:$0xff]  ;;  %v1406_v23 = vpack.c.bf16 %v1402_v20, %v1401_v19  ;;  %v1499_v25 = vld [vmem:[%s6459_s11 + $0x16] sm:$0xff]  ;;  %1677 = vst.msk [vmem:[#allocation2 + $0x30] sm:$0xff] %vm1670_vm2, %v6282_v34 }
  0x4c   : > { %5415 = vmatmul.mubr.msk.bf16.gmra.mrb[4].mxu1 %vm927_vm1, %v924_v50  ;;  %v1500_v26 = vld [vmem:[%s6459_s11 + $0x1e] sm:$0xff]  ;;  %v1501_v27 = vld [vmem:[%s6459_s11 + $0x26] sm:$0xff]  ;;  %v1502_v28 = vld [vmem:[%s6459_s11 + $0x2e] sm:$0xff]  ;;  %1678 = vst.msk [vmem:[#allocation2 + $0x38] sm:$0xff] %vm1670_vm2, %v6282_v34 }
  0x4d   : > { %v1506_v29 = vpack.c.bf16 %v1500_v26, %v1499_v25  ;;  %v1507_v30 = vpack.c.bf16 %v1502_v28, %v1501_v27  ;;  %v1503_v31 = vld [vmem:[%s6459_s11 + $0x36] sm:$0xff]  ;;  %1941 = vst.msk [vmem:[#allocation3] sm:$0xff] %vm1670_vm2, %v6282_v34  ;;  %1942 = vst.msk [vmem:[#allocation3 + $0x8] sm:$0xff] %vm1670_vm2, %v6282_v34  ;;  %v6593_v37 = vld [vmem:[%s6307_s17] sm:$0xf] }
  0x4e   : > { %1943 = vst.msk [vmem:[#allocation3 + $0x10] sm:$0xff] %vm1670_vm2, %v6282_v34  ;;  %1944 = vst.msk [vmem:[#allocation3 + $0x18] sm:$0xff] %vm1670_vm2, %v6282_v34  ;;  %v4903_v47 = vld [vmem:[%s6302_s13] ss:$0 sm:$0xff] }
  0x4f   : > { %5431 = vmatmul.mubr.msk.bf16.vlgmr.msra.gmra.mrb[0].mxu0 %vm927_vm1, %v1098_v35  ;;  %4352 = vst [vmem:[#allocation10] sm:$0x3f] %v6282_v34  ;;  %1680 = vst.msk [vmem:[#allocation2 + $0x40] sm:$0x3] %vm1679_vm3, %v6282_v34  ;;  %v4912_v35 = vld [vmem:[%s6307_s17 + $0x4] sm:$0xf] }
  0x50   : > { %5439 = vmatpush3.bf16.msra.mxu0 %v1218_v38  ;;  %5434 = vmatprep.mubr.msk.bf16.mxu0 %vm927_vm1, %v1099_v39  ;;  %1945 = vst.msk [vmem:[#allocation3 + $0x20] sm:$0x3] %vm1679_vm3, %v6282_v34  ;;  %v1719_v36 = vsel %vm1717_vm4, %v4912_v35, 0 }
  0x51   : > { %6002 = vmatprep.subr.msk.bf16.mxu0 %vm940_vm0, %v4888_v24  ;;  %v1505_v24 = vpack.c.bf16 %v1498_v22, %v1497_v21  ;;  %6005 = vmatprep.subr.msk.bf16.mxu1 %vm1717_vm4, %v4912_v35  ;;  %2409 = vst.msk [vmem:[#allocation4 + $0x10] sm:$0xff] %vm2406_vm5, %v6282_v34  ;;  %2410 = vst.msk [vmem:[#allocation4 + $0x18] sm:$0xff] %vm2406_vm5, %v6282_v34 }
  0x52   : > { %5479 = vmatpush3.bf16.msra.mxu1 %v1719_v36  ;;  %2407 = vst.msk [vmem:[#allocation4] sm:$0xff] %vm2406_vm5, %v6282_v34  ;;  %2408 = vst.msk [vmem:[#allocation4 + $0x8] sm:$0xff] %vm2406_vm5, %v6282_v34 }
  0x53   : > { %6006 = vmatprep.subr.msk.bf16.mxu1 %vm1717_vm4, %v6593_v37  ;;  %2614 = vst.msk [vmem:[#allocation5] sm:$0xff] %vm2406_vm5, %v6282_v34  ;;  %2615 = vst.msk [vmem:[#allocation5 + $0x8] sm:$0xff] %vm2406_vm5, %v6282_v34 }
  0x54   : > { %2412 = vst.msk [vmem:[#allocation4 + $0x20] sm:$0x3] %vm2411_vm6, %v6282_v34  ;;  %2616 = vst.msk [vmem:[#allocation5 + $0x10] sm:$0x3] %vm2411_vm6, %v6282_v34 }
  0x55   : > { %2992 = vst.msk [vmem:[#allocation6] sm:$0xff] %vm2991_vm8, %v6282_v34  ;;  %2993 = vst.msk [vmem:[#allocation6 + $0x8] sm:$0xff] %vm2991_vm8, %v6282_v34 }
  0x56   : > { %3201 = vst.msk [vmem:[#allocation7] sm:$0xff] %vm2991_vm8, %v6282_v34 }
  0x57   : > { %5435 = vmatmul.mubr.msk.bf16.gmra.mrb[4].mxu0 %vm927_vm1, %v1100_v51  ;;  %2995 = vst.msk [vmem:[#allocation6 + $0x10] sm:$0x3] %vm2994_vm9, %v6282_v34  ;;  %3202 = vst.msk [vmem:[#allocation7 + $0x8] sm:$0x3] %vm2994_vm9, %v6282_v34 }
  0x58   : > { %5440 = vmatprep.mubr.msk.bf16.mxu0 %vm927_vm1, %v1199_v52  ;;  %3601 = vst.msk [vmem:[#allocation8] sm:$0xff] %vm3600_vm10, %v6282_v34 }
  0x59   : > { %3603 = vst.msk [vmem:[#allocation8 + $0x8] sm:$0x3] %vm3602_vm11, %v6282_v34 }
  0x5a   : > { %3857 = vst.msk [vmem:[#allocation9] sm:$0x3f] %vm3856_vm12, %v6282_v34 }
  0x5f   : > { %5441 = vmatmul.mubr.msk.bf16.vlgmr.msra.gmra.mrb[0].mxu0 %vm927_vm1, %v1200_v57 }
  0x60   : > { %5449 = vmatpush3.bf16.msra.mxu0 %v1320_v40  ;;  %5444 = vmatprep.mubr.msk.bf16.mxu0 %vm927_vm1, %v1201_v58 }
  0x61   : > { %6003 = vmatprep.subr.msk.bf16.mxu0 %vm940_vm0, %v4893_v32  ;;  %v1504_v32 = vld [vmem:[%s6459_s11 + $0x3e] sm:$0xff]  ;;  %s7011_s11 = sld [smem:[#allocation19_spill]] }
  0x67   : > { %5445 = vmatmul.mubr.msk.bf16.gmra.mrb[4].mxu0 %vm927_vm1, %v1202_v63 }
  0x68   : > { %5450 = vmatprep.mubr.msk.bf16.mxu0 %vm927_vm1, %v1301_v0 }
  0x6f   : > { %5451 = vmatmul.mubr.msk.bf16.vlgmr.msra.gmra.mrb[0].mxu0 %vm927_vm1, %v1302_v5 }
  0x70   : > { %5459 = vmatpush3.bf16.msra.mxu0 %v1422_v42  ;;  %5454 = vmatprep.mubr.msk.bf16.mxu0 %vm927_vm1, %v1303_v6 }
  0x71   : > { %6004 = vmatprep.subr.msk.bf16.mxu0 %vm940_vm0, %v4898_v33  ;;  %v1508_v33 = vpack.c.bf16 %v1504_v32, %v1503_v31 }
  0x77   : > { %5455 = vmatmul.mubr.msk.bf16.gmra.mrb[4].mxu0 %vm927_vm1, %v1304_v11 }
  0x78   : > { %5460 = vmatprep.mubr.msk.bf16.mxu0 %vm927_vm1, %v1403_v12 }
  0x7f   : > { %5461 = vmatmul.mubr.msk.bf16.vlgmr.msra.gmra.mrb[0].mxu0 %vm927_vm1, %v1404_v17 }
  0x80   : > { %5469 = vmatpush3.bf16.msra.mxu0 %v6498_v43  ;;  %5464 = vmatprep.mubr.msk.bf16.mxu0 %vm927_vm1, %v1405_v18 }
  0x81   : > { %5586 = vmatprep.subr.bf16.mxu0 %v6282_v34 }
  0x87   : > { %5465 = vmatmul.mubr.msk.bf16.gmra.mrb[4].mxu0 %vm927_vm1, %v1406_v23 }
  0x88   : > { %5470 = vmatprep.mubr.msk.bf16.mxu0 %vm927_vm1, %v1505_v24 }
  0x8f   : > { %5471 = vmatmul.mubr.msk.bf16.vlgmr.msra.gmra.mrb[0].mxu0 %vm927_vm1, %v1506_v29 }
  0x90   : > { %5474 = vmatprep.mubr.msk.bf16.mxu0 %vm927_vm1, %v1507_v30 }
  0x97   : > { %5475 = vmatmul.mubr.msk.bf16.gmra.mrb[4].mxu0 %vm927_vm1, %v1508_v33 }
  0x98   : > { %5590 = vmatprep.mubr.msk.bf16.mxu0 %vm6283_vm7, %v6282_v34 }
 0x117   : > { %v5412_v38 = vpop.f32.mrb[0].mxu1 }
 0x118   : > { %v978_v39 = vpop.f32.mrb[1].mxu1 }
 0x119   : > { %v5413_v40 = vpop.f32.mrb[2].mxu1 }
 0x11a   : > { %v981_v41 = vpop.f32.mrb[3].mxu1 }
 0x11f   : > { %v5416_v42 = vpop.f32.mrb[4].mxu1 }
 0x120   : > { %v994_v43 = vpop.f32.mrb[5].mxu1 }
 0x121   : > { %v5417_v44 = vpop.f32.mrb[6].mxu1 }
 0x122   : > { %v997_v45 = vpop.f32.mrb[7].mxu1 }
 0x162   : > { %v5472_v46 = vpop.f32.mrb[0].mxu0 }
 0x163   : > { %v5846_v48 = vadd.f32 %v5472_v46, %v5412_v38  ;;  %v1560_v49 = vpop.f32.mrb[1].mxu0 }
 0x164   : > { %v5847_v50 = vadd.f32 %v1560_v49, %v978_v39  ;;  %v5473_v51 = vpop.f32.mrb[2].mxu0 }
 0x165   : > { %v1608_v52 = vadd.f32 %v5846_v48, %v4903_v47  ;;  %v5848_v53 = vadd.f32 %v5473_v51, %v5413_v40  ;;  %v1563_v54 = vpop.f32.mrb[3].mxu0 }
 0x166   : > { %v1606_v55 = vadd.f32 %v5847_v50, %v4903_v47  ;;  %v5849_v56 = vadd.f32 %v1563_v54, %v981_v41 }
 0x167   : > { %v4906_v57 = vmul.f32 -1.442695, %v1608_v52  ;;  %v1609_v58 = vadd.f32 %v5848_v53, %v4903_v47 }
 0x168   : > { %v4904_v59 = vmul.f32 -1.442695, %v1606_v55  ;;  %v1607_v60 = vadd.f32 %v5849_v56, %v4903_v47 }
 0x169   : > { %6149 = vpow2.f32 %v4906_v57  ;;  %v4907_v61 = vmul.f32 -1.442695, %v1609_v58  ;;  %v1777_v57 = vsel %vm1717_vm4, %v6593_v37, 0 }
 0x16a   : > { %6151 = vpow2.f32 %v4904_v59  ;;  %v4905_v62 = vmul.f32 -1.442695, %v1607_v60  ;;  %v5476_v63 = vpop.f32.mrb[4].mxu0  ;;  %v4917_v59 = vld [vmem:[%s6307_s17 + $0x8] sm:$0xf] }
 0x16b   : > { %6153 = vpow2.f32 %v4907_v61  ;;  %v5850_v0 = vadd.f32 %v5476_v63, %v5416_v42  ;;  %v1576_v1 = vpop.f32.mrb[5].mxu0 }
 0x16c   : > { %6155 = vpow2.f32 %v4905_v62  ;;  %v5851_v2 = vadd.f32 %v1576_v1, %v994_v43  ;;  %v5477_v3 = vpop.f32.mrb[6].mxu0  ;;  %v1847_v1 = vsel %vm1717_vm4, %v4917_v59, 0 }
 0x16d   : > { %v1612_v4 = vadd.f32 %v5850_v0, %v4903_v47  ;;  %v5852_v5 = vadd.f32 %v5477_v3, %v5417_v44  ;;  %v1579_v6 = vpop.f32.mrb[7].mxu0  ;;  %v4925_v3 = vld [vmem:[%s6327_s3 + $0x4] sm:$0xf] }
 0x16e   : > { %v1610_v7 = vadd.f32 %v5851_v2, %v4903_v47  ;;  %v5853_v8 = vadd.f32 %v1579_v6, %v997_v45 }
 0x16f   : > { %v4910_v9 = vmul.f32 -1.442695, %v1612_v4  ;;  %v1613_v10 = vadd.f32 %v5852_v5, %v4903_v47 }
 0x170   : > { %v4908_v11 = vmul.f32 -1.442695, %v1610_v7  ;;  %v1611_v12 = vadd.f32 %v5853_v8, %v4903_v47  ;;  %v1972_v8 = vsel %vm1717_vm4, %v4925_v3, 0 }
 0x171   : > { %6157 = vpow2.f32 %v4910_v9  ;;  %v4911_v13 = vmul.f32 -1.442695, %v1613_v10 }
 0x172   : > { %6159 = vpow2.f32 %v4908_v11  ;;  %v4909_v14 = vmul.f32 -1.442695, %v1611_v12 }
 0x173   : > { %v6150_v15 = vpop.eup %6149  ;;  %6161 = vpow2.f32 %v4911_v13 }
 0x174   : > { %v6152_v16 = vpop.eup %6151  ;;  %v1640_v17 = vadd.f32 1.0, %v6150_v15  ;;  %6163 = vpow2.f32 %v4909_v14 }
 0x175   : > { %v6154_v18 = vpop.eup %6153  ;;  %v1638_v19 = vadd.f32 1.0, %v6152_v16 }
 0x176   : > { %v6156_v20 = vpop.eup %6155  ;;  %6165 = vrcp.f32 %v1640_v17  ;;  %v1641_v21 = vadd.f32 1.0, %v6154_v18  ;;  %v4930_v18 = vld [vmem:[%s6327_s3 + $0x8] sm:$0xf] }
 0x177   : > { %6167 = vrcp.f32 %v1638_v19  ;;  %v1639_v22 = vadd.f32 1.0, %v6156_v20 }
 0x178   : > { %6169 = vrcp.f32 %v1641_v21 }
 0x179   : > { %6171 = vrcp.f32 %v1639_v22 }
 0x17b   : > { %v6158_v23 = vpop.eup %6157 }
 0x17c   : > { %v6160_v24 = vpop.eup %6159  ;;  %v1644_v25 = vadd.f32 1.0, %v6158_v23 }
 0x17d   : > { %v6162_v26 = vpop.eup %6161  ;;  %v1642_v27 = vadd.f32 1.0, %v6160_v24  ;;  %v2096_v24 = vsel %vm1717_vm4, %v4930_v18, 0 }
 0x17e   : > { %v6164_v28 = vpop.eup %6163  ;;  %6173 = vrcp.f32 %v1644_v25  ;;  %v1645_v29 = vadd.f32 1.0, %v6162_v26 }
 0x17f   : > { %6175 = vrcp.f32 %v1642_v27  ;;  %v1643_v30 = vadd.f32 1.0, %v6164_v28 }
 0x180   : > { %v6166_v31 = vpop.eup %6165  ;;  %6177 = vrcp.f32 %v1645_v29  ;;  %v4934_v29 = vld [vmem:[%s6317_s25 + $0x4] sm:$0xf] }
 0x181   : > { %v6168_v32 = vpop.eup %6167  ;;  %v1664_v33 = vmul.f32 %v6166_v31, %v1608_v52  ;;  %6179 = vrcp.f32 %v1643_v30  ;;  %v2184_v30 = vsel %vm1717_vm4, %v4934_v29, 0  ;;  %v2168_v31 = vld [vmem:[%s6317_s25] sm:$0xf] }
 0x182   : > { %v6170_v35 = vpop.eup %6169  ;;  %v1662_v36 = vmul.f32 %v6168_v32, %v1606_v55  ;;  %v4920_v32 = vld [vmem:[%s6312_s21] ss:$0 sm:$0xff] }
 0x183   : > { %v6172_v38 = vpop.eup %6171  ;;  %1683 = vst.msk [vmem:[#allocation2 + $0x11] sm:$0xff] %vm1670_vm2, %v1664_v33  ;;  %v1665_v39 = vmul.f32 %v6170_v35, %v1609_v58 }
 0x184   : > { %1681 = vst.msk [vmem:[#allocation2 + $0x1] sm:$0xff] %vm1670_vm2, %v1662_v36  ;;  %v1663_v40 = vmul.f32 %v6172_v38, %v1607_v60 }
 0x185   : > { %1684 = vst.msk [vmem:[#allocation2 + $0x19] sm:$0xff] %vm1670_vm2, %v1665_v39 }
 0x186   : > { %1682 = vst.msk [vmem:[#allocation2 + $0x9] sm:$0xff] %vm1670_vm2, %v1663_v40 }
 0x188   : > { %v6174_v41 = vpop.eup %6173 }
 0x189   : > { %v6176_v42 = vpop.eup %6175  ;;  %v1668_v43 = vmul.f32 %v6174_v41, %v1612_v4 }
 0x18a   : > { %v6178_v44 = vpop.eup %6177  ;;  %v1666_v45 = vmul.f32 %v6176_v42, %v1610_v7 }
 0x18b   : > { %v6180_v46 = vpop.eup %6179  ;;  %1687 = vst.msk [vmem:[#allocation2 + $0x31] sm:$0xff] %vm1670_vm2, %v1668_v43  ;;  %v1669_v47 = vmul.f32 %v6178_v44, %v1613_v10  ;;  %v1956_v10 = vld [vmem:[%s6327_s3] sm:$0xf] }
 0x18c   : > { %1685 = vst.msk [vmem:[#allocation2 + $0x21] sm:$0xff] %vm1670_vm2, %v1666_v45  ;;  %v1667_v48 = vmul.f32 %v6180_v46, %v1611_v12  ;;  %v1702_v49 = vld [vmem:[#allocation2 + $0x11] ss:$2 sm:$0xff]  ;;  %v1831_v63 = vld [vmem:[#allocation2 + $0x12] ss:$2 sm:$0xff]  ;;  %v2030_v16 = vsel %vm1717_vm4, %v1956_v10, 0 }
 0x18d   : > { %1688 = vst.msk [vmem:[#allocation2 + $0x39] sm:$0xff] %vm1670_vm2, %v1669_v47  ;;  %v1700_v50 = vld [vmem:[#allocation2 + $0x1] ss:$2 sm:$0xff]  ;;  %v1689_v53 = vld [vmem:[#allocation2] ss:$2 sm:$0xff] }
 0x18e   : > { %1686 = vst.msk [vmem:[#allocation2 + $0x29] sm:$0xff] %vm1670_vm2, %v1667_v48  ;;  %v1707_v51 = vpack.c.bf16 %v1702_v49, %v1700_v50  ;;  %v1691_v54 = vld [vmem:[#allocation2 + $0x10] ss:$2 sm:$0xff]  ;;  %v1957_v5 = vld [vmem:[#allocation2 + $0x1] ss:$2 sm:$0xff] }
 0x18f   : > { %v1696_v58 = vpack.c.bf16 %v1691_v54, %v1689_v53  ;;  %v1829_v62 = vld [vmem:[#allocation2 + $0x2] ss:$2 sm:$0xff]  ;;  %v1958_v6 = vld [vmem:[#allocation2 + $0x11] ss:$2 sm:$0xff]  ;;  %v2082_v22 = vld [vmem:[#allocation2 + $0x12] ss:$2 sm:$0xff] }
 0x190   : > { %5480 = vmatprep.mubr.msk.bf16.mxu1 %vm1670_vm2, %v1707_v51  ;;  %v1836_v2 = vpack.c.bf16 %v1831_v63, %v1829_v62  ;;  %v1961_v9 = vpack.c.bf16 %v1958_v6, %v1957_v5  ;;  %v1950_v13 = vld [vmem:[#allocation2] ss:$2 sm:$0xff]  ;;  %v1951_v14 = vld [vmem:[#allocation2 + $0x10] ss:$2 sm:$0xff]  ;;  %v2242_v5 = vsel %vm1717_vm4, %v2168_v31, 0 }
 0x191   : > { %v1954_v17 = vpack.c.bf16 %v1951_v14, %v1950_v13  ;;  %v2081_v21 = vld [vmem:[#allocation2 + $0x2] ss:$2 sm:$0xff] }
 0x192   : > { %v2085_v25 = vpack.c.bf16 %v2082_v22, %v2081_v21  ;;  %v4942_v22 = vld [vmem:[%s6322_s29] ss:$0 sm:$0xff] }
 0x194   : > { %v1706_v52 = vld [vmem:[#allocation2 + $0x31] ss:$2 sm:$0xff]  ;;  %v1835_v4 = vld [vmem:[#allocation2 + $0x32] ss:$2 sm:$0xff] }
 0x195   : > { %v1704_v55 = vld [vmem:[#allocation2 + $0x21] ss:$2 sm:$0xff]  ;;  %v1693_v60 = vld [vmem:[#allocation2 + $0x20] ss:$2 sm:$0xff]  ;;  %v1695_v61 = vld [vmem:[#allocation2 + $0x30] ss:$2 sm:$0xff] }
 0x196   : > { %v1708_v56 = vpack.c.bf16 %v1706_v52, %v1704_v55  ;;  %v1697_v0 = vpack.c.bf16 %v1695_v61, %v1693_v60  ;;  %v1833_v37 = vld [vmem:[#allocation2 + $0x22] ss:$2 sm:$0xff]  ;;  %v1959_v11 = vld [vmem:[#allocation2 + $0x21] ss:$2 sm:$0xff]  ;;  %v1960_v12 = vld [vmem:[#allocation2 + $0x31] ss:$2 sm:$0xff] }
 0x197   : > { %v1837_v7 = vpack.c.bf16 %v1835_v4, %v1833_v37  ;;  %v1962_v15 = vpack.c.bf16 %v1960_v12, %v1959_v11  ;;  %v1952_v19 = vld [vmem:[#allocation2 + $0x20] ss:$2 sm:$0xff]  ;;  %v1953_v20 = vld [vmem:[#allocation2 + $0x30] ss:$2 sm:$0xff] }
 0x198   : > { %5481 = vmatmul.mubr.msk.bf16.vlgmr.msra.gmra.mrb[8].mxu1 %vm1670_vm2, %v1708_v56  ;;  %v1955_v23 = vpack.c.bf16 %v1953_v20, %v1952_v19  ;;  %v2083_v26 = vld [vmem:[#allocation2 + $0x22] ss:$2 sm:$0xff]  ;;  %v2084_v27 = vld [vmem:[#allocation2 + $0x32] ss:$2 sm:$0xff] }
 0x199   : > { %5485 = vmatpush3.bf16.msra.mxu1 %v1777_v57  ;;  %5486 = vmatprep.mubr.msk.bf16.mxu1 %vm1670_vm2, %v1696_v58  ;;  %v2086_v28 = vpack.c.bf16 %v2084_v27, %v2083_v26  ;;  %v6054_v19 = vld [vmem:[%s6337_s14 + $0x8] sm:$0xff]   ;;  %v4933_v20 = vld [vmem:[%s6332_s8] ss:$0 sm:$0xff] }
 0x19a   : > { %6007 = vmatprep.subr.msk.bf16.mxu1 %vm1717_vm4, %v4917_v59 }
 0x1a4   : > { %5487 = vmatmul.mubr.msk.bf16.vlgmr.msra.gmra.mrb[8].mxu1 %vm1670_vm2, %v1697_v0 }
 0x1a5   : > { %5491 = vmatpush3.bf16.msra.mxu1 %v1847_v1  ;;  %5492 = vmatprep.mubr.msk.bf16.mxu1 %vm1670_vm2, %v1836_v2 }
 0x1a6   : > { %6008 = vmatprep.subr.msk.bf16.mxu1 %vm1717_vm4, %v4925_v3 }
 0x1b0   : > { %5493 = vmatmul.mubr.msk.bf16.vlgmr.msra.gmra.mrb[8].mxu1 %vm1670_vm2, %v1837_v7 }
 0x1b1   : > { %5498 = vmatprep.mubr.msk.bf16.mxu1 %vm1670_vm2, %v1961_v9  ;;  %5497 = vmatpush3.bf16.msra.mxu1 %v1972_v8  ;;  %v4939_v8 = vld [vmem:[%s6317_s25 + $0x8] sm:$0xf] }
 0x1b2   : > { %6009 = vmatprep.subr.msk.bf16.mxu1 %vm1717_vm4, %v1956_v10  ;;  %v2308_v14 = vsel %vm1717_vm4, %v4939_v8, 0 }
 0x1b8   : > { %5499 = vmatmul.mubr.msk.bf16.vlgmr.msra.gmra.mrb[12].mxu1 %vm1670_vm2, %v1962_v15 }
 0x1b9   : > { %5504 = vmatprep.mubr.msk.bf16.mxu1 %vm1670_vm2, %v1954_v17  ;;  %5503 = vmatpush3.bf16.msra.mxu1 %v2030_v16 }
 0x1ba   : > { %6010 = vmatprep.subr.msk.bf16.mxu1 %vm1717_vm4, %v4930_v18 }
 0x1c4   : > { %5505 = vmatmul.mubr.msk.bf16.vlgmr.msra.gmra.mrb[12].mxu1 %vm1670_vm2, %v1955_v23 }
 0x1c5   : > { %5510 = vmatprep.mubr.msk.bf16.mxu1 %vm1670_vm2, %v2085_v25  ;;  %5509 = vmatpush3.bf16.msra.mxu1 %v2096_v24 }
 0x1c6   : > { %6011 = vmatprep.subr.msk.bf16.mxu1 %vm1717_vm4, %v4934_v29 }
 0x1d0   : > { %5511 = vmatmul.mubr.msk.bf16.vlgmr.msra.gmra.mrb[12].mxu1 %vm1670_vm2, %v2086_v28 }
 0x1d1   : > { %5515 = vmatpush3.bf16.msra.mxu1 %v2184_v30 }
 0x1d2   : > { %6012 = vmatprep.subr.msk.bf16.mxu1 %vm1717_vm4, %v2168_v31 }
 0x283   : > { %v5494_v33 = vpop.f32.mrb[8].mxu1 }
 0x284   : > { %v1911_v35 = vadd.f32 %v5494_v33, %v4920_v32  ;;  %v1883_v36 = vpop.f32.mrb[9].mxu1 }
 0x285   : > { %v1909_v38 = vadd.f32 %v4920_v32, %v1883_v36  ;;  %v5495_v39 = vpop.f32.mrb[10].mxu1 }
 0x286   : > { %v4923_v40 = vmul.f32 -1.442695, %v1911_v35  ;;  %v1912_v41 = vadd.f32 %v5495_v39, %v4920_v32  ;;  %v1886_v42 = vpop.f32.mrb[11].mxu1 }
 0x287   : > { %v4921_v43 = vmul.f32 -1.442695, %v1909_v38  ;;  %v1910_v44 = vadd.f32 %v4920_v32, %v1886_v42 }
 0x288   : > { %6181 = vpow2.f32 %v4923_v40  ;;  %v4924_v45 = vmul.f32 -1.442695, %v1912_v41 }
 0x289   : > { %6183 = vpow2.f32 %v4921_v43  ;;  %v4922_v46 = vmul.f32 -1.442695, %v1910_v44 }
 0x28a   : > { %6185 = vpow2.f32 %v4924_v45 }
 0x28b   : > { %6187 = vpow2.f32 %v4922_v46 }
 0x292   : > { %v6182_v47 = vpop.eup %6181 }
 0x293   : > { %v6184_v48 = vpop.eup %6183  ;;  %v1927_v49 = vadd.f32 1.0, %v6182_v47 }
 0x294   : > { %v6186_v50 = vpop.eup %6185  ;;  %v1925_v51 = vadd.f32 1.0, %v6184_v48 }
 0x295   : > { %v6188_v52 = vpop.eup %6187  ;;  %6189 = vrcp.f32 %v1927_v49  ;;  %v1928_v53 = vadd.f32 1.0, %v6186_v50 }
 0x296   : > { %6191 = vrcp.f32 %v1925_v51  ;;  %v1926_v54 = vadd.f32 1.0, %v6188_v52 }
 0x297   : > { %6193 = vrcp.f32 %v1928_v53 }
 0x298   : > { %6195 = vrcp.f32 %v1926_v54 }
 0x29f   : > { %v6190_v55 = vpop.eup %6189 }
 0x2a0   : > { %v6192_v56 = vpop.eup %6191  ;;  %v1939_v57 = vmul.f32 %v6190_v55, %v1911_v35 }
 0x2a1   : > { %v6194_v58 = vpop.eup %6193  ;;  %v1937_v59 = vmul.f32 %v6192_v56, %v1909_v38 }
 0x2a2   : > { %v6196_v60 = vpop.eup %6195  ;;  %1948 = vst.msk [vmem:[#allocation3 + $0x11] sm:$0xff] %vm1670_vm2, %v1939_v57  ;;  %v1940_v61 = vmul.f32 %v6194_v58, %v1912_v41  ;;  %v6055_v58 = vld [vmem:[%s6337_s14] sm:$0xff]  }
 0x2a3   : > { %1946 = vst.msk [vmem:[#allocation3 + $0x1] sm:$0xff] %vm1670_vm2, %v1937_v59  ;;  %v1938_v62 = vmul.f32 %v6196_v60, %v1910_v44 }
 0x2a4   : > { %1949 = vst.msk [vmem:[#allocation3 + $0x19] sm:$0xff] %vm1670_vm2, %v1940_v61 }
 0x2a5   : > { %1947 = vst.msk [vmem:[#allocation3 + $0x9] sm:$0xff] %vm1670_vm2, %v1938_v62  ;;  %v6056_v62 = vld [vmem:[%s6337_s14 + $0x10] sm:$0xff]  }
 0x2a9   : > { %v2171_v37 = vld [vmem:[#allocation3 + $0x11] sm:$0xff] }
 0x2aa   : > { %v2169_v0 = vld [vmem:[#allocation3 + $0x1] sm:$0xff] }
 0x2ab   : > { %v2172_v63 = vld [vmem:[#allocation3 + $0x19] sm:$0xff] }
 0x2ac   : > { %v2170_v1 = vld [vmem:[#allocation3 + $0x9] sm:$0xff]  ;;  %v2174_v4 = vpack.c.bf16 %v2172_v63, %v2171_v37  ;;  %v2162_v6 = vld [vmem:[#allocation3] sm:$0xff]  ;;  %v2165_v10 = vld [vmem:[#allocation3 + $0x18] sm:$0xff] }
 0x2ad   : > { %v2163_v2 = vld [vmem:[#allocation3 + $0x8] sm:$0xff]  ;;  %v2173_v3 = vpack.c.bf16 %v2170_v1, %v2169_v0  ;;  %v2164_v9 = vld [vmem:[#allocation3 + $0x10] sm:$0xff]  ;;  %v2296_v17 = vld [vmem:[#allocation3 + $0x1a] sm:$0xff] }
 0x2ae   : > { %v2166_v7 = vpack.c.bf16 %v2163_v2, %v2162_v6  ;;  %v2293_v11 = vld [vmem:[#allocation3 + $0x2] sm:$0xff]  ;;  %v2294_v12 = vld [vmem:[#allocation3 + $0xa] sm:$0xff]  ;;  %v2167_v13 = vpack.c.bf16 %v2165_v10, %v2164_v9  ;;  %v2295_v16 = vld [vmem:[#allocation3 + $0x12] sm:$0xff] }
 0x2af   : > { %5516 = vmatprep.mubr.msk.bf16.mxu1 %vm1670_vm2, %v2173_v3  ;;  %v2297_v15 = vpack.c.bf16 %v2294_v12, %v2293_v11  ;;  %v2298_v18 = vpack.c.bf16 %v2296_v17, %v2295_v16  ;;  %v6057_v2 = vld [vmem:[%s6357_s6 + $0x8] sm:$0xff]   ;;  %v6059_v9 = vld [vmem:[%s6357_s6 + $0x10] sm:$0xff]  }
 0x2b0   : > { %5517 = vmatmul.mubr.msk.bf16.vlgmr.msra.gmra.mrb[12].mxu1 %vm1670_vm2, %v2174_v4 }
 0x2b1   : > { %5521 = vmatpush3.bf16.msra.mxu1 %v2242_v5  ;;  %5522 = vmatprep.mubr.msk.bf16.mxu1 %vm1670_vm2, %v2166_v7  ;;  %v6058_v5 = vld [vmem:[%s6357_s6] sm:$0xff]  }
 0x2b2   : > { %6013 = vmatprep.subr.msk.bf16.mxu1 %vm1717_vm4, %v4939_v8 }
 0x2bc   : > { %5523 = vmatmul.mubr.msk.bf16.vlgmr.msra.gmra.mrb[12].mxu1 %vm1670_vm2, %v2167_v13 }
 0x2bd   : > { %5527 = vmatpush3.bf16.msra.mxu1 %v2308_v14  ;;  %5528 = vmatprep.mubr.msk.bf16.mxu1 %vm1670_vm2, %v2297_v15  ;;  %v6060_v14 = vld [vmem:[%s6347_s24 + $0x8] sm:$0xff]  }
 0x2be   : > { %5532 = vmatprep.subr.bf16.mxu1 %v6282_v34 }
 0x2c8   : > { %5529 = vmatmul.mubr.msk.bf16.vlgmr.msra.gmra.mrb[12].mxu1 %vm1670_vm2, %v2298_v18 }
 0x2c9   : > { %5534 = vmatprep.mubr.msk.bf16.mxu1 %vm6283_vm7, %v6282_v34  ;;  %5533 = vmatpush3.bf16.msra.mxu1 %v6054_v19 }
 0x2ca   : > { %5538 = vmatprep.subr.bf16.mxu1 %v6282_v34 }
 0x39b   : > { %v5530_v21 = vpop.f32.mrb[12].mxu1 }
 0x39c   : > { %v5854_v23 = vadd.f32 %v5530_v21, %v4933_v20  ;;  %v2344_v24 = vpop.f32.mrb[13].mxu1 }
 0x39d   : > { %v5856_v25 = vadd.f32 %v4933_v20, %v2344_v24  ;;  %v5531_v26 = vpop.f32.mrb[14].mxu1 }
 0x39e   : > { %v5855_v27 = vadd.f32 %v5854_v23, %v4942_v22  ;;  %v5858_v28 = vadd.f32 %v5531_v26, %v4933_v20  ;;  %v2347_v29 = vpop.f32.mrb[15].mxu1  ;;  %v4957_v26 = vld [vmem:[%s6342_s19] ss:$0 sm:$0xff] }
 0x39f   : > { %v5857_v30 = vadd.f32 %v5856_v25, %v4942_v22  ;;  %v5860_v31 = vadd.f32 %v4933_v20, %v2347_v29 }
 0x3a0   : > { %v4945_v32 = vmul.f32 -1.442695, %v5855_v27  ;;  %v5859_v33 = vadd.f32 %v5858_v28, %v4942_v22 }
 0x3a1   : > { %v4943_v35 = vmul.f32 -1.442695, %v5857_v30  ;;  %v5861_v36 = vadd.f32 %v5860_v31, %v4942_v22 }
 0x3a2   : > { %6197 = vpow2.f32 %v4945_v32  ;;  %v4946_v38 = vmul.f32 -1.442695, %v5859_v33 }
 0x3a3   : > { %6199 = vpow2.f32 %v4943_v35  ;;  %v4944_v39 = vmul.f32 -1.442695, %v5861_v36 }
 0x3a4   : > { %6201 = vpow2.f32 %v4946_v38 }
 0x3a5   : > { %6203 = vpow2.f32 %v4944_v39 }
 0x3ac   : > { %v6198_v40 = vpop.eup %6197 }
 0x3ad   : > { %v6200_v41 = vpop.eup %6199  ;;  %v2392_v42 = vadd.f32 1.0, %v6198_v40 }
 0x3ae   : > { %v6202_v43 = vpop.eup %6201  ;;  %v2390_v44 = vadd.f32 1.0, %v6200_v41 }
 0x3af   : > { %v6204_v45 = vpop.eup %6203  ;;  %6205 = vrcp.f32 %v2392_v42  ;;  %v2393_v46 = vadd.f32 1.0, %v6202_v43 }
 0x3b0   : > { %6207 = vrcp.f32 %v2390_v44  ;;  %v2391_v47 = vadd.f32 1.0, %v6204_v45 }
 0x3b1   : > { %6209 = vrcp.f32 %v2393_v46 }
 0x3b2   : > { %6211 = vrcp.f32 %v2391_v47 }
 0x3b9   : > { %v6206_v48 = vpop.eup %6205 }
 0x3ba   : > { %v6208_v49 = vpop.eup %6207  ;;  %v2404_v50 = vmul.f32 %v6206_v48, %v5855_v27  ;;  %v6061_v48 = vld [vmem:[%s6347_s24] sm:$0xff]  }
 0x3bb   : > { %v6210_v51 = vpop.eup %6209  ;;  %v2402_v52 = vmul.f32 %v6208_v49, %v5857_v30 }
 0x3bc   : > { %v6212_v53 = vpop.eup %6211  ;;  %2415 = vst.msk [vmem:[#allocation4 + $0x11] sm:$0xff] %vm2406_vm5, %v2404_v50  ;;  %v2405_v54 = vmul.f32 %v6210_v51, %v5859_v33 }
 0x3bd   : > { %2413 = vst.msk [vmem:[#allocation4 + $0x1] sm:$0xff] %vm2406_vm5, %v2402_v52  ;;  %v2403_v55 = vmul.f32 %v6212_v53, %v5861_v36  ;;  %v6062_v52 = vld [vmem:[%s6347_s24 + $0x10] sm:$0xff]  }
 0x3be   : > { %2416 = vst.msk [vmem:[#allocation4 + $0x19] sm:$0xff] %vm2406_vm5, %v2405_v54 }
 0x3bf   : > { %2414 = vst.msk [vmem:[#allocation4 + $0x9] sm:$0xff] %vm2406_vm5, %v2403_v55 }
 0x3c5   : > { %v2426_v56 = vld [vmem:[#allocation4 + $0x11] ss:$2 sm:$0xff]  ;;  %v2534_v1 = vld [vmem:[#allocation4 + $0x12] ss:$2 sm:$0xff] }
 0x3c6   : > { %v2424_v57 = vld [vmem:[#allocation4 + $0x1] ss:$2 sm:$0xff]  ;;  %v2417_v60 = vld [vmem:[#allocation4] ss:$2 sm:$0xff]  ;;  %v2419_v61 = vld [vmem:[#allocation4 + $0x10] ss:$2 sm:$0xff] }
 0x3c7   : > { %v2427_v59 = vpack.c.bf16 %v2426_v56, %v2424_v57  ;;  %v2420_v63 = vpack.c.bf16 %v2419_v61, %v2417_v60  ;;  %v2532_v0 = vld [vmem:[#allocation4 + $0x2] ss:$2 sm:$0xff]  ;;  %v2624_v37 = vld [vmem:[#allocation4 + $0x1] ss:$2 sm:$0xff]  ;;  %v2625_v4 = vld [vmem:[#allocation4 + $0x11] ss:$2 sm:$0xff] }
 0x3c8   : > { %v2535_v3 = vpack.c.bf16 %v2534_v1, %v2532_v0  ;;  %v2626_v6 = vpack.c.bf16 %v2625_v4, %v2624_v37  ;;  %v2619_v7 = vld [vmem:[#allocation4] ss:$2 sm:$0xff]  ;;  %v2620_v8 = vld [vmem:[#allocation4 + $0x10] ss:$2 sm:$0xff] }
 0x3c9   : > { %5535 = vmatmul.mubr.msk.bf16.vlgmr.msra.gmra.mrb[16].mxu1 %vm2406_vm5, %v2427_v59  ;;  %v2621_v10 = vpack.c.bf16 %v2620_v8, %v2619_v7  ;;  %v2730_v11 = vld [vmem:[#allocation4 + $0x2] ss:$2 sm:$0xff]  ;;  %v2731_v12 = vld [vmem:[#allocation4 + $0x12] ss:$2 sm:$0xff] }
 0x3ca   : > { %5539 = vmatpush3.bf16.msra.mxu1 %v6055_v58  ;;  %5540 = vmatprep.mubr.msk.bf16.mxu1 %vm6283_vm7, %v6282_v34  ;;  %v2732_v13 = vpack.c.bf16 %v2731_v12, %v2730_v11  ;;  %v6063_v57 = vld [vmem:[%s6367_s20 + $0x10] sm:$0xff]   ;;  %v6064_v58 = vld [vmem:[%s6367_s20 + $0x18] sm:$0xff]   ;;  %v4970_v59 = vld [vmem:[%s7001_s15] ss:$0 sm:$0xff]  ;;  %s7012_s15 = sld [smem:[#allocation21_spill]] }
 0x3cb   : > { %5544 = vmatprep.subr.bf16.mxu1 %v6282_v34  ;;  %5587 = vmatpush3.bf16.msra.mxu0 %v6063_v57  ;;  %v4981_v61 = vld [vmem:[%s7002_s16] ss:$0 sm:$0xff]  ;;  %s898_s16 = scalar_lea.vmem %s6437_s4, %s7014_s10 }
 0x3cc   : > { %5588 = vmatprep.subr.bf16.mxu0 %v6282_v34 }
 0x3cf   : > { %5589 = vmatpush3.bf16.msra.mxu0 %v6064_v58 }
 0x3d0   : > { %5594 = vmatprep.subr.bf16.mxu0 %v6282_v34 }
 0x3d1   : > { %5541 = vmatmul.mubr.msk.bf16.vlgmr.msra.gmra.mrb[20].mxu1 %vm2406_vm5, %v2420_v63 }
 0x3d2   : > { %5545 = vmatpush3.bf16.msra.mxu1 %v6056_v62  ;;  %5546 = vmatprep.mubr.msk.bf16.mxu1 %vm6283_vm7, %v6282_v34 }
 0x3d3   : > { %5550 = vmatprep.subr.bf16.mxu1 %v6282_v34 }
 0x3d9   : > { %5547 = vmatmul.mubr.msk.bf16.vlgmr.msra.gmra.mrb[24].mxu1 %vm2406_vm5, %v2535_v3 }
 0x3da   : > { %5551 = vmatpush3.bf16.msra.mxu1 %v6057_v2  ;;  %5552 = vmatprep.mubr.msk.bf16.mxu1 %vm6283_vm7, %v6282_v34 }
 0x3db   : > { %5556 = vmatprep.subr.bf16.mxu1 %v6282_v34 }
 0x3e1   : > { %5553 = vmatmul.mubr.msk.bf16.vlgmr.msra.gmra.mrb[28].mxu1 %vm2406_vm5, %v2626_v6 }
 0x3e2   : > { %5557 = vmatpush3.bf16.msra.mxu1 %v6058_v5  ;;  %5558 = vmatprep.mubr.msk.bf16.mxu1 %vm6283_vm7, %v6282_v34 }
 0x3e3   : > { %5562 = vmatprep.subr.bf16.mxu1 %v6282_v34 }
 0x3ed   : > { %5559 = vmatmul.mubr.msk.bf16.vlgmr.msra.gmra.mrb[28].mxu1 %vm2406_vm5, %v2621_v10 }
 0x3ee   : > { %5563 = vmatpush3.bf16.msra.mxu1 %v6059_v9  ;;  %5564 = vmatprep.mubr.msk.bf16.mxu1 %vm6283_vm7, %v6282_v34 }
 0x3ef   : > { %5568 = vmatprep.subr.bf16.mxu1 %v6282_v34 }
 0x3f9   : > { %5565 = vmatmul.mubr.msk.bf16.vlgmr.msra.gmra.mrb[28].mxu1 %vm2406_vm5, %v2732_v13 }
 0x3fa   : > { %5570 = vmatprep.mubr.msk.bf16.mxu1 %vm6283_vm7, %v6282_v34  ;;  %5569 = vmatpush3.bf16.msra.mxu1 %v6060_v14 }
 0x3fb   : > { %5574 = vmatprep.subr.bf16.mxu1 %v6282_v34 }
 0x49c   : > { %v2474_v15 = vpop.f32.mrb[16].mxu1 }
 0x49d   : > { %v5536_v16 = vpop.f32.mrb[17].mxu1 }
 0x49e   : > { %v2477_v17 = vpop.f32.mrb[18].mxu1 }
 0x49f   : > { %v5537_v18 = vpop.f32.mrb[19].mxu1 }
 0x4a4   : > { %v2524_v19 = vpop.f32.mrb[20].mxu1 }
 0x4a5   : > { %v2525_v20 = vadd.f32 %v2524_v19, %v2474_v15  ;;  %v5542_v21 = vpop.f32.mrb[21].mxu1  ;;  %v6065_v15 = vld [vmem:[%s6367_s20] sm:$0xff]  }
 0x4a6   : > { %v2527_v22 = vpop.f32.mrb[22].mxu1  ;;  %v6067_v19 = vld [vmem:[%s6367_s20 + $0x20] sm:$0xff]   ;;  %v6068_v21 = vld [vmem:[%s6367_s20 + $0x28] sm:$0xff]  }
 0x4a7   : > { %v2528_v23 = vadd.f32 %v2527_v22, %v2477_v17  ;;  %v5543_v24 = vpop.f32.mrb[23].mxu1  ;;  %v6066_v17 = vld [vmem:[%s6367_s20 + $0x8] sm:$0xff]  }
 0x4ac   : > { %v2582_v25 = vpop.f32.mrb[24].mxu1 }
 0x4ad   : > { %v2589_v27 = vadd.f32 %v2582_v25, %v2525_v20  ;;  %v5548_v28 = vpop.f32.mrb[25].mxu1  ;;  %v6070_v25 = vld [vmem:[%s7003_s18 + $0x18] sm:$0xff]  }
 0x4ae   : > { %v2585_v29 = vpop.f32.mrb[26].mxu1 }
 0x4af   : > { %v2598_v30 = vadd.f32 %v4957_v26, %v2589_v27  ;;  %v2590_v31 = vadd.f32 %v2585_v29, %v2528_v23  ;;  %v5549_v32 = vpop.f32.mrb[27].mxu1  ;;  %v6069_v23 = vld [vmem:[%s7003_s18 + $0x10] sm:$0xff]   ;;  %v6071_v27 = vld [vmem:[%s7003_s18] sm:$0xff]   ;;  %v6072_v29 = vld [vmem:[%s7003_s18 + $0x8] sm:$0xff]  }
 0x4b1   : > { %v4958_v33 = vmul.f32 -1.442695, %v2598_v30  ;;  %v2599_v35 = vadd.f32 %v4957_v26, %v2590_v31  ;;  %v6073_v31 = vld [vmem:[%s7003_s18 + $0x20] sm:$0xff]  }
 0x4b3   : > { %6213 = vpow2.f32 %v4958_v33  ;;  %v4959_v36 = vmul.f32 -1.442695, %v2599_v35  ;;  %v6074_v33 = vld [vmem:[%s7003_s18 + $0x28] sm:$0xff]  }
 0x4b5   : > { %6215 = vpow2.f32 %v4959_v36 }
 0x4bd   : > { %v6214_v38 = vpop.eup %6213 }
 0x4be   : > { %v2606_v39 = vadd.f32 1.0, %v6214_v38  ;;  %v6075_v38 = vld [vmem:[%s7004_s22 + $0x10] sm:$0xff]  }
 0x4bf   : > { %v6216_v40 = vpop.eup %6215 }
 0x4c0   : > { %6217 = vrcp.f32 %v2606_v39  ;;  %v2607_v41 = vadd.f32 1.0, %v6216_v40  ;;  %v6076_v39 = vld [vmem:[%s7004_s22 + $0x18] sm:$0xff]  }
 0x4c2   : > { %6219 = vrcp.f32 %v2607_v41 }
 0x4ca   : > { %v6218_v42 = vpop.eup %6217 }
 0x4cb   : > { %v2612_v43 = vmul.f32 %v6218_v42, %v2598_v30 }
 0x4cc   : > { %v6220_v44 = vpop.eup %6219 }
 0x4cd   : > { %2617 = vst.msk [vmem:[#allocation5 + $0x1] sm:$0xff] %vm2406_vm5, %v2612_v43  ;;  %v2613_v45 = vmul.f32 %v6220_v44, %v2599_v35 }
 0x4cf   : > { %2618 = vst.msk [vmem:[#allocation5 + $0x9] sm:$0xff] %vm2406_vm5, %v2613_v45 }
 0x4d4   : > { %v2802_v46 = vld [vmem:[#allocation5 + $0x1] sm:$0xff] }
 0x4d5   : > { %v2797_v51 = vld [vmem:[#allocation5] sm:$0xff] }
 0x4d6   : > { %v2803_v47 = vld [vmem:[#allocation5 + $0x9] sm:$0xff] }
 0x4d7   : > { %v2804_v49 = vpack.c.bf16 %v2803_v47, %v2802_v46  ;;  %v2798_v50 = vld [vmem:[#allocation5 + $0x8] sm:$0xff] }
 0x4d8   : > { %v2799_v53 = vpack.c.bf16 %v2798_v50, %v2797_v51  ;;  %v2908_v54 = vld [vmem:[#allocation5 + $0x2] sm:$0xff]  ;;  %v2909_v55 = vld [vmem:[#allocation5 + $0xa] sm:$0xff] }
 0x4d9   : > { %5571 = vmatmul.mubr.msk.bf16.vlgmr.msra.gmra.mrb[28].mxu1 %vm2406_vm5, %v2804_v49  ;;  %v2910_v56 = vpack.c.bf16 %v2909_v55, %v2908_v54  ;;  %v5001_v50 = vld [vmem:[%s7005_s23] ss:$0 sm:$0xff] }
 0x4da   : > { %5575 = vmatpush3.bf16.msra.mxu1 %v6061_v48  ;;  %5576 = vmatprep.mubr.msk.bf16.mxu1 %vm6283_vm7, %v6282_v34 }
 0x4db   : > { %5580 = vmatprep.subr.bf16.mxu1 %v6282_v34 }
 0x4e5   : > { %5577 = vmatmul.mubr.msk.bf16.vlgmr.msra.gmra.mrb[28].mxu1 %vm2406_vm5, %v2799_v53 }
 0x4e6   : > { %5581 = vmatpush3.bf16.msra.mxu1 %v6062_v52  ;;  %5582 = vmatprep.mubr.msk.bf16.mxu1 %vm6283_vm7, %v6282_v34 }
 0x4e7   : > { %5658 = vmatprep.subr.bf16.mxu1 %v6282_v34 }
 0x4f1   : > { %5583 = vmatmul.mubr.msk.bf16.vlgmr.msra.gmra.mrb[28].mxu1 %vm2406_vm5, %v2910_v56 }
 0x4f2   : > { %5666 = vmatprep.mubr.msk.bf16.mxu1 %vm6283_vm7, %v6282_v34 }
 0x5c4   : > { %v2957_v60 = vpop.f32.mrb[28].mxu1 }
 0x5c5   : > { %v5862_v62 = vadd.f32 %v4970_v59, %v2957_v60  ;;  %v5584_v63 = vpop.f32.mrb[29].mxu1 }
 0x5c6   : > { %v2960_v0 = vpop.f32.mrb[30].mxu1 }
 0x5c7   : > { %v5863_v1 = vadd.f32 %v5862_v62, %v4981_v61  ;;  %v5864_v2 = vadd.f32 %v4970_v59, %v2960_v0  ;;  %v5585_v3 = vpop.f32.mrb[31].mxu1  ;;  %v6077_v62 = vld [vmem:[%s7004_s22] sm:$0xff]   ;;  %v6078_v0 = vld [vmem:[%s7004_s22 + $0x8] sm:$0xff]  }
 0x5c9   : > { %v4982_v37 = vmul.f32 -1.442695, %v5863_v1  ;;  %v5865_v4 = vadd.f32 %v5864_v2, %v4981_v61  ;;  %v6079_v2 = vld [vmem:[%s7004_s22 + $0x20] sm:$0xff]  }
 0x5cb   : > { %6221 = vpow2.f32 %v4982_v37  ;;  %v4983_v5 = vmul.f32 -1.442695, %v5865_v4  ;;  %v6080_v37 = vld [vmem:[%s7004_s22 + $0x28] sm:$0xff]  }
 0x5cd   : > { %6223 = vpow2.f32 %v4983_v5 }
 0x5d5   : > { %v6222_v6 = vpop.eup %6221 }
 0x5d6   : > { %v2983_v7 = vadd.f32 1.0, %v6222_v6  ;;  %v6081_v6 = vld [vmem:[%s7006_s26 + $0x20] sm:$0xff]  }
 0x5d7   : > { %v6224_v8 = vpop.eup %6223  ;;  %5659 = vmatpush3.bf16.msra.mxu1 %v6081_v6  ;;  %v5071_v6 = vld [vmem:[%s7011_s11] ss:$0 sm:$0xff] }
 0x5d8   : > { %6225 = vrcp.f32 %v2983_v7  ;;  %v2984_v9 = vadd.f32 1.0, %v6224_v8  ;;  %v6082_v7 = vld [vmem:[%s7007_s28 + $0x20] sm:$0xff]   ;;  %5660 = vmatprep.subr.bf16.mxu1 %v6282_v34  ;;  %v6083_v8 = vld [vmem:[%s7006_s26 + $0x28] sm:$0xff]  }
 0x5da   : > { %6227 = vrcp.f32 %v2984_v9  ;;  %v6084_v9 = vld [vmem:[%s7007_s28 + $0x28] sm:$0xff]  }
 0x5db   : > { %5661 = vmatpush3.bf16.msra.mxu1 %v6083_v8 }
 0x5dc   : > { %5662 = vmatprep.subr.bf16.mxu1 %v6282_v34 }
 0x5e2   : > { %v6226_v10 = vpop.eup %6225 }
 0x5e3   : > { %v2989_v11 = vmul.f32 %v6226_v10, %v5863_v1  ;;  %v6085_v10 = vld [vmem:[%s7006_s26 + $0x30] sm:$0xff]  }
 0x5e4   : > { %v6228_v12 = vpop.eup %6227  ;;  %5663 = vmatpush3.bf16.msra.mxu1 %v6085_v10 }
 0x5e5   : > { %2996 = vst.msk [vmem:[#allocation6 + $0x1] sm:$0xff] %vm2991_vm8, %v2989_v11  ;;  %v2990_v13 = vmul.f32 %v6228_v12, %v5865_v4  ;;  %v6086_v11 = vld [vmem:[%s7007_s28 + $0x30] sm:$0xff]   ;;  %v6087_v12 = vld [vmem:[%s7006_s26 + $0x38] sm:$0xff]   ;;  %5664 = vmatprep.subr.bf16.mxu1 %v6282_v34 }
 0x5e7   : > { %2997 = vst.msk [vmem:[#allocation6 + $0x9] sm:$0xff] %vm2991_vm8, %v2990_v13  ;;  %v6088_v13 = vld [vmem:[%s7007_s28 + $0x38] sm:$0xff]  }
 0x5e8   : > { %5665 = vmatpush3.bf16.msra.mxu1 %v6087_v12 }
 0x5e9   : > { %5670 = vmatprep.subr.bf16.mxu1 %v6282_v34 }
 0x5ee   : > { %v3005_v14 = vld [vmem:[#allocation6 + $0x1] ss:$2 sm:$0xff]  ;;  %v2998_v18 = vld [vmem:[#allocation6] ss:$2 sm:$0xff] }
 0x5ef   : > { %v3006_v16 = vpack.c.bf16 %v3005_v14, %v3005_v14  ;;  %v2999_v20 = vpack.c.bf16 %v2998_v18, %v2998_v18  ;;  %v3123_v22 = vld [vmem:[#allocation6 + $0x2] ss:$2 sm:$0xff]  ;;  %v3210_v26 = vld [vmem:[#allocation6 + $0x1] ss:$2 sm:$0xff] }
 0x5f0   : > { %v3124_v24 = vpack.c.bf16 %v3123_v22, %v3123_v22  ;;  %v3211_v28 = vpack.c.bf16 %v3210_v26, %v3210_v26  ;;  %v3204_v30 = vld [vmem:[#allocation6] ss:$2 sm:$0xff]  ;;  %v5020_v14 = vld [vmem:[%s7008_s1] ss:$0 sm:$0xff] }
 0x5f1   : > { %5591 = vmatmul.mubr.msk.bf16.vlgmr.msra.gmra.mrb[8].mxu0 %vm2991_vm8, %v3006_v16  ;;  %v3205_v32 = vpack.c.bf16 %v3204_v30, %v3204_v30  ;;  %v3327_v35 = vld [vmem:[#allocation6 + $0x2] ss:$2 sm:$0xff] }
 0x5f2   : > { %5595 = vmatpush3.bf16.msra.mxu0 %v6065_v15  ;;  %5598 = vmatprep.mubr.msk.bf16.mxu0 %vm6283_vm7, %v6282_v34  ;;  %v3328_v36 = vpack.c.bf16 %v3327_v35, %v3327_v35  ;;  %v5038_v16 = vld [vmem:[%s7009_s2] ss:$0 sm:$0xff]  ;;  %v6092_v35 = vld [vmem:[%s7007_s28 + $0x8] sm:$0xff]  }
 0x5f3   : > { %5596 = vmatprep.subr.bf16.mxu0 %v6282_v34 }
 0x5f6   : > { %5597 = vmatpush3.bf16.msra.mxu0 %v6066_v17 }
 0x5f7   : > { %5602 = vmatprep.subr.bf16.mxu0 %v6282_v34 }
 0x5f9   : > { %5599 = vmatmul.mubr.msk.bf16.vlgmr.msra.gmra.mrb[12].mxu0 %vm2991_vm8, %v2999_v20 }
 0x5fa   : > { %5603 = vmatpush3.bf16.msra.mxu0 %v6067_v19  ;;  %5606 = vmatprep.mubr.msk.bf16.mxu0 %vm6283_vm7, %v6282_v34 }
 0x5fb   : > { %5604 = vmatprep.subr.bf16.mxu0 %v6282_v34 }
 0x5fe   : > { %5605 = vmatpush3.bf16.msra.mxu0 %v6068_v21 }
 0x5ff   : > { %5610 = vmatprep.subr.bf16.mxu0 %v6282_v34 }
 0x601   : > { %5607 = vmatmul.mubr.msk.bf16.vlgmr.msra.gmra.mrb[16].mxu0 %vm2991_vm8, %v3124_v24 }
 0x602   : > { %5611 = vmatpush3.bf16.msra.mxu0 %v6069_v23  ;;  %5614 = vmatprep.mubr.msk.bf16.mxu0 %vm6283_vm7, %v6282_v34 }
 0x603   : > { %5612 = vmatprep.subr.bf16.mxu0 %v6282_v34 }
 0x606   : > { %5613 = vmatpush3.bf16.msra.mxu0 %v6070_v25 }
 0x607   : > { %5618 = vmatprep.subr.bf16.mxu0 %v6282_v34 }
 0x609   : > { %5615 = vmatmul.mubr.msk.bf16.vlgmr.msra.gmra.mrb[20].mxu0 %vm2991_vm8, %v3211_v28  ;;  %v6090_v28 = vld [vmem:[%s7007_s28] sm:$0xff]  }
 0x60a   : > { %5619 = vmatpush3.bf16.msra.mxu0 %v6071_v27  ;;  %5622 = vmatprep.mubr.msk.bf16.mxu0 %vm6283_vm7, %v6282_v34  ;;  %v6089_v27 = vld [vmem:[%s7006_s26] sm:$0xff]  }
 0x60b   : > { %5620 = vmatprep.subr.bf16.mxu0 %v6282_v34 }
 0x60e   : > { %5621 = vmatpush3.bf16.msra.mxu0 %v6072_v29 }
 0x60f   : > { %5626 = vmatprep.subr.bf16.mxu0 %v6282_v34 }
 0x615   : > { %5623 = vmatmul.mubr.msk.bf16.vlgmr.msra.gmra.mrb[20].mxu0 %vm2991_vm8, %v3205_v32 }
 0x616   : > { %5627 = vmatpush3.bf16.msra.mxu0 %v6073_v31  ;;  %5630 = vmatprep.mubr.msk.bf16.mxu0 %vm6283_vm7, %v6282_v34 }
 0x617   : > { %5628 = vmatprep.subr.bf16.mxu0 %v6282_v34 }
 0x61a   : > { %5629 = vmatpush3.bf16.msra.mxu0 %v6074_v33  ;;  %v6091_v33 = vld [vmem:[%s7006_s26 + $0x8] sm:$0xff]  }
 0x61b   : > { %5634 = vmatprep.subr.bf16.mxu0 %v6282_v34 }
 0x621   : > { %5631 = vmatmul.mubr.msk.bf16.vlgmr.msra.gmra.mrb[20].mxu0 %vm2991_vm8, %v3328_v36  ;;  %v6093_v36 = vld [vmem:[%s7006_s26 + $0x10] sm:$0xff]  }
 0x622   : > { %5638 = vmatprep.mubr.msk.bf16.mxu0 %vm6283_vm7, %v6282_v34  ;;  %5635 = vmatpush3.bf16.msra.mxu0 %v6075_v38  ;;  %v6094_v38 = vld [vmem:[%s7007_s28 + $0x10] sm:$0xff]  }
 0x623   : > { %5636 = vmatprep.subr.bf16.mxu0 %v6282_v34 }
 0x626   : > { %5637 = vmatpush3.bf16.msra.mxu0 %v6076_v39  ;;  %v6095_v39 = vld [vmem:[%s7006_s26 + $0x18] sm:$0xff]  }
 0x627   : > { %5642 = vmatprep.subr.bf16.mxu0 %v6282_v34 }
 0x6c4   : > { %v3061_v40 = vpop.f32.mrb[8].mxu0 }
 0x6c5   : > { %v5592_v41 = vpop.f32.mrb[9].mxu0 }
 0x6c6   : > { %v3064_v42 = vpop.f32.mrb[10].mxu0 }
 0x6c7   : > { %v5593_v43 = vpop.f32.mrb[11].mxu0 }
 0x6c8   : > { %v6097_v43 = vld [vmem:[%s7006_s26 + $0x40] sm:$0xff]  }
 0x6cc   : > { %v3116_v44 = vpop.f32.mrb[12].mxu0 }
 0x6cd   : > { %v3117_v45 = vadd.f32 %v3116_v44, %v3061_v40  ;;  %v5600_v46 = vpop.f32.mrb[13].mxu0  ;;  %v6096_v40 = vld [vmem:[%s7007_s28 + $0x18] sm:$0xff]   ;;  %v6098_v44 = vld [vmem:[%s7007_s28 + $0x40] sm:$0xff]  }
 0x6ce   : > { %v3119_v47 = vpop.f32.mrb[14].mxu0 }
 0x6cf   : > { %v5601_v48 = vpop.f32.mrb[15].mxu0  ;;  %v6099_v47 = vld [vmem:[%s7006_s26 + $0x48] sm:$0xff]  }
 0x6d0   : > { %v6100_v48 = vld [vmem:[%s7007_s28 + $0x48] sm:$0xff]  }
 0x6d4   : > { %v3179_v49 = vpop.f32.mrb[16].mxu0 }
 0x6d5   : > { %v3185_v51 = vadd.f32 %v3179_v49, %v3117_v45  ;;  %v5608_v52 = vpop.f32.mrb[17].mxu0  ;;  %v6101_v49 = vld [vmem:[%s7006_s26 + $0x50] sm:$0xff]  }
 0x6d6   : > { %v3182_v53 = vpop.f32.mrb[18].mxu0  ;;  %v6104_v52 = vld [vmem:[%s7007_s28 + $0x58] sm:$0xff]  }
 0x6d7   : > { %v3193_v54 = vadd.f32 %v5001_v50, %v3185_v51  ;;  %v5609_v55 = vpop.f32.mrb[19].mxu0  ;;  %v6102_v50 = vld [vmem:[%s7007_s28 + $0x50] sm:$0xff]   ;;  %v6103_v51 = vld [vmem:[%s7006_s26 + $0x58] sm:$0xff]  }
 0x6d9   : > { %v5002_v56 = vmul.f32 -1.442695, %v3193_v54 }
 0x6db   : > { %6229 = vpow2.f32 %v5002_v56 }
 0x6e5   : > { %v6230_v57 = vpop.eup %6229 }
 0x6e6   : > { %v3197_v58 = vadd.f32 1.0, %v6230_v57  ;;  %v6105_v57 = vld [vmem:[%s7010_s0 + $0x20] sm:$0xff]  }
 0x6e8   : > { %6231 = vrcp.f32 %v3197_v58  ;;  %v6106_v58 = vld [vmem:[%s7010_s0 + $0x28] sm:$0xff]  }
 0x6f2   : > { %v6232_v59 = vpop.eup %6231 }
 0x6f3   : > { %v3200_v60 = vmul.f32 %v6232_v59, %v3193_v54  ;;  %v6107_v59 = vld [vmem:[%s7010_s0 + $0x30] sm:$0xff]  }
 0x6f5   : > { %3203 = vst.msk [vmem:[#allocation7 + $0x1] sm:$0xff] %vm2991_vm8, %v3200_v60  ;;  %v6108_v60 = vld [vmem:[%s7010_s0 + $0x38] sm:$0xff]  }
 0x6fc   : > { %v3404_v61 = vld [vmem:[#allocation7 + $0x1] sm:$0xff] }
 0x6fd   : > { %v3405_v63 = vpack.c.bf16 %v3404_v61, %v3404_v61  ;;  %v3398_v1 = vld [vmem:[#allocation7] sm:$0xff] }
 0x6fe   : > { %v3399_v3 = vpack.c.bf16 %v3398_v1, %v3398_v1  ;;  %v3521_v4 = vld [vmem:[#allocation7 + $0x2] sm:$0xff] }
 0x6ff   : > { %5639 = vmatmul.mubr.msk.bf16.vlgmr.msra.gmra.mrb[20].mxu0 %vm2991_vm8, %v3405_v63  ;;  %v3522_v5 = vpack.c.bf16 %v3521_v4, %v3521_v4 }
 0x700   : > { %5643 = vmatpush3.bf16.msra.mxu0 %v6077_v62  ;;  %5646 = vmatprep.mubr.msk.bf16.mxu0 %vm6283_vm7, %v6282_v34 }
 0x701   : > { %5644 = vmatprep.subr.bf16.mxu0 %v6282_v34 }
 0x704   : > { %5645 = vmatpush3.bf16.msra.mxu0 %v6078_v0 }
 0x705   : > { %5650 = vmatprep.subr.bf16.mxu0 %v6282_v34 }
 0x70b   : > { %5647 = vmatmul.mubr.msk.bf16.vlgmr.msra.gmra.mrb[20].mxu0 %vm2991_vm8, %v3399_v3 }
 0x70c   : > { %5651 = vmatpush3.bf16.msra.mxu0 %v6079_v2  ;;  %5654 = vmatprep.mubr.msk.bf16.mxu0 %vm6283_vm7, %v6282_v34 }
 0x70d   : > { %5652 = vmatprep.subr.bf16.mxu0 %v6282_v34 }
 0x710   : > { %5653 = vmatpush3.bf16.msra.mxu0 %v6080_v37 }
 0x711   : > { %5694 = vmatprep.subr.bf16.mxu0 %v6282_v34 }
 0x717   : > { %5655 = vmatmul.mubr.msk.bf16.vlgmr.msra.gmra.mrb[20].mxu0 %vm2991_vm8, %v3522_v5 }
 0x718   : > { %5702 = vmatprep.mubr.msk.bf16.mxu0 %vm6283_vm7, %v6282_v34  ;;  %5695 = vmatpush3.bf16.msra.mxu0 %v6082_v7 }
 0x719   : > { %5696 = vmatprep.subr.bf16.mxu0 %v6282_v34 }
 0x71c   : > { %5697 = vmatpush3.bf16.msra.mxu0 %v6084_v9 }
 0x71d   : > { %5698 = vmatprep.subr.bf16.mxu0 %v6282_v34 }
 0x720   : > { %5699 = vmatpush3.bf16.msra.mxu0 %v6086_v11 }
 0x721   : > { %5700 = vmatprep.subr.bf16.mxu0 %v6282_v34 }
 0x724   : > { %5701 = vmatpush3.bf16.msra.mxu0 %v6088_v13 }
 0x725   : > { %5706 = vmatprep.subr.bf16.mxu0 %v6282_v34 }
 0x7ea   : > { %v3577_v15 = vpop.f32.mrb[20].mxu0 }
 0x7eb   : > { %v5866_v17 = vadd.f32 %v5020_v14, %v3577_v15  ;;  %v5656_v18 = vpop.f32.mrb[21].mxu0 }
 0x7ec   : > { %v3580_v19 = vpop.f32.mrb[22].mxu0  ;;  %v6109_v18 = vld [vmem:[%s7010_s0] sm:$0xff]  }
 0x7ed   : > { %v5867_v20 = vadd.f32 %v5866_v17, %v5038_v16  ;;  %v5657_v21 = vpop.f32.mrb[23].mxu0 }
 0x7ee   : > { %v6111_v21 = vld [vmem:[%s7010_s0 + $0x10] sm:$0xff]  }
 0x7ef   : > { %v5039_v22 = vmul.f32 -1.442695, %v5867_v20 }
 0x7f1   : > { %6233 = vpow2.f32 %v5039_v22  ;;  %v6112_v22 = vld [vmem:[%s7010_s0 + $0x18] sm:$0xff]  }
 0x7fb   : > { %v6234_v23 = vpop.eup %6233 }
 0x7fc   : > { %v3596_v24 = vadd.f32 1.0, %v6234_v23 }
 0x7fe   : > { %6235 = vrcp.f32 %v3596_v24  ;;  %v6113_v24 = vld [vmem:[%s7010_s0 + $0x40] sm:$0xff]  }
 0x808   : > { %v6236_v25 = vpop.eup %6235 }
 0x809   : > { %v3599_v26 = vmul.f32 %v6236_v25, %v5867_v20  ;;  %v6110_v20 = vld [vmem:[%s7010_s0 + $0x8] sm:$0xff]  }
 0x80b   : > { %3604 = vst.msk [vmem:[#allocation8 + $0x1] sm:$0xff] %vm3600_vm10, %v3599_v26  ;;  %v6114_v26 = vld [vmem:[%s7010_s0 + $0x48] sm:$0xff]  }
 0x812   : > { %v3616_v29 = vld [vmem:[#allocation8 + $0x1] ss:$2 sm:$0xf]  ;;  %v3605_v41 = vld [vmem:[#allocation8] ss:$2 sm:$0xf] }
 0x813   : > { %v3870_v30 = vld [vmem:[#allocation8 + $0x1] ss:$2 sm:$0xf]  ;;  %v3617_v31 = vpack.c.bf16 %v3616_v29, %v3616_v29  ;;  %v3860_v42 = vld [vmem:[#allocation8] ss:$2 sm:$0xf]  ;;  %v3606_v45 = vpack.c.bf16 %v3605_v41, %v3605_v41 }
 0x814   : > { %v3871_v32 = vpack.c.bf16 %v3870_v30, %v3870_v30  ;;  %v3861_v46 = vpack.c.bf16 %v3860_v42, %v3860_v42  ;;  %v3762_v53 = vld [vmem:[#allocation8 + $0x2] ss:$2 sm:$0xf] }
 0x815   : > { %5667 = vmatmul.mubr.msk.bf16.vlgmr.msra.gmra.mrb[32].mxu1 %vm3600_vm10, %v3617_v31  ;;  %v4015_v54 = vld [vmem:[#allocation8 + $0x2] ss:$2 sm:$0xf]  ;;  %v3763_v55 = vpack.c.bf16 %v3762_v53, %v3762_v53 }
 0x816   : > { %5703 = vmatmul.mubr.msk.bf16.vlgmr.msra.gmra.mrb[24].mxu0 %vm3600_vm10, %v3871_v32  ;;  %5671 = vmatpush3.bf16.msra.mxu1 %v6089_v27  ;;  %v4016_v56 = vpack.c.bf16 %v4015_v54, %v4015_v54  ;;  %v6115_v27 = vld [vmem:[%s7010_s0 + $0x50] sm:$0xff]   ;;  %v6117_v31 = vld [vmem:[%s6427_s12 + $0x40] sm:$0xff]  }
 0x817   : > { %5707 = vmatpush3.bf16.msra.mxu0 %v6090_v28  ;;  %5672 = vmatprep.subr.bf16.mxu1 %v6282_v34  ;;  %v6116_v28 = vld [vmem:[%s7010_s0 + $0x58] sm:$0xff]   ;;  %v6118_v32 = vld [vmem:[%s6427_s12 + $0xc0] sm:$0xff]  }
 0x818   : > { %5708 = vmatprep.subr.bf16.mxu0 %v6282_v34  ;;  %5678 = vmatprep.mubr.msk.bf16.mxu1 %vm6283_vm7, %v6282_v34  ;;  %v6125_v41 = vld [vmem:[%s6427_s12 + $0x60] sm:$0xff]  }
 0x819   : > { %5714 = vmatprep.mubr.msk.bf16.mxu0 %vm6283_vm7, %v6282_v34  ;;  %v6126_v42 = vld [vmem:[%s6427_s12 + $0xe0] sm:$0xff]  }
 0x81a   : > { %5673 = vmatpush3.bf16.msra.mxu1 %v6091_v33  ;;  %v6119_v33 = vld [vmem:[%s6427_s12 + $0x48] sm:$0xff]  }
 0x81b   : > { %5709 = vmatpush3.bf16.msra.mxu0 %v6092_v35  ;;  %5674 = vmatprep.subr.bf16.mxu1 %v6282_v34  ;;  %v6120_v35 = vld [vmem:[%s6427_s12 + $0xc8] sm:$0xff]  }
 0x81c   : > { %5710 = vmatprep.subr.bf16.mxu0 %v6282_v34 }
 0x81e   : > { %5675 = vmatpush3.bf16.msra.mxu1 %v6093_v36  ;;  %v6121_v36 = vld [vmem:[%s6427_s12 + $0x50] sm:$0xff]  }
 0x81f   : > { %5711 = vmatpush3.bf16.msra.mxu0 %v6094_v38  ;;  %5676 = vmatprep.subr.bf16.mxu1 %v6282_v34  ;;  %v6122_v38 = vld [vmem:[%s6427_s12 + $0xd0] sm:$0xff]  }
 0x820   : > { %5712 = vmatprep.subr.bf16.mxu0 %v6282_v34 }
 0x822   : > { %5677 = vmatpush3.bf16.msra.mxu1 %v6095_v39  ;;  %v6123_v39 = vld [vmem:[%s6427_s12 + $0x58] sm:$0xff]  }
 0x823   : > { %5713 = vmatpush3.bf16.msra.mxu0 %v6096_v40  ;;  %5682 = vmatprep.subr.bf16.mxu1 %v6282_v34  ;;  %v6124_v40 = vld [vmem:[%s6427_s12 + $0xd8] sm:$0xff]  }
 0x824   : > { %5718 = vmatprep.subr.bf16.mxu0 %v6282_v34 }
 0x825   : > { %5679 = vmatmul.mubr.msk.bf16.vlgmr.msra.gmra.mrb[36].mxu1 %vm3600_vm10, %v3606_v45  ;;  %v6129_v45 = vld [vmem:[%s6427_s12 + $0x70] sm:$0xff]  }
 0x826   : > { %5715 = vmatmul.mubr.msk.bf16.vlgmr.msra.gmra.mrb[24].mxu0 %vm3600_vm10, %v3861_v46  ;;  %5683 = vmatpush3.bf16.msra.mxu1 %v6097_v43  ;;  %v6127_v43 = vld [vmem:[%s6427_s12 + $0x68] sm:$0xff]   ;;  %v6130_v46 = vld [vmem:[%s6427_s12 + $0xf0] sm:$0xff]  }
 0x827   : > { %5719 = vmatpush3.bf16.msra.mxu0 %v6098_v44  ;;  %5684 = vmatprep.subr.bf16.mxu1 %v6282_v34  ;;  %v6128_v44 = vld [vmem:[%s6427_s12 + $0xe8] sm:$0xff]  }
 0x828   : > { %5720 = vmatprep.subr.bf16.mxu0 %v6282_v34  ;;  %5690 = vmatprep.mubr.msk.bf16.mxu1 %vm6283_vm7, %v6282_v34 }
 0x829   : > { %5726 = vmatprep.mubr.msk.bf16.mxu0 %vm6283_vm7, %v6282_v34 }
 0x82a   : > { %5685 = vmatpush3.bf16.msra.mxu1 %v6099_v47  ;;  %v6131_v47 = vld [vmem:[%s6427_s12 + $0x78] sm:$0xff]  }
 0x82b   : > { %5721 = vmatpush3.bf16.msra.mxu0 %v6100_v48  ;;  %5686 = vmatprep.subr.bf16.mxu1 %v6282_v34  ;;  %v6132_v48 = vld [vmem:[%s6427_s12 + $0xf8] sm:$0xff]  }
 0x82c   : > { %5722 = vmatprep.subr.bf16.mxu0 %v6282_v34 }
 0x82e   : > { %5687 = vmatpush3.bf16.msra.mxu1 %v6101_v49  ;;  %v5104_v49 = vld [vmem:[%s6422_s30] ss:$0 sm:$0xff] }
 0x82f   : > { %5723 = vmatpush3.bf16.msra.mxu0 %v6102_v50  ;;  %5688 = vmatprep.subr.bf16.mxu1 %v6282_v34 }
 0x830   : > { %5724 = vmatprep.subr.bf16.mxu0 %v6282_v34 }
 0x832   : > { %5689 = vmatpush3.bf16.msra.mxu1 %v6103_v51  ;;  %v5136_v51 = vld [vmem:[%s7012_s15] ss:$0 sm:$0xff] }
 0x833   : > { %5725 = vmatpush3.bf16.msra.mxu0 %v6104_v52  ;;  %5766 = vmatprep.subr.bf16.mxu1 %v6282_v34 }
 0x834   : > { %5730 = vmatprep.subr.bf16.mxu0 %v6282_v34 }
 0x835   : > { %5691 = vmatmul.mubr.msk.bf16.vlgmr.msra.gmra.mrb[40].mxu1 %vm3600_vm10, %v3763_v55 }
 0x836   : > { %5727 = vmatmul.mubr.msk.bf16.vlgmr.msra.gmra.mrb[24].mxu0 %vm3600_vm10, %v4016_v56  ;;  %5782 = vmatprep.mubr.msk.bf16.mxu1 %vm6283_vm7, %v6282_v34 }
 0x837   : > { %5738 = vmatprep.mubr.msk.bf16.mxu0 %vm6283_vm7, %v6282_v34  ;;  %5731 = vmatpush3.bf16.msra.mxu0 %v6105_v57 }
 0x838   : > { %5732 = vmatprep.subr.bf16.mxu0 %v6282_v34  ;;  %5767 = vmatpush3.bf16.msra.mxu1 %v6117_v31 }
 0x839   : > { %5768 = vmatprep.subr.bf16.mxu1 %v6282_v34 }
 0x83b   : > { %5733 = vmatpush3.bf16.msra.mxu0 %v6106_v58 }
 0x83c   : > { %5734 = vmatprep.subr.bf16.mxu0 %v6282_v34  ;;  %5769 = vmatpush3.bf16.msra.mxu1 %v6119_v33 }
 0x83d   : > { %5770 = vmatprep.subr.bf16.mxu1 %v6282_v34 }
 0x83f   : > { %5735 = vmatpush3.bf16.msra.mxu0 %v6107_v59 }
 0x840   : > { %5736 = vmatprep.subr.bf16.mxu0 %v6282_v34  ;;  %5771 = vmatpush3.bf16.msra.mxu1 %v6121_v36 }
 0x841   : > { %5772 = vmatprep.subr.bf16.mxu1 %v6282_v34 }
 0x843   : > { %5737 = vmatpush3.bf16.msra.mxu0 %v6108_v60 }
 0x844   : > { %5742 = vmatprep.subr.bf16.mxu0 %v6282_v34  ;;  %5773 = vmatpush3.bf16.msra.mxu1 %v6123_v39 }
 0x845   : > { %5774 = vmatprep.subr.bf16.mxu1 %v6282_v34 }
 0x848   : > { %5775 = vmatpush3.bf16.msra.mxu1 %v6125_v41 }
 0x849   : > { %5776 = vmatprep.subr.bf16.mxu1 %v6282_v34 }
 0x84c   : > { %5777 = vmatpush3.bf16.msra.mxu1 %v6127_v43 }
 0x84d   : > { %5778 = vmatprep.subr.bf16.mxu1 %v6282_v34 }
 0x850   : > { %5779 = vmatpush3.bf16.msra.mxu1 %v6129_v45 }
 0x851   : > { %5780 = vmatprep.subr.bf16.mxu1 %v6282_v34 }
 0x854   : > { %5781 = vmatpush3.bf16.msra.mxu1 %v6131_v47 }
 0x855   : > { %5786 = vmatprep.subr.bf16.mxu1 %v6282_v34 }
 0x8e8   : > { %v3688_v61 = vpop.f32.mrb[32].mxu1 }
 0x8e9   : > { %v5668_v62 = vpop.f32.mrb[33].mxu1 }
 0x8ea   : > { %v3691_v63 = vpop.f32.mrb[34].mxu1 }
 0x8eb   : > { %v5669_v0 = vpop.f32.mrb[35].mxu1  ;;  %v6133_v63 = vld [vmem:[%s6427_s12] sm:$0xff]  }
 0x8f8   : > { %v3755_v1 = vpop.f32.mrb[36].mxu1 }
 0x8f9   : > { %v3756_v2 = vadd.f32 %v3755_v1, %v3688_v61  ;;  %v5680_v3 = vpop.f32.mrb[37].mxu1 }
 0x8fa   : > { %v3758_v37 = vpop.f32.mrb[38].mxu1  ;;  %v6134_v3 = vld [vmem:[%s6427_s12 + $0x8] sm:$0xff]  }
 0x8fb   : > { %v5681_v4 = vpop.f32.mrb[39].mxu1  ;;  %v6135_v37 = vld [vmem:[%s6427_s12 + $0x10] sm:$0xff]  }
 0x8fc   : > { %v6136_v4 = vld [vmem:[%s6427_s12 + $0x18] sm:$0xff]  }
 0x908   : > { %v3834_v5 = vpop.f32.mrb[40].mxu1 }
 0x909   : > { %v3840_v7 = vadd.f32 %v3834_v5, %v3756_v2  ;;  %v5692_v8 = vpop.f32.mrb[41].mxu1  ;;  %v6137_v5 = vld [vmem:[%s6427_s12 + $0x20] sm:$0xff]  }
 0x90a   : > { %v3837_v9 = vpop.f32.mrb[42].mxu1  ;;  %v6140_v8 = vld [vmem:[%s6427_s12 + $0x38] sm:$0xff]  }
 0x90b   : > { %v3848_v10 = vadd.f32 %v5071_v6, %v3840_v7  ;;  %v5693_v11 = vpop.f32.mrb[43].mxu1  ;;  %v6138_v6 = vld [vmem:[%s6427_s12 + $0x28] sm:$0xff]   ;;  %v6139_v7 = vld [vmem:[%s6427_s12 + $0x30] sm:$0xff]  }
 0x90d   : > { %v5072_v12 = vmul.f32 -1.442695, %v3848_v10 }
 0x90f   : > { %6237 = vpow2.f32 %v5072_v12  ;;  %v6142_v12 = vld [vmem:[%s6427_s12 + $0x88] sm:$0xff]  }
 0x919   : > { %v6238_v13 = vpop.eup %6237 }
 0x91a   : > { %v3852_v14 = vadd.f32 1.0, %v6238_v13  ;;  %v6143_v13 = vld [vmem:[%s6427_s12 + $0x90] sm:$0xff]  }
 0x91c   : > { %6239 = vrcp.f32 %v3852_v14  ;;  %v6144_v14 = vld [vmem:[%s6427_s12 + $0x98] sm:$0xff]  }
 0x926   : > { %v6240_v15 = vpop.eup %6239 }
 0x927   : > { %v3855_v16 = vmul.f32 %v6240_v15, %v3848_v10  ;;  %v6141_v10 = vld [vmem:[%s6427_s12 + $0x80] sm:$0xff]  }
 0x928   : > { %v6145_v15 = vld [vmem:[%s6427_s12 + $0xa0] sm:$0xff]  }
 0x929   : > { %3859 = vst.msk [vmem:[#allocation9 + $0x1] sm:$0xf] %vm3858_vm13, %v3855_v16  ;;  %v6146_v16 = vld [vmem:[%s6427_s12 + $0xa8] sm:$0xff]  }
 0x930   : > { %v4112_v17 = vld [vmem:[#allocation9 + $0x1] sm:$0xf] }
 0x931   : > { %v4113_v19 = vpack.c.bf16 %v4112_v17, %v4112_v17  ;;  %v4102_v23 = vld [vmem:[#allocation9] sm:$0xf]  ;;  %v6147_v17 = vld [vmem:[%s6427_s12 + $0xb0] sm:$0xff]  }
 0x932   : > { %v4103_v25 = vpack.c.bf16 %v4102_v23, %v4102_v23  ;;  %v4257_v29 = vld [vmem:[#allocation9 + $0x2] sm:$0xf] }
 0x933   : > { %5739 = vmatmul.mubr.msk.bf16.vlgmr.msra.gmra.mrb[24].mxu0 %vm3600_vm10, %v4113_v19  ;;  %v4258_v30 = vpack.c.bf16 %v4257_v29, %v4257_v29 }
 0x934   : > { %5743 = vmatpush3.bf16.msra.mxu0 %v6109_v18  ;;  %5750 = vmatprep.mubr.msk.bf16.mxu0 %vm6283_vm7, %v6282_v34  ;;  %v6148_v18 = vld [vmem:[%s6427_s12 + $0xb8] sm:$0xff]  }
 0x935   : > { %5744 = vmatprep.subr.bf16.mxu0 %v6282_v34 }
 0x938   : > { %5745 = vmatpush3.bf16.msra.mxu0 %v6110_v20 }
 0x939   : > { %5746 = vmatprep.subr.bf16.mxu0 %v6282_v34 }
 0x93c   : > { %5747 = vmatpush3.bf16.msra.mxu0 %v6111_v21 }
 0x93d   : > { %5748 = vmatprep.subr.bf16.mxu0 %v6282_v34 }
 0x940   : > { %5749 = vmatpush3.bf16.msra.mxu0 %v6112_v22 }
 0x941   : > { %5754 = vmatprep.subr.bf16.mxu0 %v6282_v34 }
 0x943   : > { %5751 = vmatmul.mubr.msk.bf16.vlgmr.msra.gmra.mrb[24].mxu0 %vm3600_vm10, %v4103_v25 }
 0x944   : > { %5755 = vmatpush3.bf16.msra.mxu0 %v6113_v24  ;;  %5762 = vmatprep.mubr.msk.bf16.mxu0 %vm6283_vm7, %v6282_v34 }
 0x945   : > { %5756 = vmatprep.subr.bf16.mxu0 %v6282_v34 }
 0x948   : > { %5757 = vmatpush3.bf16.msra.mxu0 %v6114_v26 }
 0x949   : > { %5758 = vmatprep.subr.bf16.mxu0 %v6282_v34 }
 0x94c   : > { %5759 = vmatpush3.bf16.msra.mxu0 %v6115_v27 }
 0x94d   : > { %5760 = vmatprep.subr.bf16.mxu0 %v6282_v34 }
 0x950   : > { %5761 = vmatpush3.bf16.msra.mxu0 %v6116_v28 }
 0x951   : > { %5826 = vmatprep.subr.bf16.mxu0 %v6282_v34 }
 0x953   : > { %5763 = vmatmul.mubr.msk.bf16.vlgmr.msra.gmra.mrb[24].mxu0 %vm3600_vm10, %v4258_v30 }
 0x954   : > { %5842 = vmatprep.mubr.msk.bf16.mxu0 %vm6283_vm7, %v6282_v34  ;;  %5827 = vmatpush3.bf16.msra.mxu0 %v6118_v32 }
 0x955   : > { %5828 = vmatprep.subr.bf16.mxu0 %v6282_v34 }
 0x958   : > { %5829 = vmatpush3.bf16.msra.mxu0 %v6120_v35 }
 0x959   : > { %5830 = vmatprep.subr.bf16.mxu0 %v6282_v34 }
 0x95c   : > { %5831 = vmatpush3.bf16.msra.mxu0 %v6122_v38  ;;  %v4783_v38 = vld [vmem:[%s6432_s27] sm:$0x1] }
 0x95d   : > { %5832 = vmatprep.subr.bf16.mxu0 %v6282_v34 }
 0x960   : > { %5833 = vmatpush3.bf16.msra.mxu0 %v6124_v40 }
 0x961   : > { %5834 = vmatprep.subr.bf16.mxu0 %v6282_v34 }
 0x964   : > { %5835 = vmatpush3.bf16.msra.mxu0 %v6126_v42 }
 0x965   : > { %5836 = vmatprep.subr.bf16.mxu0 %v6282_v34 }
 0x968   : > { %5837 = vmatpush3.bf16.msra.mxu0 %v6128_v44 }
 0x969   : > { %5838 = vmatprep.subr.bf16.mxu0 %v6282_v34 }
 0x96c   : > { %5839 = vmatpush3.bf16.msra.mxu0 %v6130_v46 }
 0x96d   : > { %5840 = vmatprep.subr.bf16.mxu0 %v6282_v34 }
 0x970   : > { %5841 = vmatpush3.bf16.msra.mxu0 %v6132_v48 }
 0xa26   : > { %v4329_v50 = vpop.f32.mrb[24].mxu0 }
 0xa27   : > { %v5868_v52 = vadd.f32 %v5104_v49, %v4329_v50  ;;  %v5764_v53 = vpop.f32.mrb[25].mxu0 }
 0xa28   : > { %v4332_v54 = vpop.f32.mrb[26].mxu0 }
 0xa29   : > { %v5869_v55 = vadd.f32 %v5868_v52, %v5136_v51  ;;  %v5765_v56 = vpop.f32.mrb[27].mxu0 }
 0xa2b   : > { %v5137_v57 = vmul.f32 -1.442695, %v5869_v55 }
 0xa2d   : > { %6241 = vpow2.f32 %v5137_v57 }
 0xa37   : > { %v6242_v58 = vpop.eup %6241 }
 0xa38   : > { %v4348_v59 = vadd.f32 1.0, %v6242_v58 }
 0xa3a   : > { %6243 = vrcp.f32 %v4348_v59 }
 0xa44   : > { %v6244_v60 = vpop.eup %6243 }
 0xa45   : > { %v4351_v61 = vmul.f32 %v6244_v60, %v5869_v55 }
 0xa47   : > { %4353 = vst [vmem:[#allocation10 + $0x1] sm:$0xf] %v4351_v61 }
 0xa4e   : > { %v4372_v62 = vld [vmem:[#allocation10 + $0x2] sm:$0x1]  ;;  %v4675_v0 = vld [vmem:[#allocation10 + $0x4] sm:$0x1]  ;;  %v4354_v9 = vld [vmem:[#allocation10 + $0x1] sm:$0x1] }
 0xa4f   : > { %v4373_v1 = vpack.c.bf16 %v4372_v62, %v4372_v62  ;;  %v4676_v2 = vpack.c.bf16 %v4675_v0, %v4675_v0  ;;  %v4355_v11 = vpack.c.bf16 %v4354_v9, %v4354_v9  ;;  %v4567_v19 = vld [vmem:[#allocation10 + $0x3] sm:$0x1] }
 0xa50   : > { %v4568_v20 = vpack.c.bf16 %v4567_v19, %v4567_v19 }
 0xa51   : > { %5783 = vmatmul.mubr.bf16.vlgmr.msra.gmra.mrb[44].mxu1 %v4373_v1  ;;  %5843 = vmatmul.mubr.bf16.vlgmr.msra.gmra.mrb[28].mxu0 %v4676_v2 }
 0xa52   : > { %5787 = vmatpush3.bf16.msra.mxu1 %v6133_v63  ;;  %5802 = vmatprep.mubr.msk.bf16.mxu1 %vm6283_vm7, %v6282_v34 }
 0xa53   : > { %5788 = vmatprep.subr.bf16.mxu1 %v6282_v34 }
 0xa56   : > { %5789 = vmatpush3.bf16.msra.mxu1 %v6134_v3 }
 0xa57   : > { %5790 = vmatprep.subr.bf16.mxu1 %v6282_v34 }
 0xa5a   : > { %5791 = vmatpush3.bf16.msra.mxu1 %v6135_v37 }
 0xa5b   : > { %5792 = vmatprep.subr.bf16.mxu1 %v6282_v34 }
 0xa5e   : > { %5793 = vmatpush3.bf16.msra.mxu1 %v6136_v4 }
 0xa5f   : > { %5794 = vmatprep.subr.bf16.mxu1 %v6282_v34 }
 0xa62   : > { %5795 = vmatpush3.bf16.msra.mxu1 %v6137_v5 }
 0xa63   : > { %5796 = vmatprep.subr.bf16.mxu1 %v6282_v34 }
 0xa66   : > { %5797 = vmatpush3.bf16.msra.mxu1 %v6138_v6 }
 0xa67   : > { %5798 = vmatprep.subr.bf16.mxu1 %v6282_v34 }
 0xa6a   : > { %5799 = vmatpush3.bf16.msra.mxu1 %v6139_v7 }
 0xa6b   : > { %5800 = vmatprep.subr.bf16.mxu1 %v6282_v34 }
 0xa6e   : > { %5801 = vmatpush3.bf16.msra.mxu1 %v6140_v8 }
 0xa6f   : > { %5806 = vmatprep.subr.bf16.mxu1 %v6282_v34 }
 0xa71   : > { %5803 = vmatmul.mubr.bf16.vlgmr.msra.gmra.mrb[48].mxu1 %v4355_v11 }
 0xa72   : > { %5807 = vmatpush3.bf16.msra.mxu1 %v6141_v10  ;;  %5822 = vmatprep.mubr.msk.bf16.mxu1 %vm6283_vm7, %v6282_v34 }
 0xa73   : > { %5808 = vmatprep.subr.bf16.mxu1 %v6282_v34 }
 0xa76   : > { %5809 = vmatpush3.bf16.msra.mxu1 %v6142_v12 }
 0xa77   : > { %5810 = vmatprep.subr.bf16.mxu1 %v6282_v34 }
 0xa7a   : > { %5811 = vmatpush3.bf16.msra.mxu1 %v6143_v13 }
 0xa7b   : > { %5812 = vmatprep.subr.bf16.mxu1 %v6282_v34 }
 0xa7e   : > { %5813 = vmatpush3.bf16.msra.mxu1 %v6144_v14 }
 0xa7f   : > { %5814 = vmatprep.subr.bf16.mxu1 %v6282_v34 }
 0xa82   : > { %5815 = vmatpush3.bf16.msra.mxu1 %v6145_v15 }
 0xa83   : > { %5816 = vmatprep.subr.bf16.mxu1 %v6282_v34 }
 0xa86   : > { %5817 = vmatpush3.bf16.msra.mxu1 %v6146_v16 }
 0xa87   : > { %5818 = vmatprep.subr.bf16.mxu1 %v6282_v34 }
 0xa8a   : > { %5819 = vmatpush3.bf16.msra.mxu1 %v6147_v17 }
 0xa8b   : > { %5820 = vmatprep.subr.bf16.mxu1 %v6282_v34 }
 0xa8e   : > { %5821 = vmatpush3.bf16.msra.mxu1 %v6148_v18 }
 0xa91   : > { %5823 = vmatmul.mubr.bf16.vlgmr.msra.gmra.mrb[52].mxu1 %v4568_v20 }
 0xb24   : > { %v4473_v21 = vpop.f32.mrb[44].mxu1  ;;  %v4776_v22 = vpop.f32.mrb[28].mxu0 }
 0xb25   : > { %v5784_v23 = vpop.f32.mrb[45].mxu1  ;;  %v5844_v24 = vpop.f32.mrb[29].mxu0 }
 0xb26   : > { %v4476_v25 = vpop.f32.mrb[46].mxu1  ;;  %v4779_v26 = vpop.f32.mrb[30].mxu0 }
 0xb27   : > { %v5785_v27 = vpop.f32.mrb[47].mxu1  ;;  %v5845_v28 = vpop.f32.mrb[31].mxu0 }
 0xb44   : > { %v4561_v29 = vpop.f32.mrb[48].mxu1 }
 0xb45   : > { %v4562_v30 = vadd.f32 %v4561_v29, %v4473_v21  ;;  %v5804_v31 = vpop.f32.mrb[49].mxu1 }
 0xb46   : > { %v4564_v32 = vpop.f32.mrb[50].mxu1 }
 0xb47   : > { %v5805_v34 = vpop.f32.mrb[51].mxu1 }
 0xb64   : > { %v4668_v33 = vpop.f32.mrb[52].mxu1 }
 0xb65   : > { %v4674_v35 = vadd.f32 %v4668_v33, %v4562_v30  ;;  %v5824_v36 = vpop.f32.mrb[53].mxu1 }
 0xb66   : > { %v4671_v39 = vpop.f32.mrb[54].mxu1 }
 0xb67   : > { %v4782_v40 = vadd.f32 %v4776_v22, %v4674_v35  ;;  %v5825_v41 = vpop.f32.mrb[55].mxu1 }
 0xb69   : > { %v4784_v42 = vadd.f32 %v4783_v38, %v4782_v40 }
 0xb6b   : > { %4786 = vst.msk [vmem:[%s898_s16] sm:$0x1] %vm4785_vm14, %v4784_v42 }
 0xb6c PF: > { %s69_s7 = sadd.s32 1, %s6251_s7  }
 0xb6d   : > { %p66_p4 = scmp.ge.s32.totalorder %s69_s7, 4  }
 0xb6f   :  { %68 = sbr.rel (!%p66_p4) target bundleno = 43 (0x2b), region = 248 }

</bundles_post_ra>
